<compile_context>
chip_gen: v7x
topology: tpu7x:2x2x1
jax: 0.10.0
libtpu: 0.0.40
codegen_flags: <defaults>
</compile_context>

<pallas_src>
import functools
import math

import jax
import jax.numpy as jnp
from jax.experimental import pallas as pl
from jax.experimental.pallas import tpu as pltpu


HPARAMS = dict(
    rows=4, columns=4, channels=3,
    num_features=32,
    hidden_size=32, filter_size=64, num_layers=2,
    attn_num_heads=4, attn_type='global',
    total_key_depth=0, total_value_depth=0,   # 0 -> fall back to hidden_size
    decoder_dropout=0.0, distr='cat',
)


# ----------------------------- in-kernel helpers -----------------------------

def _erf(x):
    # Abramowitz & Stegun 7.1.26 (exp + polynomial only; Mosaic-friendly).
    a1, a2, a3, a4, a5 = 0.254829592, -0.284496736, 1.421413741, -1.453152027, 1.061405429
    p = 0.3275911
    sgn = jnp.where(x < 0.0, -1.0, 1.0).astype(jnp.float32)
    ax = jnp.abs(x)
    t = 1.0 / (1.0 + p * ax)
    poly = ((((a5 * t + a4) * t + a3) * t + a2) * t + a1) * t
    return sgn * (1.0 - poly * jnp.exp(-ax * ax))


def _gelu(x):
    # exact (erf-based) GELU, matching torch.nn.GELU default
    return 0.5 * x * (1.0 + _erf(x * (1.0 / math.sqrt(2.0))))


def _layernorm(x, gamma, beta, eps=1e-6):
    # torch.nn.LayerNorm(eps=1e-06), biased variance
    mu = jnp.mean(x, axis=-1, keepdims=True)
    var = jnp.mean(jnp.square(x - mu), axis=-1, keepdims=True)
    return (x - mu) * jax.lax.rsqrt(var + eps) * gamma + beta


# ----------------------------- fused forward kernel --------------------------

def _fused_forward_kernel(x_ref, ts_ref, bias_ref,
                          wq_ref, wk_ref, wv_ref, wo_ref,
                          ga_ref, ba_ref, w1_ref, b1_ref, w2_ref, b2_ref,
                          gf_ref, bf_ref,
                          wout_ref, gout_ref, bout_ref,
                          o_ref, *, num_layers, num_heads, num_features):
    x = x_ref[0] + ts_ref[...]                      # (S, H), timing signal added in-kernel
    S, H = x.shape
    bias = bias_ref[...]                            # (S, S) causal bias (constant input)

    for l in range(num_layers):                     # static unroll, L = 2
        # ---- multi-head attention, heads batched on a leading axis ----
        xb = jnp.broadcast_to(x, (num_heads, S, H))           # (h, S, H)
        qh = jnp.einsum('hsk,hkd->hsd', xb, wq_ref[l],
                        preferred_element_type=jnp.float32)   # (h, S, hd) (scale folded in wq)
        kh = jnp.einsum('hsk,hkd->hsd', xb, wk_ref[l],
                        preferred_element_type=jnp.float32)
        vh = jnp.einsum('hsk,hkd->hsd', xb, wv_ref[l],
                        preferred_element_type=jnp.float32)

        logits = jnp.einsum('hqd,hkd->hqk', qh, kh,
                            preferred_element_type=jnp.float32) + bias   # (h, S, S)
        m = jnp.max(logits, axis=-1, keepdims=True)
        e = jnp.exp(logits - m)
        denom = jnp.sum(e, axis=-1, keepdims=True)
        probs = e * pl.reciprocal(denom, approx=True)          # EUP reciprocal

        ctx = jnp.einsum('hqk,hkd->hqd', probs, vh,
                         preferred_element_type=jnp.float32)   # (h, S, hd)
        yh = jnp.einsum('hqd,hdm->hqm', ctx, wo_ref[l],
                        preferred_element_type=jnp.float32)    # (h, S, H)
        y = jnp.sum(yh, axis=0)                                # (S, H)

        # residual + layernorm (dropout is identity at inference)
        x = _layernorm(y + x, ga_ref[l], ba_ref[l])

        # ---- FFN: Linear -> GELU -> Linear ----
        h1 = _gelu(jnp.dot(x, w1_ref[l], preferred_element_type=jnp.float32) + b1_ref[l])
        h2 = jnp.dot(h1, w2_ref[l], preferred_element_type=jnp.float32) + b2_ref[l]
        x = _layernorm(h2 + x, gf_ref[l], bf_ref[l])

    # ---- fused output projection: y[n] = sum_{s,d} x[s,d] * Wout[s*H+d, n] ----
    # wout_ref holds Wout reshaped to (S, H*NF) so that column (d*NF + n) pairs with x[:, d].
    NF = num_features
    z = jax.lax.dot_general(x, wout_ref[...], (((0,), (0,)), ((), ())),
                            preferred_element_type=jnp.float32)      # (H, H*NF)
    d_idx = jax.lax.broadcasted_iota(jnp.int32, z.shape, 0)
    j_idx = jax.lax.broadcasted_iota(jnp.int32, z.shape, 1)
    keep = (j_idx >= d_idx * NF) & (j_idx < (d_idx + 1) * NF)
    zm = jnp.where(keep, z, 0.0)
    zc = jnp.sum(zm, axis=0, keepdims=True)                          # (1, H*NF)
    width = H * NF
    while width > NF:                                                # log2 lane fold
        width //= 2
        zc = zc[:, :width] + zc[:, width:]
    yo = _gelu(zc)                                                   # (1, NF)
    o_ref[0] = _layernorm(yo, gout_ref[...], bout_ref[...])


def fused_forward(h0, p, hp):
    B, S, H = h0.shape
    L = hp['num_layers']
    heads = hp['attn_num_heads']
    NF = hp['num_features']
    F_ = hp['filter_size']
    kd = hp['total_key_depth'] or H
    vd = hp['total_value_depth'] or H
    hd, hdv = kd // heads, vd // heads
    assert (H & (H - 1)) == 0, "hidden_size must be a power of two for the lane fold"

    kernel = functools.partial(_fused_forward_kernel,
                               num_layers=L, num_heads=heads, num_features=NF)

    def const(shape):
        zeros = (0,) * len(shape)
        return pl.BlockSpec(shape, lambda b: zeros)

    in_specs = [
        pl.BlockSpec((1, S, H), lambda b: (b, 0, 0)),   # x
        const((S, H)),                                  # timing signal
        const((S, S)),                                  # causal bias
        const((L, heads, H, hd)),                       # wq (per-head, scale folded)
        const((L, heads, H, hd)),                       # wk
        const((L, heads, H, hdv)),                      # wv
        const((L, heads, hdv, H)),                      # wo
        const((L, 1, H)), const((L, 1, H)),             # ln_attn gamma/beta
        const((L, H, F_)), const((L, 1, F_)),           # ffn W1, b1
        const((L, F_, H)), const((L, 1, H)),            # ffn W2, b2
        const((L, 1, H)), const((L, 1, H)),             # ln_ffn gamma/beta
        const((S, H * NF)),                             # wout reshaped
        const((1, NF)), const((1, NF)),                 # out layernorm gamma/beta
    ]

    return pl.pallas_call(
        kernel,
        out_shape=jax.ShapeDtypeStruct((B, 1, NF), jnp.float32),
        grid=(B,),
        in_specs=in_specs,
        out_specs=pl.BlockSpec((1, 1, NF), lambda b: (b, 0, 0)),
        compiler_params=pltpu.CompilerParams(dimension_semantics=("parallel",)),
    )(h0, p['ts'], p['bias'], p['wq'], p['wk'], p['wv'], p['wo'],
      p['ga'], p['ba'], p['w1'], p['b1'], p['w2'], p['b2'], p['gf'], p['bf'],
      p['wout2'], p['gout'], p['bout'])


# ----------------------------- JAX glue (pre-processing) ---------------------

def shift_and_pad(x):
    B, d1, d2, H = x.shape
    xf = x.reshape(B, d1 * d2, H)
    xf = xf[:, :-1, :]
    xf = jnp.pad(xf, ((0, 0), (1, 0), (0, 0)))
    return xf.reshape(B, d1, d2, H)


def make_timing_signal(rows, cols_ch, hidden, min_timescale=1.0, max_timescale=10000.0):
    # Precomputed once at init; matches Model.add_timing_signal for a (B, rows, cols_ch, H) input.
    num_dims = 2
    num_timescales = hidden // (num_dims * 2)
    log_inc = math.log(max_timescale / min_timescale) / (num_timescales - 1)
    inv = min_timescale * jnp.exp(jnp.arange(num_timescales, dtype=jnp.float32) * -log_inc)
    sig = jnp.zeros((rows, cols_ch, hidden), jnp.float32)
    lengths = (rows, cols_ch)
    for dim in range(num_dims):
        length = lengths[dim]
        pos = jnp.arange(length, dtype=jnp.float32)
        scaled = pos[:, None] * inv[None, :]
        s = jnp.concatenate([jnp.sin(scaled), jnp.cos(scaled)], axis=1)
        prepad = dim * 2 * num_timescales
        postpad = hidden - (dim + 1) * 2 * num_timescales
        s = jnp.pad(s, ((0, 0), (prepad, postpad)))
        shape = [1, 1, hidden]
        shape[dim] = length
        sig = sig + s.reshape(shape)
    return sig.reshape(rows * cols_ch, hidden)


def model_forward(X, params, hp):
    B = X.shape[0]
    rows, cols, ch = hp['rows'], hp['columns'], hp['channels']
    H = hp['hidden_size']
    num_points = rows * cols
    S = num_points * ch

    # NCHW -> (B, rows, cols*ch), same as the PyTorch permute + view
    x = jnp.transpose(X, (0, 2, 3, 1)).reshape(B, rows, cols * ch)

    # distr == 'cat': embedding lookup with per-channel index offsets (trunc == floor for X in [0,1])
    idx = (x * (num_points - 1)).astype(jnp.int32)
    chan_add = jnp.tile(jnp.array([0, 1, 2], jnp.int32) * num_points,
                        (cols * ch) // 3).reshape(1, 1, -1)
    idx = idx + chan_add
    emb = params['embeds_scaled'][idx]               # (B, rows, cols*ch, H), sqrt(H) folded in

    emb = shift_and_pad(emb)
    h0 = emb.reshape(B, S, H)

    out = fused_forward(h0, params, hp)              # (B, 1, NF)
    return out.reshape(B, hp['num_features'])


# ----------------------------- parameter init & packing ----------------------

def init_params(key, hp):
    # Torch-layout parameters (same shapes as the nn.Module's weights).
    H, F_, NF = hp['hidden_size'], hp['filter_size'], hp['num_features']
    num_points = hp['rows'] * hp['columns']
    S = num_points * hp['channels']
    kd = hp['total_key_depth'] or H
    vd = hp['total_value_depth'] or H

    keys = jax.random.split(key, 2 + hp['num_layers'])
    params = {
        'embeds': 0.02 * jax.random.normal(keys[0], (num_points * hp['channels'], H), jnp.float32),
        'wout': 0.02 * jax.random.normal(keys[1], (S * H, NF), jnp.float32),
        'gout': jnp.ones((1, NF), jnp.float32),
        'bout': jnp.zeros((1, NF), jnp.float32),
        'layers': [],
    }
    for l in range(hp['num_layers']):
        ks = jax.random.split(keys[2 + l], 6)
        params['layers'].append(dict(
            wq=0.05 * jax.random.normal(ks[0], (H, kd), jnp.float32),
            wk=0.05 * jax.random.normal(ks[1], (H, kd), jnp.float32),
            wv=0.05 * jax.random.normal(ks[2], (H, vd), jnp.float32),
            wo=0.05 * jax.random.normal(ks[3], (vd, H), jnp.float32),
            ga=jnp.ones((1, H), jnp.float32), ba=jnp.zeros((1, H), jnp.float32),
            w1=0.05 * jax.random.normal(ks[4], (H, F_), jnp.float32),
            b1=jnp.zeros((1, F_), jnp.float32),
            w2=0.05 * jax.random.normal(ks[5], (F_, H), jnp.float32),
            b2=jnp.zeros((1, H), jnp.float32),
            gf=jnp.ones((1, H), jnp.float32), bf=jnp.zeros((1, H), jnp.float32),
        ))
    return params


def pack_params(raw, hp):
    # Restructure torch-layout weights into the kernel layout (pure re-layouts, done once).
    H, NF = hp['hidden_size'], hp['num_features']
    rows, cols, ch = hp['rows'], hp['columns'], hp['channels']
    S = rows * cols * ch
    heads = hp['attn_num_heads']
    kd = hp['total_key_depth'] or H
    vd = hp['total_value_depth'] or H
    hd, hdv = kd // heads, vd // heads
    scale = hd ** -0.5

    def split_heads_in(w, d):        # (H, heads*d) -> (heads, H, d)
        return w.reshape(H, heads, d).transpose(1, 0, 2)

    layers = raw['layers']
    packed = dict(
        embeds_scaled=raw['embeds'] * (H ** 0.5),
        ts=make_timing_signal(rows, cols * ch, H),
        bias=jnp.where(jnp.arange(S)[None, :] > jnp.arange(S)[:, None],
                       jnp.float32(-1e9), jnp.float32(0.0)),
        wq=jnp.stack([split_heads_in(l['wq'], hd) * scale for l in layers]),
        wk=jnp.stack([split_heads_in(l['wk'], hd) for l in layers]),
        wv=jnp.stack([split_heads_in(l['wv'], hdv) for l in layers]),
        wo=jnp.stack([l['wo'].reshape(heads, hdv, H) for l in layers]),
        ga=jnp.stack([l['ga'] for l in layers]), ba=jnp.stack([l['ba'] for l in layers]),
        w1=jnp.stack([l['w1'] for l in layers]), b1=jnp.stack([l['b1'] for l in layers]),
        w2=jnp.stack([l['w2'] for l in layers]), b2=jnp.stack([l['b2'] for l in layers]),
        gf=jnp.stack([l['gf'] for l in layers]), bf=jnp.stack([l['bf'] for l in layers]),
        wout2=raw['wout'].reshape(S, H * NF),    # row s holds Wout[s*H + d, n] at column d*NF + n
        gout=raw['gout'], bout=raw['bout'],
    )
    return packed


if __name__ == "__main__":
    hp = HPARAMS
    key = jax.random.PRNGKey(0)
    kx, kp = jax.random.split(key)
    # NCHW input in [0, 1] (required by the categorical-index path)
    X = jax.random.uniform(kx, (2, hp['channels'], hp['rows'], hp['columns']),
                           dtype=jnp.float32)
    params = pack_params(init_params(kp, hp), hp)

    fwd = jax.jit(functools.partial(model_forward, hp=hp))
    out = jax.block_until_ready(fwd(X, params))
    assert out.shape == (2, hp['num_features'])
    assert bool(jnp.all(jnp.isfinite(out)))
    print("KERNEL_OK")
</pallas_src>

<mosaic_0001>
module attributes {stable_mosaic.version = 11 : i64} {
  func.func @_fused_forward_kernel(%arg0: i32, %arg1: memref<1x48x32xf32, #tpu.memory_space<vmem>>, %arg2: memref<48x32xf32, #tpu.memory_space<vmem>>, %arg3: memref<48x48xf32, #tpu.memory_space<vmem>>, %arg4: memref<2x4x32x8xf32, #tpu.memory_space<vmem>>, %arg5: memref<2x4x32x8xf32, #tpu.memory_space<vmem>>, %arg6: memref<2x4x32x8xf32, #tpu.memory_space<vmem>>, %arg7: memref<2x4x8x32xf32, #tpu.memory_space<vmem>>, %arg8: memref<2x1x32xf32, #tpu.memory_space<vmem>>, %arg9: memref<2x1x32xf32, #tpu.memory_space<vmem>>, %arg10: memref<2x32x64xf32, #tpu.memory_space<vmem>>, %arg11: memref<2x1x64xf32, #tpu.memory_space<vmem>>, %arg12: memref<2x64x32xf32, #tpu.memory_space<vmem>>, %arg13: memref<2x1x32xf32, #tpu.memory_space<vmem>>, %arg14: memref<2x1x32xf32, #tpu.memory_space<vmem>>, %arg15: memref<2x1x32xf32, #tpu.memory_space<vmem>>, %arg16: memref<48x1024xf32, #tpu.memory_space<vmem>>, %arg17: memref<1x32xf32, #tpu.memory_space<vmem>>, %arg18: memref<1x32xf32, #tpu.memory_space<vmem>>, %arg19: memref<1x1x32xf32, #tpu.memory_space<vmem>>) attributes {dimension_semantics = [#tpu.dimension_semantics<parallel>], iteration_bounds = array<i64: 2>, scalar_prefetch = 0 : i64, scratch_operands = 0 : i64, tpu.core_type = #tpu.core_type<tc>, window_params = [{transform_indices = @transform_0, window_bounds = array<i64: 1, 48, 32>}, {pipeline_mode = #tpu.pipeline_mode<synchronous>, transform_indices = @transform_1, window_bounds = array<i64: 48, 32>}, {pipeline_mode = #tpu.pipeline_mode<synchronous>, transform_indices = @transform_2, window_bounds = array<i64: 48, 48>}, {pipeline_mode = #tpu.pipeline_mode<synchronous>, transform_indices = @transform_3, window_bounds = array<i64: 2, 4, 32, 8>}, {pipeline_mode = #tpu.pipeline_mode<synchronous>, transform_indices = @transform_4, window_bounds = array<i64: 2, 4, 32, 8>}, {pipeline_mode = #tpu.pipeline_mode<synchronous>, transform_indices = @transform_5, window_bounds = array<i64: 2, 4, 32, 8>}, {pipeline_mode = #tpu.pipeline_mode<synchronous>, transform_indices = @transform_6, window_bounds = array<i64: 2, 4, 8, 32>}, {pipeline_mode = #tpu.pipeline_mode<synchronous>, transform_indices = @transform_7, window_bounds = array<i64: 2, 1, 32>}, {pipeline_mode = #tpu.pipeline_mode<synchronous>, transform_indices = @transform_8, window_bounds = array<i64: 2, 1, 32>}, {pipeline_mode = #tpu.pipeline_mode<synchronous>, transform_indices = @transform_9, window_bounds = array<i64: 2, 32, 64>}, {pipeline_mode = #tpu.pipeline_mode<synchronous>, transform_indices = @transform_10, window_bounds = array<i64: 2, 1, 64>}, {pipeline_mode = #tpu.pipeline_mode<synchronous>, transform_indices = @transform_11, window_bounds = array<i64: 2, 64, 32>}, {pipeline_mode = #tpu.pipeline_mode<synchronous>, transform_indices = @transform_12, window_bounds = array<i64: 2, 1, 32>}, {pipeline_mode = #tpu.pipeline_mode<synchronous>, transform_indices = @transform_13, window_bounds = array<i64: 2, 1, 32>}, {pipeline_mode = #tpu.pipeline_mode<synchronous>, transform_indices = @transform_14, window_bounds = array<i64: 2, 1, 32>}, {pipeline_mode = #tpu.pipeline_mode<synchronous>, transform_indices = @transform_15, window_bounds = array<i64: 48, 1024>}, {pipeline_mode = #tpu.pipeline_mode<synchronous>, transform_indices = @transform_16, window_bounds = array<i64: 1, 32>}, {pipeline_mode = #tpu.pipeline_mode<synchronous>, transform_indices = @transform_17, window_bounds = array<i64: 1, 32>}, {transform_indices = @transform_18, window_bounds = array<i64: 1, 1, 32>}]} {
    %c0 = arith.constant 0 : index
    %c0_0 = arith.constant 0 : index
    %c0_1 = arith.constant 0 : index
    %0 = vector.load %arg1[%c0, %c0_0, %c0_1] : memref<1x48x32xf32, #tpu.memory_space<vmem>>, vector<1x48x32xf32>
    %1 = vector.shape_cast %0 : vector<1x48x32xf32> to vector<48x32xf32>
    %c0_2 = arith.constant 0 : index
    %c0_3 = arith.constant 0 : index
    %2 = vector.load %arg2[%c0_2, %c0_3] : memref<48x32xf32, #tpu.memory_space<vmem>>, vector<48x32xf32>
    %3 = arith.addf %1, %2 : vector<48x32xf32>
    %c0_4 = arith.constant 0 : index
    %c0_5 = arith.constant 0 : index
    %4 = vector.load %arg3[%c0_4, %c0_5] : memref<48x48xf32, #tpu.memory_space<vmem>>, vector<48x48xf32>
    %5 = vector.shape_cast %3 : vector<48x32xf32> to vector<1x48x32xf32>
    %6 = vector.broadcast %5 : vector<1x48x32xf32> to vector<4x48x32xf32>
    %c0_6 = arith.constant 0 : index
    %c0_7 = arith.constant 0 : index
    %c0_8 = arith.constant 0 : index
    %c0_9 = arith.constant 0 : index
    %7 = vector.load %arg4[%c0_6, %c0_7, %c0_8, %c0_9] : memref<2x4x32x8xf32, #tpu.memory_space<vmem>>, vector<1x4x32x8xf32>
    %8 = vector.shape_cast %7 : vector<1x4x32x8xf32> to vector<4x32x8xf32>
    "tpu.trace_start"() <{level = 10 : i32, message = "hsk,hkd->hsd"}> : () -> ()
    %cst = arith.constant dense<0.000000e+00> : vector<4x48x8xf32>
    %9 = tpu.matmul %6, %8, %cst {dimension_numbers = #tpu.dot_dimension_numbers<[2], [1], [1], [2], [0, 0, 0, 1, 1, 2], [0], [0]>} : vector<4x48x32xf32>, vector<4x32x8xf32>, vector<4x48x8xf32> -> vector<4x48x8xf32>
    "tpu.trace_stop"() : () -> ()
    %c0_10 = arith.constant 0 : index
    %c0_11 = arith.constant 0 : index
    %c0_12 = arith.constant 0 : index
    %c0_13 = arith.constant 0 : index
    %10 = vector.load %arg5[%c0_10, %c0_11, %c0_12, %c0_13] : memref<2x4x32x8xf32, #tpu.memory_space<vmem>>, vector<1x4x32x8xf32>
    %11 = vector.shape_cast %10 : vector<1x4x32x8xf32> to vector<4x32x8xf32>
    "tpu.trace_start"() <{level = 10 : i32, message = "hsk,hkd->hsd"}> : () -> ()
    %cst_14 = arith.constant dense<0.000000e+00> : vector<4x48x8xf32>
    %12 = tpu.matmul %6, %11, %cst_14 {dimension_numbers = #tpu.dot_dimension_numbers<[2], [1], [1], [2], [0, 0, 0, 1, 1, 2], [0], [0]>} : vector<4x48x32xf32>, vector<4x32x8xf32>, vector<4x48x8xf32> -> vector<4x48x8xf32>
    "tpu.trace_stop"() : () -> ()
    %c0_15 = arith.constant 0 : index
    %c0_16 = arith.constant 0 : index
    %c0_17 = arith.constant 0 : index
    %c0_18 = arith.constant 0 : index
    %13 = vector.load %arg6[%c0_15, %c0_16, %c0_17, %c0_18] : memref<2x4x32x8xf32, #tpu.memory_space<vmem>>, vector<1x4x32x8xf32>
    %14 = vector.shape_cast %13 : vector<1x4x32x8xf32> to vector<4x32x8xf32>
    "tpu.trace_start"() <{level = 10 : i32, message = "hsk,hkd->hsd"}> : () -> ()
    %cst_19 = arith.constant dense<0.000000e+00> : vector<4x48x8xf32>
    %15 = tpu.matmul %6, %14, %cst_19 {dimension_numbers = #tpu.dot_dimension_numbers<[2], [1], [1], [2], [0, 0, 0, 1, 1, 2], [0], [0]>} : vector<4x48x32xf32>, vector<4x32x8xf32>, vector<4x48x8xf32> -> vector<4x48x8xf32>
    "tpu.trace_stop"() : () -> ()
    "tpu.trace_start"() <{level = 10 : i32, message = "hqd,hkd->hqk"}> : () -> ()
    %cst_20 = arith.constant dense<0.000000e+00> : vector<4x48x48xf32>
    %16 = tpu.matmul %9, %12, %cst_20 {dimension_numbers = #tpu.dot_dimension_numbers<[2], [2], [1], [1], [0, 0, 0, 1, 1, 1], [0], [0]>} : vector<4x48x8xf32>, vector<4x48x8xf32>, vector<4x48x48xf32> -> vector<4x48x48xf32>
    "tpu.trace_stop"() : () -> ()
    %17 = vector.shape_cast %4 : vector<48x48xf32> to vector<1x48x48xf32>
    %18 = vector.broadcast %17 : vector<1x48x48xf32> to vector<4x48x48xf32>
    %19 = arith.addf %16, %18 : vector<4x48x48xf32>
    %cst_21 = arith.constant dense<0xFF800000> : vector<4x48xf32>
    %20 = vector.multi_reduction <maximumf>, %19, %cst_21 [2] : vector<4x48x48xf32> to vector<4x48xf32>
    %21 = vector.shape_cast %20 : vector<4x48xf32> to vector<4x48x1xf32>
    %22 = vector.broadcast %21 : vector<4x48x1xf32> to vector<4x48x48xf32>
    %23 = arith.subf %19, %22 : vector<4x48x48xf32>
    %24 = math.exp %23 : vector<4x48x48xf32>
    %cst_22 = arith.constant dense<0.000000e+00> : vector<4x48xf32>
    %25 = vector.multi_reduction <add>, %24, %cst_22 [2] : vector<4x48x48xf32> to vector<4x48xf32>
    %26 = vector.shape_cast %25 : vector<4x48xf32> to vector<4x48x1xf32>
    %27 = tpu.reciprocal %26 {approx = true} : vector<4x48x1xf32> -> vector<4x48x1xf32>
    %28 = vector.broadcast %27 : vector<4x48x1xf32> to vector<4x48x48xf32>
    %29 = arith.mulf %24, %28 : vector<4x48x48xf32>
    "tpu.trace_start"() <{level = 10 : i32, message = "hqk,hkd->hqd"}> : () -> ()
    %cst_23 = arith.constant dense<0.000000e+00> : vector<4x48x8xf32>
    %30 = tpu.matmul %29, %15, %cst_23 {dimension_numbers = #tpu.dot_dimension_numbers<[2], [1], [1], [2], [0, 0, 0, 1, 1, 2], [0], [0]>} : vector<4x48x48xf32>, vector<4x48x8xf32>, vector<4x48x8xf32> -> vector<4x48x8xf32>
    "tpu.trace_stop"() : () -> ()
    %c0_24 = arith.constant 0 : index
    %c0_25 = arith.constant 0 : index
    %c0_26 = arith.constant 0 : index
    %c0_27 = arith.constant 0 : index
    %31 = vector.load %arg7[%c0_24, %c0_25, %c0_26, %c0_27] : memref<2x4x8x32xf32, #tpu.memory_space<vmem>>, vector<1x4x8x32xf32>
    %32 = vector.shape_cast %31 : vector<1x4x8x32xf32> to vector<4x8x32xf32>
    "tpu.trace_start"() <{level = 10 : i32, message = "hqd,hdm->hqm"}> : () -> ()
    %cst_28 = arith.constant dense<0.000000e+00> : vector<4x48x32xf32>
    %33 = tpu.matmul %30, %32, %cst_28 {dimension_numbers = #tpu.dot_dimension_numbers<[2], [1], [1], [2], [0, 0, 0, 1, 1, 2], [0], [0]>} : vector<4x48x8xf32>, vector<4x8x32xf32>, vector<4x48x32xf32> -> vector<4x48x32xf32>
    "tpu.trace_stop"() : () -> ()
    %cst_29 = arith.constant dense<0.000000e+00> : vector<48x32xf32>
    %34 = vector.multi_reduction <add>, %33, %cst_29 [0] : vector<4x48x32xf32> to vector<48x32xf32>
    %35 = arith.addf %34, %3 : vector<48x32xf32>
    %c0_30 = arith.constant 0 : index
    %c0_31 = arith.constant 0 : index
    %c0_32 = arith.constant 0 : index
    %36 = vector.load %arg8[%c0_30, %c0_31, %c0_32] : memref<2x1x32xf32, #tpu.memory_space<vmem>>, vector<1x1x32xf32>
    %37 = vector.shape_cast %36 : vector<1x1x32xf32> to vector<1x32xf32>
    %c0_33 = arith.constant 0 : index
    %c0_34 = arith.constant 0 : index
    %c0_35 = arith.constant 0 : index
    %38 = vector.load %arg9[%c0_33, %c0_34, %c0_35] : memref<2x1x32xf32, #tpu.memory_space<vmem>>, vector<1x1x32xf32>
    %39 = vector.shape_cast %38 : vector<1x1x32xf32> to vector<1x32xf32>
    %cst_36 = arith.constant dense<0.000000e+00> : vector<48xf32>
    %40 = vector.multi_reduction <add>, %35, %cst_36 [1] : vector<48x32xf32> to vector<48xf32>
    %41 = vector.shape_cast %40 : vector<48xf32> to vector<48x1xf32>
    %cst_37 = arith.constant 3.200000e+01 : f32
    %42 = vector.broadcast %cst_37 : f32 to vector<48x1xf32>
    %43 = arith.divf %41, %42 : vector<48x1xf32>
    %44 = vector.broadcast %43 : vector<48x1xf32> to vector<48x32xf32>
    %45 = arith.subf %35, %44 : vector<48x32xf32>
    %46 = arith.mulf %45, %45 : vector<48x32xf32>
    %cst_38 = arith.constant dense<0.000000e+00> : vector<48xf32>
    %47 = vector.multi_reduction <add>, %46, %cst_38 [1] : vector<48x32xf32> to vector<48xf32>
    %48 = vector.shape_cast %47 : vector<48xf32> to vector<48x1xf32>
    %cst_39 = arith.constant 3.200000e+01 : f32
    %49 = vector.broadcast %cst_39 : f32 to vector<48x1xf32>
    %50 = arith.divf %48, %49 : vector<48x1xf32>
    %51 = vector.broadcast %43 : vector<48x1xf32> to vector<48x32xf32>
    %52 = arith.subf %35, %51 : vector<48x32xf32>
    %cst_40 = arith.constant 9.99999997E-7 : f32
    %53 = vector.broadcast %cst_40 : f32 to vector<48x1xf32>
    %54 = arith.addf %50, %53 : vector<48x1xf32>
    %55 = math.rsqrt %54 : vector<48x1xf32>
    %56 = vector.broadcast %55 : vector<48x1xf32> to vector<48x32xf32>
    %57 = arith.mulf %52, %56 : vector<48x32xf32>
    %58 = vector.broadcast %37 : vector<1x32xf32> to vector<48x32xf32>
    %59 = arith.mulf %57, %58 : vector<48x32xf32>
    %60 = vector.broadcast %39 : vector<1x32xf32> to vector<48x32xf32>
    %61 = arith.addf %59, %60 : vector<48x32xf32>
    %c0_41 = arith.constant 0 : index
    %c0_42 = arith.constant 0 : index
    %c0_43 = arith.constant 0 : index
    %62 = vector.load %arg10[%c0_41, %c0_42, %c0_43] : memref<2x32x64xf32, #tpu.memory_space<vmem>>, vector<1x32x64xf32>
    %63 = vector.shape_cast %62 : vector<1x32x64xf32> to vector<32x64xf32>
    %cst_44 = arith.constant dense<0.000000e+00> : vector<48x64xf32>
    %64 = tpu.matmul %61, %63, %cst_44 {dimension_numbers = #tpu.dot_dimension_numbers<[1], [0], [0], [1], [0, 0, 1, 1], [], []>} : vector<48x32xf32>, vector<32x64xf32>, vector<48x64xf32> -> vector<48x64xf32>
    %c0_45 = arith.constant 0 : index
    %c0_46 = arith.constant 0 : index
    %c0_47 = arith.constant 0 : index
    %65 = vector.load %arg11[%c0_45, %c0_46, %c0_47] : memref<2x1x64xf32, #tpu.memory_space<vmem>>, vector<1x1x64xf32>
    %66 = vector.shape_cast %65 : vector<1x1x64xf32> to vector<1x64xf32>
    %67 = vector.broadcast %66 : vector<1x64xf32> to vector<48x64xf32>
    %68 = arith.addf %64, %67 : vector<48x64xf32>
    %cst_48 = arith.constant 5.000000e-01 : f32
    %69 = vector.broadcast %cst_48 : f32 to vector<48x64xf32>
    %70 = arith.mulf %69, %68 : vector<48x64xf32>
    %cst_49 = arith.constant 0.707106769 : f32
    %71 = vector.broadcast %cst_49 : f32 to vector<48x64xf32>
    %72 = arith.mulf %68, %71 : vector<48x64xf32>
    %cst_50 = arith.constant 0.000000e+00 : f32
    %73 = vector.broadcast %cst_50 : f32 to vector<48x64xf32>
    %74 = arith.cmpf olt, %72, %73 : vector<48x64xf32>
    %cst_51 = arith.constant -1.000000e+00 : f32
    %cst_52 = arith.constant 1.000000e+00 : f32
    %75 = vector.broadcast %cst_51 : f32 to vector<48x64xf32>
    %76 = vector.broadcast %cst_52 : f32 to vector<48x64xf32>
    %77 = arith.select %74, %75, %76 : vector<48x64xi1>, vector<48x64xf32>
    %78 = math.absf %72 : vector<48x64xf32>
    %cst_53 = arith.constant 0.327591091 : f32
    %79 = vector.broadcast %cst_53 : f32 to vector<48x64xf32>
    %80 = arith.mulf %79, %78 : vector<48x64xf32>
    %cst_54 = arith.constant 1.000000e+00 : f32
    %81 = vector.broadcast %cst_54 : f32 to vector<48x64xf32>
    %82 = arith.addf %81, %80 : vector<48x64xf32>
    %cst_55 = arith.constant 1.000000e+00 : f32
    %83 = vector.broadcast %cst_55 : f32 to vector<48x64xf32>
    %84 = arith.divf %83, %82 : vector<48x64xf32>
    %cst_56 = arith.constant 1.06140542 : f32
    %85 = vector.broadcast %cst_56 : f32 to vector<48x64xf32>
    %86 = arith.mulf %85, %84 : vector<48x64xf32>
    %cst_57 = arith.constant -1.45315206 : f32
    %87 = vector.broadcast %cst_57 : f32 to vector<48x64xf32>
    %88 = arith.addf %86, %87 : vector<48x64xf32>
    %89 = arith.mulf %88, %84 : vector<48x64xf32>
    %cst_58 = arith.constant 1.42141378 : f32
    %90 = vector.broadcast %cst_58 : f32 to vector<48x64xf32>
    %91 = arith.addf %89, %90 : vector<48x64xf32>
    %92 = arith.mulf %91, %84 : vector<48x64xf32>
    %cst_59 = arith.constant -0.284496725 : f32
    %93 = vector.broadcast %cst_59 : f32 to vector<48x64xf32>
    %94 = arith.addf %92, %93 : vector<48x64xf32>
    %95 = arith.mulf %94, %84 : vector<48x64xf32>
    %cst_60 = arith.constant 0.254829586 : f32
    %96 = vector.broadcast %cst_60 : f32 to vector<48x64xf32>
    %97 = arith.addf %95, %96 : vector<48x64xf32>
    %98 = arith.mulf %97, %84 : vector<48x64xf32>
    %cst_61 = arith.constant 0.000000e+00 : f32
    %99 = vector.broadcast %cst_61 : f32 to vector<48x64xf32>
    %100 = arith.subf %99, %78 : vector<48x64xf32>
    %101 = arith.mulf %100, %78 : vector<48x64xf32>
    %102 = math.exp %101 : vector<48x64xf32>
    %103 = arith.mulf %98, %102 : vector<48x64xf32>
    %cst_62 = arith.constant 1.000000e+00 : f32
    %104 = vector.broadcast %cst_62 : f32 to vector<48x64xf32>
    %105 = arith.subf %104, %103 : vector<48x64xf32>
    %106 = arith.mulf %77, %105 : vector<48x64xf32>
    %cst_63 = arith.constant 1.000000e+00 : f32
    %107 = vector.broadcast %cst_63 : f32 to vector<48x64xf32>
    %108 = arith.addf %107, %106 : vector<48x64xf32>
    %109 = arith.mulf %70, %108 : vector<48x64xf32>
    %c0_64 = arith.constant 0 : index
    %c0_65 = arith.constant 0 : index
    %c0_66 = arith.constant 0 : index
    %110 = vector.load %arg12[%c0_64, %c0_65, %c0_66] : memref<2x64x32xf32, #tpu.memory_space<vmem>>, vector<1x64x32xf32>
    %111 = vector.shape_cast %110 : vector<1x64x32xf32> to vector<64x32xf32>
    %cst_67 = arith.constant dense<0.000000e+00> : vector<48x32xf32>
    %112 = tpu.matmul %109, %111, %cst_67 {dimension_numbers = #tpu.dot_dimension_numbers<[1], [0], [0], [1], [0, 0, 1, 1], [], []>} : vector<48x64xf32>, vector<64x32xf32>, vector<48x32xf32> -> vector<48x32xf32>
    %c0_68 = arith.constant 0 : index
    %c0_69 = arith.constant 0 : index
    %c0_70 = arith.constant 0 : index
    %113 = vector.load %arg13[%c0_68, %c0_69, %c0_70] : memref<2x1x32xf32, #tpu.memory_space<vmem>>, vector<1x1x32xf32>
    %114 = vector.shape_cast %113 : vector<1x1x32xf32> to vector<1x32xf32>
    %115 = vector.broadcast %114 : vector<1x32xf32> to vector<48x32xf32>
    %116 = arith.addf %112, %115 : vector<48x32xf32>
    %117 = arith.addf %116, %61 : vector<48x32xf32>
    %c0_71 = arith.constant 0 : index
    %c0_72 = arith.constant 0 : index
    %c0_73 = arith.constant 0 : index
    %118 = vector.load %arg14[%c0_71, %c0_72, %c0_73] : memref<2x1x32xf32, #tpu.memory_space<vmem>>, vector<1x1x32xf32>
    %119 = vector.shape_cast %118 : vector<1x1x32xf32> to vector<1x32xf32>
    %c0_74 = arith.constant 0 : index
    %c0_75 = arith.constant 0 : index
    %c0_76 = arith.constant 0 : index
    %120 = vector.load %arg15[%c0_74, %c0_75, %c0_76] : memref<2x1x32xf32, #tpu.memory_space<vmem>>, vector<1x1x32xf32>
    %121 = vector.shape_cast %120 : vector<1x1x32xf32> to vector<1x32xf32>
    %cst_77 = arith.constant dense<0.000000e+00> : vector<48xf32>
    %122 = vector.multi_reduction <add>, %117, %cst_77 [1] : vector<48x32xf32> to vector<48xf32>
    %123 = vector.shape_cast %122 : vector<48xf32> to vector<48x1xf32>
    %cst_78 = arith.constant 3.200000e+01 : f32
    %124 = vector.broadcast %cst_78 : f32 to vector<48x1xf32>
    %125 = arith.divf %123, %124 : vector<48x1xf32>
    %126 = vector.broadcast %125 : vector<48x1xf32> to vector<48x32xf32>
    %127 = arith.subf %117, %126 : vector<48x32xf32>
    %128 = arith.mulf %127, %127 : vector<48x32xf32>
    %cst_79 = arith.constant dense<0.000000e+00> : vector<48xf32>
    %129 = vector.multi_reduction <add>, %128, %cst_79 [1] : vector<48x32xf32> to vector<48xf32>
    %130 = vector.shape_cast %129 : vector<48xf32> to vector<48x1xf32>
    %cst_80 = arith.constant 3.200000e+01 : f32
    %131 = vector.broadcast %cst_80 : f32 to vector<48x1xf32>
    %132 = arith.divf %130, %131 : vector<48x1xf32>
    %133 = vector.broadcast %125 : vector<48x1xf32> to vector<48x32xf32>
    %134 = arith.subf %117, %133 : vector<48x32xf32>
    %cst_81 = arith.constant 9.99999997E-7 : f32
    %135 = vector.broadcast %cst_81 : f32 to vector<48x1xf32>
    %136 = arith.addf %132, %135 : vector<48x1xf32>
    %137 = math.rsqrt %136 : vector<48x1xf32>
    %138 = vector.broadcast %137 : vector<48x1xf32> to vector<48x32xf32>
    %139 = arith.mulf %134, %138 : vector<48x32xf32>
    %140 = vector.broadcast %119 : vector<1x32xf32> to vector<48x32xf32>
    %141 = arith.mulf %139, %140 : vector<48x32xf32>
    %142 = vector.broadcast %121 : vector<1x32xf32> to vector<48x32xf32>
    %143 = arith.addf %141, %142 : vector<48x32xf32>
    %144 = vector.shape_cast %143 : vector<48x32xf32> to vector<1x48x32xf32>
    %145 = vector.broadcast %144 : vector<1x48x32xf32> to vector<4x48x32xf32>
    %c1 = arith.constant 1 : index
    %c0_82 = arith.constant 0 : index
    %c0_83 = arith.constant 0 : index
    %c0_84 = arith.constant 0 : index
    %146 = vector.load %arg4[%c1, %c0_82, %c0_83, %c0_84] : memref<2x4x32x8xf32, #tpu.memory_space<vmem>>, vector<1x4x32x8xf32>
    %147 = vector.shape_cast %146 : vector<1x4x32x8xf32> to vector<4x32x8xf32>
    "tpu.trace_start"() <{level = 10 : i32, message = "hsk,hkd->hsd"}> : () -> ()
    %cst_85 = arith.constant dense<0.000000e+00> : vector<4x48x8xf32>
    %148 = tpu.matmul %145, %147, %cst_85 {dimension_numbers = #tpu.dot_dimension_numbers<[2], [1], [1], [2], [0, 0, 0, 1, 1, 2], [0], [0]>} : vector<4x48x32xf32>, vector<4x32x8xf32>, vector<4x48x8xf32> -> vector<4x48x8xf32>
    "tpu.trace_stop"() : () -> ()
    %c1_86 = arith.constant 1 : index
    %c0_87 = arith.constant 0 : index
    %c0_88 = arith.constant 0 : index
    %c0_89 = arith.constant 0 : index
    %149 = vector.load %arg5[%c1_86, %c0_87, %c0_88, %c0_89] : memref<2x4x32x8xf32, #tpu.memory_space<vmem>>, vector<1x4x32x8xf32>
    %150 = vector.shape_cast %149 : vector<1x4x32x8xf32> to vector<4x32x8xf32>
    "tpu.trace_start"() <{level = 10 : i32, message = "hsk,hkd->hsd"}> : () -> ()
    %cst_90 = arith.constant dense<0.000000e+00> : vector<4x48x8xf32>
    %151 = tpu.matmul %145, %150, %cst_90 {dimension_numbers = #tpu.dot_dimension_numbers<[2], [1], [1], [2], [0, 0, 0, 1, 1, 2], [0], [0]>} : vector<4x48x32xf32>, vector<4x32x8xf32>, vector<4x48x8xf32> -> vector<4x48x8xf32>
    "tpu.trace_stop"() : () -> ()
    %c1_91 = arith.constant 1 : index
    %c0_92 = arith.constant 0 : index
    %c0_93 = arith.constant 0 : index
    %c0_94 = arith.constant 0 : index
    %152 = vector.load %arg6[%c1_91, %c0_92, %c0_93, %c0_94] : memref<2x4x32x8xf32, #tpu.memory_space<vmem>>, vector<1x4x32x8xf32>
    %153 = vector.shape_cast %152 : vector<1x4x32x8xf32> to vector<4x32x8xf32>
    "tpu.trace_start"() <{level = 10 : i32, message = "hsk,hkd->hsd"}> : () -> ()
    %cst_95 = arith.constant dense<0.000000e+00> : vector<4x48x8xf32>
    %154 = tpu.matmul %145, %153, %cst_95 {dimension_numbers = #tpu.dot_dimension_numbers<[2], [1], [1], [2], [0, 0, 0, 1, 1, 2], [0], [0]>} : vector<4x48x32xf32>, vector<4x32x8xf32>, vector<4x48x8xf32> -> vector<4x48x8xf32>
    "tpu.trace_stop"() : () -> ()
    "tpu.trace_start"() <{level = 10 : i32, message = "hqd,hkd->hqk"}> : () -> ()
    %cst_96 = arith.constant dense<0.000000e+00> : vector<4x48x48xf32>
    %155 = tpu.matmul %148, %151, %cst_96 {dimension_numbers = #tpu.dot_dimension_numbers<[2], [2], [1], [1], [0, 0, 0, 1, 1, 1], [0], [0]>} : vector<4x48x8xf32>, vector<4x48x8xf32>, vector<4x48x48xf32> -> vector<4x48x48xf32>
    "tpu.trace_stop"() : () -> ()
    %156 = vector.shape_cast %4 : vector<48x48xf32> to vector<1x48x48xf32>
    %157 = vector.broadcast %156 : vector<1x48x48xf32> to vector<4x48x48xf32>
    %158 = arith.addf %155, %157 : vector<4x48x48xf32>
    %cst_97 = arith.constant dense<0xFF800000> : vector<4x48xf32>
    %159 = vector.multi_reduction <maximumf>, %158, %cst_97 [2] : vector<4x48x48xf32> to vector<4x48xf32>
    %160 = vector.shape_cast %159 : vector<4x48xf32> to vector<4x48x1xf32>
    %161 = vector.broadcast %160 : vector<4x48x1xf32> to vector<4x48x48xf32>
    %162 = arith.subf %158, %161 : vector<4x48x48xf32>
    %163 = math.exp %162 : vector<4x48x48xf32>
    %cst_98 = arith.constant dense<0.000000e+00> : vector<4x48xf32>
    %164 = vector.multi_reduction <add>, %163, %cst_98 [2] : vector<4x48x48xf32> to vector<4x48xf32>
    %165 = vector.shape_cast %164 : vector<4x48xf32> to vector<4x48x1xf32>
    %166 = tpu.reciprocal %165 {approx = true} : vector<4x48x1xf32> -> vector<4x48x1xf32>
    %167 = vector.broadcast %166 : vector<4x48x1xf32> to vector<4x48x48xf32>
    %168 = arith.mulf %163, %167 : vector<4x48x48xf32>
    "tpu.trace_start"() <{level = 10 : i32, message = "hqk,hkd->hqd"}> : () -> ()
    %cst_99 = arith.constant dense<0.000000e+00> : vector<4x48x8xf32>
    %169 = tpu.matmul %168, %154, %cst_99 {dimension_numbers = #tpu.dot_dimension_numbers<[2], [1], [1], [2], [0, 0, 0, 1, 1, 2], [0], [0]>} : vector<4x48x48xf32>, vector<4x48x8xf32>, vector<4x48x8xf32> -> vector<4x48x8xf32>
    "tpu.trace_stop"() : () -> ()
    %c1_100 = arith.constant 1 : index
    %c0_101 = arith.constant 0 : index
    %c0_102 = arith.constant 0 : index
    %c0_103 = arith.constant 0 : index
    %170 = vector.load %arg7[%c1_100, %c0_101, %c0_102, %c0_103] : memref<2x4x8x32xf32, #tpu.memory_space<vmem>>, vector<1x4x8x32xf32>
    %171 = vector.shape_cast %170 : vector<1x4x8x32xf32> to vector<4x8x32xf32>
    "tpu.trace_start"() <{level = 10 : i32, message = "hqd,hdm->hqm"}> : () -> ()
    %cst_104 = arith.constant dense<0.000000e+00> : vector<4x48x32xf32>
    %172 = tpu.matmul %169, %171, %cst_104 {dimension_numbers = #tpu.dot_dimension_numbers<[2], [1], [1], [2], [0, 0, 0, 1, 1, 2], [0], [0]>} : vector<4x48x8xf32>, vector<4x8x32xf32>, vector<4x48x32xf32> -> vector<4x48x32xf32>
    "tpu.trace_stop"() : () -> ()
    %cst_105 = arith.constant dense<0.000000e+00> : vector<48x32xf32>
    %173 = vector.multi_reduction <add>, %172, %cst_105 [0] : vector<4x48x32xf32> to vector<48x32xf32>
    %174 = arith.addf %173, %143 : vector<48x32xf32>
    %c1_106 = arith.constant 1 : index
    %c0_107 = arith.constant 0 : index
    %c0_108 = arith.constant 0 : index
    %175 = vector.load %arg8[%c1_106, %c0_107, %c0_108] : memref<2x1x32xf32, #tpu.memory_space<vmem>>, vector<1x1x32xf32>
    %176 = vector.shape_cast %175 : vector<1x1x32xf32> to vector<1x32xf32>
    %c1_109 = arith.constant 1 : index
    %c0_110 = arith.constant 0 : index
    %c0_111 = arith.constant 0 : index
    %177 = vector.load %arg9[%c1_109, %c0_110, %c0_111] : memref<2x1x32xf32, #tpu.memory_space<vmem>>, vector<1x1x32xf32>
    %178 = vector.shape_cast %177 : vector<1x1x32xf32> to vector<1x32xf32>
    %cst_112 = arith.constant dense<0.000000e+00> : vector<48xf32>
    %179 = vector.multi_reduction <add>, %174, %cst_112 [1] : vector<48x32xf32> to vector<48xf32>
    %180 = vector.shape_cast %179 : vector<48xf32> to vector<48x1xf32>
    %cst_113 = arith.constant 3.200000e+01 : f32
    %181 = vector.broadcast %cst_113 : f32 to vector<48x1xf32>
    %182 = arith.divf %180, %181 : vector<48x1xf32>
    %183 = vector.broadcast %182 : vector<48x1xf32> to vector<48x32xf32>
    %184 = arith.subf %174, %183 : vector<48x32xf32>
    %185 = arith.mulf %184, %184 : vector<48x32xf32>
    %cst_114 = arith.constant dense<0.000000e+00> : vector<48xf32>
    %186 = vector.multi_reduction <add>, %185, %cst_114 [1] : vector<48x32xf32> to vector<48xf32>
    %187 = vector.shape_cast %186 : vector<48xf32> to vector<48x1xf32>
    %cst_115 = arith.constant 3.200000e+01 : f32
    %188 = vector.broadcast %cst_115 : f32 to vector<48x1xf32>
    %189 = arith.divf %187, %188 : vector<48x1xf32>
    %190 = vector.broadcast %182 : vector<48x1xf32> to vector<48x32xf32>
    %191 = arith.subf %174, %190 : vector<48x32xf32>
    %cst_116 = arith.constant 9.99999997E-7 : f32
    %192 = vector.broadcast %cst_116 : f32 to vector<48x1xf32>
    %193 = arith.addf %189, %192 : vector<48x1xf32>
    %194 = math.rsqrt %193 : vector<48x1xf32>
    %195 = vector.broadcast %194 : vector<48x1xf32> to vector<48x32xf32>
    %196 = arith.mulf %191, %195 : vector<48x32xf32>
    %197 = vector.broadcast %176 : vector<1x32xf32> to vector<48x32xf32>
    %198 = arith.mulf %196, %197 : vector<48x32xf32>
    %199 = vector.broadcast %178 : vector<1x32xf32> to vector<48x32xf32>
    %200 = arith.addf %198, %199 : vector<48x32xf32>
    %c1_117 = arith.constant 1 : index
    %c0_118 = arith.constant 0 : index
    %c0_119 = arith.constant 0 : index
    %201 = vector.load %arg10[%c1_117, %c0_118, %c0_119] : memref<2x32x64xf32, #tpu.memory_space<vmem>>, vector<1x32x64xf32>
    %202 = vector.shape_cast %201 : vector<1x32x64xf32> to vector<32x64xf32>
    %cst_120 = arith.constant dense<0.000000e+00> : vector<48x64xf32>
    %203 = tpu.matmul %200, %202, %cst_120 {dimension_numbers = #tpu.dot_dimension_numbers<[1], [0], [0], [1], [0, 0, 1, 1], [], []>} : vector<48x32xf32>, vector<32x64xf32>, vector<48x64xf32> -> vector<48x64xf32>
    %c1_121 = arith.constant 1 : index
    %c0_122 = arith.constant 0 : index
    %c0_123 = arith.constant 0 : index
    %204 = vector.load %arg11[%c1_121, %c0_122, %c0_123] : memref<2x1x64xf32, #tpu.memory_space<vmem>>, vector<1x1x64xf32>
    %205 = vector.shape_cast %204 : vector<1x1x64xf32> to vector<1x64xf32>
    %206 = vector.broadcast %205 : vector<1x64xf32> to vector<48x64xf32>
    %207 = arith.addf %203, %206 : vector<48x64xf32>
    %cst_124 = arith.constant 5.000000e-01 : f32
    %208 = vector.broadcast %cst_124 : f32 to vector<48x64xf32>
    %209 = arith.mulf %208, %207 : vector<48x64xf32>
    %cst_125 = arith.constant 0.707106769 : f32
    %210 = vector.broadcast %cst_125 : f32 to vector<48x64xf32>
    %211 = arith.mulf %207, %210 : vector<48x64xf32>
    %cst_126 = arith.constant 0.000000e+00 : f32
    %212 = vector.broadcast %cst_126 : f32 to vector<48x64xf32>
    %213 = arith.cmpf olt, %211, %212 : vector<48x64xf32>
    %cst_127 = arith.constant -1.000000e+00 : f32
    %cst_128 = arith.constant 1.000000e+00 : f32
    %214 = vector.broadcast %cst_127 : f32 to vector<48x64xf32>
    %215 = vector.broadcast %cst_128 : f32 to vector<48x64xf32>
    %216 = arith.select %213, %214, %215 : vector<48x64xi1>, vector<48x64xf32>
    %217 = math.absf %211 : vector<48x64xf32>
    %cst_129 = arith.constant 0.327591091 : f32
    %218 = vector.broadcast %cst_129 : f32 to vector<48x64xf32>
    %219 = arith.mulf %218, %217 : vector<48x64xf32>
    %cst_130 = arith.constant 1.000000e+00 : f32
    %220 = vector.broadcast %cst_130 : f32 to vector<48x64xf32>
    %221 = arith.addf %220, %219 : vector<48x64xf32>
    %cst_131 = arith.constant 1.000000e+00 : f32
    %222 = vector.broadcast %cst_131 : f32 to vector<48x64xf32>
    %223 = arith.divf %222, %221 : vector<48x64xf32>
    %cst_132 = arith.constant 1.06140542 : f32
    %224 = vector.broadcast %cst_132 : f32 to vector<48x64xf32>
    %225 = arith.mulf %224, %223 : vector<48x64xf32>
    %cst_133 = arith.constant -1.45315206 : f32
    %226 = vector.broadcast %cst_133 : f32 to vector<48x64xf32>
    %227 = arith.addf %225, %226 : vector<48x64xf32>
    %228 = arith.mulf %227, %223 : vector<48x64xf32>
    %cst_134 = arith.constant 1.42141378 : f32
    %229 = vector.broadcast %cst_134 : f32 to vector<48x64xf32>
    %230 = arith.addf %228, %229 : vector<48x64xf32>
    %231 = arith.mulf %230, %223 : vector<48x64xf32>
    %cst_135 = arith.constant -0.284496725 : f32
    %232 = vector.broadcast %cst_135 : f32 to vector<48x64xf32>
    %233 = arith.addf %231, %232 : vector<48x64xf32>
    %234 = arith.mulf %233, %223 : vector<48x64xf32>
    %cst_136 = arith.constant 0.254829586 : f32
    %235 = vector.broadcast %cst_136 : f32 to vector<48x64xf32>
    %236 = arith.addf %234, %235 : vector<48x64xf32>
    %237 = arith.mulf %236, %223 : vector<48x64xf32>
    %cst_137 = arith.constant 0.000000e+00 : f32
    %238 = vector.broadcast %cst_137 : f32 to vector<48x64xf32>
    %239 = arith.subf %238, %217 : vector<48x64xf32>
    %240 = arith.mulf %239, %217 : vector<48x64xf32>
    %241 = math.exp %240 : vector<48x64xf32>
    %242 = arith.mulf %237, %241 : vector<48x64xf32>
    %cst_138 = arith.constant 1.000000e+00 : f32
    %243 = vector.broadcast %cst_138 : f32 to vector<48x64xf32>
    %244 = arith.subf %243, %242 : vector<48x64xf32>
    %245 = arith.mulf %216, %244 : vector<48x64xf32>
    %cst_139 = arith.constant 1.000000e+00 : f32
    %246 = vector.broadcast %cst_139 : f32 to vector<48x64xf32>
    %247 = arith.addf %246, %245 : vector<48x64xf32>
    %248 = arith.mulf %209, %247 : vector<48x64xf32>
    %c1_140 = arith.constant 1 : index
    %c0_141 = arith.constant 0 : index
    %c0_142 = arith.constant 0 : index
    %249 = vector.load %arg12[%c1_140, %c0_141, %c0_142] : memref<2x64x32xf32, #tpu.memory_space<vmem>>, vector<1x64x32xf32>
    %250 = vector.shape_cast %249 : vector<1x64x32xf32> to vector<64x32xf32>
    %cst_143 = arith.constant dense<0.000000e+00> : vector<48x32xf32>
    %251 = tpu.matmul %248, %250, %cst_143 {dimension_numbers = #tpu.dot_dimension_numbers<[1], [0], [0], [1], [0, 0, 1, 1], [], []>} : vector<48x64xf32>, vector<64x32xf32>, vector<48x32xf32> -> vector<48x32xf32>
    %c1_144 = arith.constant 1 : index
    %c0_145 = arith.constant 0 : index
    %c0_146 = arith.constant 0 : index
    %252 = vector.load %arg13[%c1_144, %c0_145, %c0_146] : memref<2x1x32xf32, #tpu.memory_space<vmem>>, vector<1x1x32xf32>
    %253 = vector.shape_cast %252 : vector<1x1x32xf32> to vector<1x32xf32>
    %254 = vector.broadcast %253 : vector<1x32xf32> to vector<48x32xf32>
    %255 = arith.addf %251, %254 : vector<48x32xf32>
    %256 = arith.addf %255, %200 : vector<48x32xf32>
    %c1_147 = arith.constant 1 : index
    %c0_148 = arith.constant 0 : index
    %c0_149 = arith.constant 0 : index
    %257 = vector.load %arg14[%c1_147, %c0_148, %c0_149] : memref<2x1x32xf32, #tpu.memory_space<vmem>>, vector<1x1x32xf32>
    %258 = vector.shape_cast %257 : vector<1x1x32xf32> to vector<1x32xf32>
    %c1_150 = arith.constant 1 : index
    %c0_151 = arith.constant 0 : index
    %c0_152 = arith.constant 0 : index
    %259 = vector.load %arg15[%c1_150, %c0_151, %c0_152] : memref<2x1x32xf32, #tpu.memory_space<vmem>>, vector<1x1x32xf32>
    %260 = vector.shape_cast %259 : vector<1x1x32xf32> to vector<1x32xf32>
    %cst_153 = arith.constant dense<0.000000e+00> : vector<48xf32>
    %261 = vector.multi_reduction <add>, %256, %cst_153 [1] : vector<48x32xf32> to vector<48xf32>
    %262 = vector.shape_cast %261 : vector<48xf32> to vector<48x1xf32>
    %cst_154 = arith.constant 3.200000e+01 : f32
    %263 = vector.broadcast %cst_154 : f32 to vector<48x1xf32>
    %264 = arith.divf %262, %263 : vector<48x1xf32>
    %265 = vector.broadcast %264 : vector<48x1xf32> to vector<48x32xf32>
    %266 = arith.subf %256, %265 : vector<48x32xf32>
    %267 = arith.mulf %266, %266 : vector<48x32xf32>
    %cst_155 = arith.constant dense<0.000000e+00> : vector<48xf32>
    %268 = vector.multi_reduction <add>, %267, %cst_155 [1] : vector<48x32xf32> to vector<48xf32>
    %269 = vector.shape_cast %268 : vector<48xf32> to vector<48x1xf32>
    %cst_156 = arith.constant 3.200000e+01 : f32
    %270 = vector.broadcast %cst_156 : f32 to vector<48x1xf32>
    %271 = arith.divf %269, %270 : vector<48x1xf32>
    %272 = vector.broadcast %264 : vector<48x1xf32> to vector<48x32xf32>
    %273 = arith.subf %256, %272 : vector<48x32xf32>
    %cst_157 = arith.constant 9.99999997E-7 : f32
    %274 = vector.broadcast %cst_157 : f32 to vector<48x1xf32>
    %275 = arith.addf %271, %274 : vector<48x1xf32>
    %276 = math.rsqrt %275 : vector<48x1xf32>
    %277 = vector.broadcast %276 : vector<48x1xf32> to vector<48x32xf32>
    %278 = arith.mulf %273, %277 : vector<48x32xf32>
    %279 = vector.broadcast %258 : vector<1x32xf32> to vector<48x32xf32>
    %280 = arith.mulf %278, %279 : vector<48x32xf32>
    %281 = vector.broadcast %260 : vector<1x32xf32> to vector<48x32xf32>
    %282 = arith.addf %280, %281 : vector<48x32xf32>
    %c0_158 = arith.constant 0 : index
    %c0_159 = arith.constant 0 : index
    %283 = vector.load %arg16[%c0_158, %c0_159] : memref<48x1024xf32, #tpu.memory_space<vmem>>, vector<48x1024xf32>
    %cst_160 = arith.constant dense<0.000000e+00> : vector<32x1024xf32>
    %284 = tpu.matmul %282, %283, %cst_160 {dimension_numbers = #tpu.dot_dimension_numbers<[0], [0], [1], [1], [0, 1, 1, 1], [], []>} : vector<48x32xf32>, vector<48x1024xf32>, vector<32x1024xf32> -> vector<32x1024xf32>
    %285 = tpu.iota {dimensions = array<i32: 0>} : vector<32x1024xi32>
    %286 = tpu.iota {dimensions = array<i32: 1>} : vector<32x1024xi32>
    %c32_i32 = arith.constant 32 : i32
    %287 = vector.broadcast %c32_i32 : i32 to vector<32x1024xi32>
    %288 = arith.muli %285, %287 : vector<32x1024xi32>
    %289 = arith.cmpi sge, %286, %288 : vector<32x1024xi32>
    %c1_i32 = arith.constant 1 : i32
    %290 = vector.broadcast %c1_i32 : i32 to vector<32x1024xi32>
    %291 = arith.addi %285, %290 : vector<32x1024xi32>
    %c32_i32_161 = arith.constant 32 : i32
    %292 = vector.broadcast %c32_i32_161 : i32 to vector<32x1024xi32>
    %293 = arith.muli %291, %292 : vector<32x1024xi32>
    %294 = arith.cmpi slt, %286, %293 : vector<32x1024xi32>
    %295 = arith.andi %289, %294 : vector<32x1024xi1>
    %cst_162 = arith.constant 0.000000e+00 : f32
    %296 = vector.broadcast %cst_162 : f32 to vector<32x1024xf32>
    %297 = arith.select %295, %284, %296 : vector<32x1024xi1>, vector<32x1024xf32>
    %cst_163 = arith.constant dense<0.000000e+00> : vector<1024xf32>
    %298 = vector.multi_reduction <add>, %297, %cst_163 [0] : vector<32x1024xf32> to vector<1024xf32>
    %299 = vector.shape_cast %298 : vector<1024xf32> to vector<1x1024xf32>
    %300 = vector.extract_strided_slice %299 {offsets = [0, 0], sizes = [1, 512], strides = [1, 1]} : vector<1x1024xf32> to vector<1x512xf32>
    %301 = vector.extract_strided_slice %299 {offsets = [0, 512], sizes = [1, 512], strides = [1, 1]} : vector<1x1024xf32> to vector<1x512xf32>
    %302 = arith.addf %300, %301 : vector<1x512xf32>
    %303 = vector.extract_strided_slice %302 {offsets = [0, 0], sizes = [1, 256], strides = [1, 1]} : vector<1x512xf32> to vector<1x256xf32>
    %304 = vector.extract_strided_slice %302 {offsets = [0, 256], sizes = [1, 256], strides = [1, 1]} : vector<1x512xf32> to vector<1x256xf32>
    %305 = arith.addf %303, %304 : vector<1x256xf32>
    %306 = vector.extract_strided_slice %305 {offsets = [0, 0], sizes = [1, 128], strides = [1, 1]} : vector<1x256xf32> to vector<1x128xf32>
    %307 = vector.extract_strided_slice %305 {offsets = [0, 128], sizes = [1, 128], strides = [1, 1]} : vector<1x256xf32> to vector<1x128xf32>
    %308 = arith.addf %306, %307 : vector<1x128xf32>
    %309 = vector.extract_strided_slice %308 {offsets = [0, 0], sizes = [1, 64], strides = [1, 1]} : vector<1x128xf32> to vector<1x64xf32>
    %310 = vector.extract_strided_slice %308 {offsets = [0, 64], sizes = [1, 64], strides = [1, 1]} : vector<1x128xf32> to vector<1x64xf32>
    %311 = arith.addf %309, %310 : vector<1x64xf32>
    %312 = vector.extract_strided_slice %311 {offsets = [0, 0], sizes = [1, 32], strides = [1, 1]} : vector<1x64xf32> to vector<1x32xf32>
    %313 = vector.extract_strided_slice %311 {offsets = [0, 32], sizes = [1, 32], strides = [1, 1]} : vector<1x64xf32> to vector<1x32xf32>
    %314 = arith.addf %312, %313 : vector<1x32xf32>
    %cst_164 = arith.constant 5.000000e-01 : f32
    %315 = vector.broadcast %cst_164 : f32 to vector<1x32xf32>
    %316 = arith.mulf %315, %314 : vector<1x32xf32>
    %cst_165 = arith.constant 0.707106769 : f32
    %317 = vector.broadcast %cst_165 : f32 to vector<1x32xf32>
    %318 = arith.mulf %314, %317 : vector<1x32xf32>
    %cst_166 = arith.constant 0.000000e+00 : f32
    %319 = vector.broadcast %cst_166 : f32 to vector<1x32xf32>
    %320 = arith.cmpf olt, %318, %319 : vector<1x32xf32>
    %cst_167 = arith.constant -1.000000e+00 : f32
    %cst_168 = arith.constant 1.000000e+00 : f32
    %321 = vector.broadcast %cst_167 : f32 to vector<1x32xf32>
    %322 = vector.broadcast %cst_168 : f32 to vector<1x32xf32>
    %323 = arith.select %320, %321, %322 : vector<1x32xi1>, vector<1x32xf32>
    %324 = math.absf %318 : vector<1x32xf32>
    %cst_169 = arith.constant 0.327591091 : f32
    %325 = vector.broadcast %cst_169 : f32 to vector<1x32xf32>
    %326 = arith.mulf %325, %324 : vector<1x32xf32>
    %cst_170 = arith.constant 1.000000e+00 : f32
    %327 = vector.broadcast %cst_170 : f32 to vector<1x32xf32>
    %328 = arith.addf %327, %326 : vector<1x32xf32>
    %cst_171 = arith.constant 1.000000e+00 : f32
    %329 = vector.broadcast %cst_171 : f32 to vector<1x32xf32>
    %330 = arith.divf %329, %328 : vector<1x32xf32>
    %cst_172 = arith.constant 1.06140542 : f32
    %331 = vector.broadcast %cst_172 : f32 to vector<1x32xf32>
    %332 = arith.mulf %331, %330 : vector<1x32xf32>
    %cst_173 = arith.constant -1.45315206 : f32
    %333 = vector.broadcast %cst_173 : f32 to vector<1x32xf32>
    %334 = arith.addf %332, %333 : vector<1x32xf32>
    %335 = arith.mulf %334, %330 : vector<1x32xf32>
    %cst_174 = arith.constant 1.42141378 : f32
    %336 = vector.broadcast %cst_174 : f32 to vector<1x32xf32>
    %337 = arith.addf %335, %336 : vector<1x32xf32>
    %338 = arith.mulf %337, %330 : vector<1x32xf32>
    %cst_175 = arith.constant -0.284496725 : f32
    %339 = vector.broadcast %cst_175 : f32 to vector<1x32xf32>
    %340 = arith.addf %338, %339 : vector<1x32xf32>
    %341 = arith.mulf %340, %330 : vector<1x32xf32>
    %cst_176 = arith.constant 0.254829586 : f32
    %342 = vector.broadcast %cst_176 : f32 to vector<1x32xf32>
    %343 = arith.addf %341, %342 : vector<1x32xf32>
    %344 = arith.mulf %343, %330 : vector<1x32xf32>
    %cst_177 = arith.constant 0.000000e+00 : f32
    %345 = vector.broadcast %cst_177 : f32 to vector<1x32xf32>
    %346 = arith.subf %345, %324 : vector<1x32xf32>
    %347 = arith.mulf %346, %324 : vector<1x32xf32>
    %348 = math.exp %347 : vector<1x32xf32>
    %349 = arith.mulf %344, %348 : vector<1x32xf32>
    %cst_178 = arith.constant 1.000000e+00 : f32
    %350 = vector.broadcast %cst_178 : f32 to vector<1x32xf32>
    %351 = arith.subf %350, %349 : vector<1x32xf32>
    %352 = arith.mulf %323, %351 : vector<1x32xf32>
    %cst_179 = arith.constant 1.000000e+00 : f32
    %353 = vector.broadcast %cst_179 : f32 to vector<1x32xf32>
    %354 = arith.addf %353, %352 : vector<1x32xf32>
    %355 = arith.mulf %316, %354 : vector<1x32xf32>
    %c0_180 = arith.constant 0 : index
    %c0_181 = arith.constant 0 : index
    %356 = vector.load %arg17[%c0_180, %c0_181] : memref<1x32xf32, #tpu.memory_space<vmem>>, vector<1x32xf32>
    %c0_182 = arith.constant 0 : index
    %c0_183 = arith.constant 0 : index
    %357 = vector.load %arg18[%c0_182, %c0_183] : memref<1x32xf32, #tpu.memory_space<vmem>>, vector<1x32xf32>
    %cst_184 = arith.constant dense<0.000000e+00> : vector<1xf32>
    %358 = vector.multi_reduction <add>, %355, %cst_184 [1] : vector<1x32xf32> to vector<1xf32>
    %359 = vector.shape_cast %358 : vector<1xf32> to vector<1x1xf32>
    %cst_185 = arith.constant 3.200000e+01 : f32
    %360 = vector.broadcast %cst_185 : f32 to vector<1x1xf32>
    %361 = arith.divf %359, %360 : vector<1x1xf32>
    %362 = vector.broadcast %361 : vector<1x1xf32> to vector<1x32xf32>
    %363 = arith.subf %355, %362 : vector<1x32xf32>
    %364 = arith.mulf %363, %363 : vector<1x32xf32>
    %cst_186 = arith.constant dense<0.000000e+00> : vector<1xf32>
    %365 = vector.multi_reduction <add>, %364, %cst_186 [1] : vector<1x32xf32> to vector<1xf32>
    %366 = vector.shape_cast %365 : vector<1xf32> to vector<1x1xf32>
    %cst_187 = arith.constant 3.200000e+01 : f32
    %367 = vector.broadcast %cst_187 : f32 to vector<1x1xf32>
    %368 = arith.divf %366, %367 : vector<1x1xf32>
    %369 = vector.broadcast %361 : vector<1x1xf32> to vector<1x32xf32>
    %370 = arith.subf %355, %369 : vector<1x32xf32>
    %cst_188 = arith.constant 9.99999997E-7 : f32
    %371 = vector.broadcast %cst_188 : f32 to vector<1x1xf32>
    %372 = arith.addf %368, %371 : vector<1x1xf32>
    %373 = math.rsqrt %372 : vector<1x1xf32>
    %374 = vector.broadcast %373 : vector<1x1xf32> to vector<1x32xf32>
    %375 = arith.mulf %370, %374 : vector<1x32xf32>
    %376 = arith.mulf %375, %356 : vector<1x32xf32>
    %377 = arith.addf %376, %357 : vector<1x32xf32>
    %c0_189 = arith.constant 0 : index
    %c0_190 = arith.constant 0 : index
    %c0_191 = arith.constant 0 : index
    %378 = vector.load %arg19[%c0_189, %c0_190, %c0_191] : memref<1x1x32xf32, #tpu.memory_space<vmem>>, vector<1x1x32xf32>
    %379 = vector.shape_cast %378 : vector<1x1x32xf32> to vector<1x32xf32>
    %380 = vector.shape_cast %377 : vector<1x32xf32> to vector<1x1x32xf32>
    tpu.vector_store %arg19[%c0_189, %c0_190, %c0_191], %380 {strides = array<i32>} : memref<1x1x32xf32, #tpu.memory_space<vmem>>, vector<1x1x32xf32>,
    return
  }
  func.func @transform_0(%arg0: i32) -> (i32, i32, i32) {
    %c0_i32 = arith.constant 0 : i32
    %c0_i32_0 = arith.constant 0 : i32
    %c0_i32_1 = arith.constant 0 : i32
    return %arg0, %c0_i32, %c0_i32_0 : i32, i32, i32
  }
  func.func @transform_1(%arg0: i32) -> (i32, i32) {
    %c0_i32 = arith.constant 0 : i32
    %c0_i32_0 = arith.constant 0 : i32
    %c0_i32_1 = arith.constant 0 : i32
    return %c0_i32, %c0_i32_0 : i32, i32
  }
  func.func @transform_2(%arg0: i32) -> (i32, i32) {
    %c0_i32 = arith.constant 0 : i32
    %c0_i32_0 = arith.constant 0 : i32
    %c0_i32_1 = arith.constant 0 : i32
    return %c0_i32, %c0_i32_0 : i32, i32
  }
  func.func @transform_3(%arg0: i32) -> (i32, i32, i32, i32) {
    %c0_i32 = arith.constant 0 : i32
    %c0_i32_0 = arith.constant 0 : i32
    %c0_i32_1 = arith.constant 0 : i32
    %c0_i32_2 = arith.constant 0 : i32
    %c0_i32_3 = arith.constant 0 : i32
    return %c0_i32, %c0_i32_0, %c0_i32_1, %c0_i32_2 : i32, i32, i32, i32
  }
  func.func @transform_4(%arg0: i32) -> (i32, i32, i32, i32) {
    %c0_i32 = arith.constant 0 : i32
    %c0_i32_0 = arith.constant 0 : i32
    %c0_i32_1 = arith.constant 0 : i32
    %c0_i32_2 = arith.constant 0 : i32
    %c0_i32_3 = arith.constant 0 : i32
    return %c0_i32, %c0_i32_0, %c0_i32_1, %c0_i32_2 : i32, i32, i32, i32
  }
  func.func @transform_5(%arg0: i32) -> (i32, i32, i32, i32) {
    %c0_i32 = arith.constant 0 : i32
    %c0_i32_0 = arith.constant 0 : i32
    %c0_i32_1 = arith.constant 0 : i32
    %c0_i32_2 = arith.constant 0 : i32
    %c0_i32_3 = arith.constant 0 : i32
    return %c0_i32, %c0_i32_0, %c0_i32_1, %c0_i32_2 : i32, i32, i32, i32
  }
  func.func @transform_6(%arg0: i32) -> (i32, i32, i32, i32) {
    %c0_i32 = arith.constant 0 : i32
    %c0_i32_0 = arith.constant 0 : i32
    %c0_i32_1 = arith.constant 0 : i32
    %c0_i32_2 = arith.constant 0 : i32
    %c0_i32_3 = arith.constant 0 : i32
    return %c0_i32, %c0_i32_0, %c0_i32_1, %c0_i32_2 : i32, i32, i32, i32
  }
  func.func @transform_7(%arg0: i32) -> (i32, i32, i32) {
    %c0_i32 = arith.constant 0 : i32
    %c0_i32_0 = arith.constant 0 : i32
    %c0_i32_1 = arith.constant 0 : i32
    %c0_i32_2 = arith.constant 0 : i32
    return %c0_i32, %c0_i32_0, %c0_i32_1 : i32, i32, i32
  }
  func.func @transform_8(%arg0: i32) -> (i32, i32, i32) {
    %c0_i32 = arith.constant 0 : i32
    %c0_i32_0 = arith.constant 0 : i32
    %c0_i32_1 = arith.constant 0 : i32
    %c0_i32_2 = arith.constant 0 : i32
    return %c0_i32, %c0_i32_0, %c0_i32_1 : i32, i32, i32
  }
  func.func @transform_9(%arg0: i32) -> (i32, i32, i32) {
    %c0_i32 = arith.constant 0 : i32
    %c0_i32_0 = arith.constant 0 : i32
    %c0_i32_1 = arith.constant 0 : i32
    %c0_i32_2 = arith.constant 0 : i32
    return %c0_i32, %c0_i32_0, %c0_i32_1 : i32, i32, i32
  }
  func.func @transform_10(%arg0: i32) -> (i32, i32, i32) {
    %c0_i32 = arith.constant 0 : i32
    %c0_i32_0 = arith.constant 0 : i32
    %c0_i32_1 = arith.constant 0 : i32
    %c0_i32_2 = arith.constant 0 : i32
    return %c0_i32, %c0_i32_0, %c0_i32_1 : i32, i32, i32
  }
  func.func @transform_11(%arg0: i32) -> (i32, i32, i32) {
    %c0_i32 = arith.constant 0 : i32
    %c0_i32_0 = arith.constant 0 : i32
    %c0_i32_1 = arith.constant 0 : i32
    %c0_i32_2 = arith.constant 0 : i32
    return %c0_i32, %c0_i32_0, %c0_i32_1 : i32, i32, i32
  }
  func.func @transform_12(%arg0: i32) -> (i32, i32, i32) {
    %c0_i32 = arith.constant 0 : i32
    %c0_i32_0 = arith.constant 0 : i32
    %c0_i32_1 = arith.constant 0 : i32
    %c0_i32_2 = arith.constant 0 : i32
    return %c0_i32, %c0_i32_0, %c0_i32_1 : i32, i32, i32
  }
  func.func @transform_13(%arg0: i32) -> (i32, i32, i32) {
    %c0_i32 = arith.constant 0 : i32
    %c0_i32_0 = arith.constant 0 : i32
    %c0_i32_1 = arith.constant 0 : i32
    %c0_i32_2 = arith.constant 0 : i32
    return %c0_i32, %c0_i32_0, %c0_i32_1 : i32, i32, i32
  }
  func.func @transform_14(%arg0: i32) -> (i32, i32, i32) {
    %c0_i32 = arith.constant 0 : i32
    %c0_i32_0 = arith.constant 0 : i32
    %c0_i32_1 = arith.constant 0 : i32
    %c0_i32_2 = arith.constant 0 : i32
    return %c0_i32, %c0_i32_0, %c0_i32_1 : i32, i32, i32
  }
  func.func @transform_15(%arg0: i32) -> (i32, i32) {
    %c0_i32 = arith.constant 0 : i32
    %c0_i32_0 = arith.constant 0 : i32
    %c0_i32_1 = arith.constant 0 : i32
    return %c0_i32, %c0_i32_0 : i32, i32
  }
  func.func @transform_16(%arg0: i32) -> (i32, i32) {
    %c0_i32 = arith.constant 0 : i32
    %c0_i32_0 = arith.constant 0 : i32
    %c0_i32_1 = arith.constant 0 : i32
    return %c0_i32, %c0_i32_0 : i32, i32
  }
  func.func @transform_17(%arg0: i32) -> (i32, i32) {
    %c0_i32 = arith.constant 0 : i32
    %c0_i32_0 = arith.constant 0 : i32
    %c0_i32_1 = arith.constant 0 : i32
    return %c0_i32, %c0_i32_0 : i32, i32
  }
  func.func @transform_18(%arg0: i32) -> (i32, i32, i32) {
    %c0_i32 = arith.constant 0 : i32
    %c0_i32_0 = arith.constant 0 : i32
    %c0_i32_1 = arith.constant 0 : i32
    return %arg0, %c0_i32, %c0_i32_0 : i32, i32, i32
  }
}

</mosaic_0001>

<bundles_post_ra>
// kernel: tile.6
= control target key start
LH: loop header
LB: loop body
LE: loop exit
PB: predicated region body
PF: predicated region fallthrough
CT: control target
= control target key end

     0   :  { %s22_s0 = inlined_call_operand.vmem [shape: s32[3], index: 0, kind: input, shape index: {}]   ;;  %s23_s1 = inlined_call_operand.vmem [shape: s32[4,3], index: 1, kind: output, shape index: {}]  }
   0x1   :  { %v4_v0 = vld [vmem:[%s22_s0] ss:$0 sm:$0xff] }
   0x2   :  { %5 = vst [vmem:[%s23_s1] sm:$0xf] %v4_v0 }

// kernel: model_forward.1
= control target key start
LH: loop header
LB: loop body
LE: loop exit
PB: predicated region body
PF: predicated region fallthrough
CT: control target
= control target key end

     0   :  { %s14541_s0 = inlined_call_operand.vmem [shape: f32[2,48,32], index: 0, kind: input, shape index: {}]   ;;  %s14542_s1 = inlined_call_operand.vmem [shape: f32[48,32], index: 1, kind: input, shape index: {}]   ;;  %s14543_s2 = inlined_call_operand.vmem [shape: f32[48,48], index: 2, kind: input, shape index: {}]   ;;  %s14544_s3 = inlined_call_operand.vmem [shape: f32[2,4,32,8], index: 3, kind: input, shape index: {}]   ;;  %s14545_s4 = inlined_call_operand.vmem [shape: f32[2,4,32,8], index: 4, kind: input, shape index: {}]   ;;  %s14546_s5 = inlined_call_operand.vmem [shape: f32[2,4,32,8], index: 5, kind: input, shape index: {}]   ;;  %s14547_s6 = inlined_call_operand.vmem [shape: f32[2,4,8,32], index: 6, kind: input, shape index: {}]   ;;  %s14548_s7 = inlined_call_operand.vmem [shape: f32[2,1,32], index: 7, kind: input, shape index: {}]   ;;  %s14549_s8 = inlined_call_operand.vmem [shape: f32[2,1,32], index: 8, kind: input, shape index: {}]   ;;  %s14550_s9 = inlined_call_operand.vmem [shape: f32[2,32,64], index: 9, kind: input, shape index: {}]   ;;  %s14551_s10 = inlined_call_operand.vmem [shape: f32[2,1,64], index: 10, kind: input, shape index: {}]   ;;  %s14552_s11 = inlined_call_operand.vmem [shape: f32[2,64,32], index: 11, kind: input, shape index: {}]   ;;  %s14553_s12 = inlined_call_operand.vmem [shape: f32[2,1,32], index: 12, kind: input, shape index: {}]   ;;  %s14554_s13 = inlined_call_operand.vmem [shape: f32[2,1,32], index: 13, kind: input, shape index: {}]   ;;  %s14555_s14 = inlined_call_operand.vmem [shape: f32[2,1,32], index: 14, kind: input, shape index: {}]   ;;  %s14556_s15 = inlined_call_operand.vmem [shape: f32[48,1024], index: 15, kind: input, shape index: {}]   ;;  %s14557_s16 = inlined_call_operand.vmem [shape: f32[1,32], index: 16, kind: input, shape index: {}]   ;;  %s14558_s17 = inlined_call_operand.vmem [shape: f32[1,32], index: 17, kind: input, shape index: {}]   ;;  %s14559_s18 = inlined_call_operand.hbm [shape: f32[2,1,32], index: 18, kind: output, shape index: {}]  }
   0x1   :  { %14569 = sst [smem:[#allocation11_spill]] %s14541_s0 }
   0x2   :  { %14570 = sst [smem:[#allocation12_spill]] %s14542_s1 }
   0x3   :  { %14571 = sst [smem:[#allocation13_spill]] %s14543_s2 }
   0x4   :  { %14572 = sst [smem:[#allocation14_spill]] %s14544_s3 }
   0x5   :  { %14573 = sst [smem:[#allocation15_spill]] %s14557_s16 }
   0x6   :  { %14574 = sst [smem:[#allocation16_spill]] %s14558_s17 }
   0x7   :  { %14575 = sst [smem:[#allocation17_spill]] %s14559_s18 }
   0x8   :  { %23 = vsyncpa [#allocation3], 0 }
   0x9   :  { %25 = vsyncpa [#allocation3 + $0x1], 0  ;;  %s11535_s27 = smov 0   ;;  %s11537_s28 = smov 0  }
   0xa   :  { %s11539_s29 = smov 0   ;;  %s11541_s30 = smov 0  }
   0xb LB: > { %14576 = sst [smem:[#allocation5_spill]] %s11421_s27  ;;  %s11556_s0 = sadd.s32 4294967295, %s11433_s30   ;;  %s11433_s30 = sphi %s11541_s30, %s14679_s30   ;;  %s11429_s29 = sphi %s11539_s29, %s14681_s29   ;;  %s11425_s28 = sphi %s11537_s28, %s14683_s28   ;;  %s11421_s27 = sphi %s11535_s27, %s14682_s27  }
   0xc   : > { %14577 = sst [smem:[#allocation6_spill]] %s11429_s29  ;;  %s8575_s19 = sadd.s32 4294967294, %s11433_s30  }
   0xd   : > { %14578 = sst [smem:[#allocation7_spill]] %s11433_s30  ;;  %s11560_s1 = sadd.s32 1, %s11433_s30  }
   0xe   : > { %14579 = sst [smem:[#allocation8_spill]] %s11560_s1  ;;  %s421_s20 = sadd.s32 1, %s11429_s29 }
   0xf   : > { %s418_s21 = ssub.s32 %s11433_s30, %s11560_s1  ;;  %p431_p0 = scmp.ne.s32.totalorder %s11429_s29, %s11425_s28 }
  0x10   : > { %p419_p1 = scmp.eq.s32.totalorder %s418_s21, 0  ;;  %p432_p2 = scmp.eq.s32.totalorder %s11556_s0, 1 }
  0x11   : > { %p437_p3 = scmp.ne.s32.totalorder %s11425_s28, %s11421_s27  ;;  %p438_p4 = scmp.eq.s32.totalorder %s8575_s19, 1 }
  0x12   : > { %s11571_s22 = scalar_select %p419_p1, %s11429_s29, %s421_s20  }
  0x13   : > { %p11573_p5 = por %p432_p2, %p431_p0  ;;  %p11577_p6 = por %p438_p4, %p437_p3 }
  0x14   : > { %14580 = sst [smem:[#allocation9_spill]] %s11571_s22  ;;  %p8578_p7 = scmp.ge.s32.totalorder %s11433_s30, 1 }
  0x15   : > { %s14582_s23 = scalar_select %p11577_p6, 1, 0 }
  0x16   : > { %p515_p8 = scmp.lt.s32.totalorder %s11433_s30, 3 }
  0x17   : > { %14583 = sst [smem:[#allocation10_spill]] %s14582_s23 }
  0x18   : > { %p516_p9 = pnand %p8578_p7, %p515_p8 }
  0x19   : > { %s14584_s3 = sld [smem:[#allocation14_spill]] (!%p516_p9)  ;;  %p568_p10 = scmp.lt.s32.totalorder (!%p516_p9), %s11556_s0, 1  ;;  %vm613_vm0 = vcmask (!%p516_p9), 261120   ;;  %v1012_v39 = vld [vmem:[%s14545_s4] sm:$0xff] (!%p516_p9)  ;;  %v1013_v40 = vld [vmem:[%s14545_s4 + $0x8] sm:$0xff] (!%p516_p9)  ;;  %v1014_v48 = vld [vmem:[%s14545_s4 + $0x10] sm:$0xff] (!%p516_p9) }
  0x1a   : > { %519 = sbr.rel (%p516_p9) target bundleno = 5784 (0x1698), region = 92  ;;  %s14585_s27 = sld [smem:[#allocation12_spill]] (!%p516_p9)  ;;  %v1016_v43 = vld [vmem:[%s14545_s4 + $0x20] sm:$0xff] (!%p516_p9)  ;;  %v1017_v44 = vld [vmem:[%s14545_s4 + $0x28] sm:$0xff] (!%p516_p9)  ;;  %v10525_v45 = vpack.c.bf16 (!%p516_p9), %v1013_v40, %v1012_v39  ;;  %v1015_v49 = vld [vmem:[%s14545_s4 + $0x18] sm:$0xff] (!%p516_p9)  ;;  %vm1804_vm1 = vcmask (!%p516_p9), 64512  }
  0x1b   : > { %s14587_s26 = sld [smem:[#allocation11_spill]] (!%p516_p9)  ;;  %v10533_v47 = vpack.c.bf16 (!%p516_p9), %v1017_v44, %v1016_v43  ;;  %v1018_v50 = vld [vmem:[%s14545_s4 + $0x30] sm:$0xff] (!%p516_p9)  ;;  %v1019_v51 = vld [vmem:[%s14545_s4 + $0x38] sm:$0xff] (!%p516_p9)  ;;  %v10529_v52 = vpack.c.bf16 (!%p516_p9), %v1015_v49, %v1014_v48  ;;  %v1020_v54 = vld [vmem:[%s14545_s4 + $0x40] sm:$0xff] (!%p516_p9)  ;;  %vm2329_vm3 = vcmask (!%p516_p9), 392192   ;;  %vm3956_vm6 = vcmask (!%p516_p9), 523264  }
  0x1c   : > { %v10537_v53 = vpack.c.bf16 (!%p516_p9), %v1019_v51, %v1018_v50  ;;  %v1021_v55 = vld [vmem:[%s14545_s4 + $0x48] sm:$0xff] (!%p516_p9)  ;;  %v1024_v56 = vld [vmem:[%s14545_s4 + $0x60] sm:$0xff] (!%p516_p9)  ;;  %v1022_v60 = vld [vmem:[%s14545_s4 + $0x50] sm:$0xff] (!%p516_p9)  ;;  %s11437_s20 = smov (!%p516_p9), 64   ;;  %s11438_s21 = smov (!%p516_p9), 96  }
  0x1d   : > { %v1025_v57 = vld [vmem:[%s14545_s4 + $0x68] sm:$0xff] (!%p516_p9)  ;;  %v10541_v58 = vpack.c.bf16 (!%p516_p9), %v1021_v55, %v1020_v54  ;;  %v1023_v61 = vld [vmem:[%s14545_s4 + $0x58] sm:$0xff] (!%p516_p9)  ;;  %v1026_v62 = vld [vmem:[%s14545_s4 + $0x70] sm:$0xff] (!%p516_p9)  ;;  %s566_s16 = sand.u32 (!%p516_p9), 1, %s11425_s28   ;;  %s14673_s22 = sld [smem:[#allocation15_spill]] (!%p516_p9) }
  0x1e   : > { %v10549_v59 = vpack.c.bf16 (!%p516_p9), %v1025_v57, %v1024_v56  ;;  %v1027_v63 = vld [vmem:[%s14545_s4 + $0x78] sm:$0xff] (!%p516_p9)  ;;  %vm11962_vm2 = vmpackc.low (!%p516_p9), %vm1804_vm1, %vm1804_vm1  ;;  %s14674_s23 = sld [smem:[#allocation16_spill]] (!%p516_p9)  ;;  %s8508_s17 = scalar_lea.sflag (!%p516_p9), [#allocation3], %s566_s16 }
  0x1f   : > { %v597_v0 = vld [vmem:[%s14584_s3] sm:$0xff] (!%p516_p9)  ;;  %v598_v1 = vld [vmem:[%s14584_s3 + $0x8] sm:$0xff] (!%p516_p9)  ;;  %v599_v5 = vld [vmem:[%s14584_s3 + $0x10] sm:$0xff] (!%p516_p9) }
  0x20   : > { %v601_v2 = vld [vmem:[%s14584_s3 + $0x20] sm:$0xff] (!%p516_p9)  ;;  %v10493_v3 = vpack.c.bf16 (!%p516_p9), %v598_v1, %v597_v0  ;;  %v602_v4 = vld [vmem:[%s14584_s3 + $0x28] sm:$0xff] (!%p516_p9)  ;;  %v600_v6 = vld [vmem:[%s14584_s3 + $0x18] sm:$0xff] (!%p516_p9)  ;;  %s14586_s18 = smov (!%p516_p9), %s14585_s27  ;;  %v10545_v0 = vpack.c.bf16 (!%p516_p9), %v1023_v61, %v1022_v60  ;;  %v10553_v1 = vpack.c.bf16 (!%p516_p9), %v1027_v63, %v1026_v62 }
  0x21   : > { %v10501_v7 = vpack.c.bf16 %v602_v4, %v601_v2  ;;  %v10497_v8 = vpack.c.bf16 %v600_v6, %v599_v5  ;;  %v603_v9 = vld [vmem:[%s14584_s3 + $0x30] sm:$0xff]  ;;  %v604_v10 = vld [vmem:[%s14584_s3 + $0x38] sm:$0xff]  ;;  %s569_s29 = scalar_select %p568_p10, %s11556_s0, 1  ;;  %v605_v12 = vld [vmem:[%s14584_s3 + $0x40] sm:$0xff] }
  0x22   : > { %10494 = vmatprep.subr.bf16.mxu0 %v10493_v3  ;;  %v10505_v11 = vpack.c.bf16 %v604_v10, %v603_v9  ;;  %v606_v13 = vld [vmem:[%s14584_s3 + $0x48] sm:$0xff]  ;;  %v609_v14 = vld [vmem:[%s14584_s3 + $0x60] sm:$0xff]  ;;  %v581_v19 = vld [vmem:[%s14586_s18 + $0x10] sm:$0xff] }
  0x23   : > { %10502 = vmatprep.subr.bf16.mxu1 %v10501_v7  ;;  %10496 = vmatpush3.bf16.msra.mxu0 %v10493_v3  ;;  %s11027_s25 = smul.u32 48, %s569_s29  ;;  %v579_v15 = vld [vmem:[%s14585_s27] sm:$0xff]  ;;  %v580_v16 = vld [vmem:[%s14586_s18 + $0x8] sm:$0xff]  ;;  %v10509_v17 = vpack.c.bf16 %v606_v13, %v605_v12  ;;  %v607_v20 = vld [vmem:[%s14584_s3 + $0x50] sm:$0xff]  ;;  %s14590_s29 = sld [smem:[#allocation13_spill]] }
  0x24   : > { %10504 = vmatpush3.bf16.msra.mxu1 %v10501_v7  ;;  %10498 = vmatprep.subr.bf16.mxu0 %v10497_v8  ;;  %v610_v18 = vld [vmem:[%s14584_s3 + $0x68] sm:$0xff]  ;;  %v608_v21 = vld [vmem:[%s14584_s3 + $0x58] sm:$0xff]  ;;  %v611_v30 = vld [vmem:[%s14584_s3 + $0x70] sm:$0xff] }
  0x25   : > { %10506 = vmatprep.subr.bf16.mxu1 %v10505_v11  ;;  %s11630_s19 = scalar_lea.vmem %s14587_s26, %s11027_s25  ;;  %v10517_v25 = vpack.c.bf16 %v610_v18, %v609_v14  ;;  %v582_v29 = vld [vmem:[%s14586_s18 + $0x18] sm:$0xff]  ;;  %v583_v33 = vld [vmem:[%s14586_s18 + $0x20] sm:$0xff]  ;;  %v10513_v35 = vpack.c.bf16 %v608_v21, %v607_v20  ;;  %v584_v37 = vld [vmem:[%s14586_s18 + $0x28] sm:$0xff]  ;;  %s567_s26 = scalar_lea.vmem [#allocation2], %s566_s16 }
  0x26   : > { %v573_v22 = vld [vmem:[%s11630_s19] sm:$0xff]  ;;  %v574_v23 = vld [vmem:[%s11630_s19 + $0x8] sm:$0xff]  ;;  %v575_v24 = vld [vmem:[%s11630_s19 + $0x10] sm:$0xff]  ;;  %s8520_s27 = sshll.u32 %s567_s26, 4  ;;  %s14500_s27 = int_to_ptr.vmem [resolvable:$true] %s8520_s27 }
  0x27   : > { %10500 = vmatpush3.bf16.msra.mxu0 %v10497_v8  ;;  %v11644_v26 = vadd.f32 %v579_v15, %v573_v22  ;;  %v11646_v27 = vadd.f32 %v580_v16, %v574_v23  ;;  %v576_v28 = vld [vmem:[%s11630_s19 + $0x18] sm:$0xff]  ;;  %v11655_v31 = vadd.f32 %v581_v19, %v575_v24  ;;  %v577_v32 = vld [vmem:[%s11630_s19 + $0x20] sm:$0xff]  ;;  %v578_v42 = vld [vmem:[%s11630_s19 + $0x28] sm:$0xff]  ;;  %s11371_s25 = scalar_lea.vmem %s14500_s27, 16 }
  0x28   : > { %10508 = vmatpush3.bf16.msra.mxu1 %v10505_v11  ;;  %10510 = vmatprep.subr.bf16.mxu0 %v10509_v17  ;;  %v612_v34 = vld [vmem:[%s14584_s3 + $0x78] sm:$0xff]  ;;  %v11670_v36 = vadd.f32 %v582_v29, %v576_v28  ;;  %v11683_v41 = vadd.f32 %v583_v33, %v577_v32  ;;  %v11698_v46 = vadd.f32 %v584_v37, %v578_v42  ;;  %v1408_v2 = vld [vmem:[%s14546_s5] sm:$0xff]  ;;  %v1409_v3 = vld [vmem:[%s14546_s5 + $0x8] sm:$0xff]  ;;  %p11372_p11 = scmp.ne.s32.totalorder %s14500_s27, %s11371_s25 }
  0x29   : > { %9585 = vmatprep.mubr.msk.f32.mxu0 %vm613_vm0, %v11644_v26  ;;  %9602 = vmatprep.mubr.msk.f32.mxu1 %vm613_vm0, %v11644_v26  ;;  %v10521_v38 = vpack.c.bf16 %v612_v34, %v611_v30  ;;  %v1412_v4 = vld [vmem:[%s14546_s5 + $0x20] sm:$0xff]  ;;  %v1413_v5 = vld [vmem:[%s14546_s5 + $0x28] sm:$0xff]  ;;  %v10557_v6 = vpack.c.bf16 %v1409_v3, %v1408_v2  ;;  %v1410_v8 = vld [vmem:[%s14546_s5 + $0x10] sm:$0xff]  ;;  %s14591_s24 = smov %s14590_s29 }
  0x2a   : > { %9586 = vmatmul.mubr.msk.f32.vlgmr.msra.gmra.mrb[0].mxu0 %vm613_vm0, %v11646_v27  ;;  %10518 = vmatprep.subr.bf16.mxu1 %v10517_v25  ;;  %v10565_v7 = vpack.c.bf16 %v1413_v5, %v1412_v4  ;;  %v1411_v9 = vld [vmem:[%s14546_s5 + $0x18] sm:$0xff]  ;;  %v1414_v10 = vld [vmem:[%s14546_s5 + $0x30] sm:$0xff]  ;;  %v1416_v13 = vld [vmem:[%s14546_s5 + $0x40] sm:$0xff]  ;;  %p11373_p12 = pnand %p11372_p11, %p11573_p5 }
  0x2b   : > { %9603 = vmatmul.mubr.msk.f32.vlgmr.msra.gmra.mrb[0].mxu1 %vm613_vm0, %v11646_v27  ;;  %10512 = vmatpush3.bf16.msra.mxu0 %v10509_v17  ;;  %v1415_v11 = vld [vmem:[%s14546_s5 + $0x38] sm:$0xff]  ;;  %v10561_v12 = vpack.c.bf16 %v1411_v9, %v1410_v8  ;;  %v1417_v14 = vld [vmem:[%s14546_s5 + $0x48] sm:$0xff]  ;;  %v1420_v16 = vld [vmem:[%s14546_s5 + $0x60] sm:$0xff] }
  0x2c   : > { %9588 = vmatprep.mubr.msk.f32.mxu0 %vm613_vm0, %v11655_v31  ;;  %9605 = vmatprep.mubr.msk.f32.mxu1 %vm613_vm0, %v11655_v31  ;;  %v10569_v15 = vpack.c.bf16 %v1415_v11, %v1414_v10  ;;  %v1421_v17 = vld [vmem:[%s14546_s5 + $0x68] sm:$0xff]  ;;  %v10573_v18 = vpack.c.bf16 %v1417_v14, %v1416_v13  ;;  %v1418_v20 = vld [vmem:[%s14546_s5 + $0x50] sm:$0xff]  ;;  %v1419_v21 = vld [vmem:[%s14546_s5 + $0x58] sm:$0xff]  ;;  %p11374_p13 = pneg %p11373_p12 }
  0x2d   : > { %10520 = vmatpush3.bf16.msra.mxu1 %v10517_v25  ;;  %10514 = vmatprep.subr.bf16.mxu0 %v10513_v35  ;;  %v10581_v19 = vpack.c.bf16 %v1421_v17, %v1420_v16  ;;  %v10577_v22 = vpack.c.bf16 %v1419_v21, %v1418_v20  ;;  %v1422_v23 = vld [vmem:[%s14546_s5 + $0x70] sm:$0xff]  ;;  %v1423_v24 = vld [vmem:[%s14546_s5 + $0x78] sm:$0xff] }
  0x2e   : > { %9589 = vmatmul.mubr.msk.f32.gmra.mrb[2].mxu0 %vm613_vm0, %v11670_v36  ;;  %10522 = vmatprep.subr.bf16.mxu1 %v10521_v38  ;;  %v10585_v25 = vpack.c.bf16 %v1423_v24, %v1422_v23 }
  0x2f   : > { %9606 = vmatmul.mubr.msk.f32.gmra.mrb[2].mxu1 %vm613_vm0, %v11670_v36  ;;  %9591 = vmatprep.mubr.msk.f32.mxu0 %vm613_vm0, %v11683_v41 }
  0x30   : > { %9608 = vmatprep.mubr.msk.f32.mxu1 %vm613_vm0, %v11683_v41  ;;  %10516 = vmatpush3.bf16.msra.mxu0 %v10513_v35 }
  0x31   : > { %10524 = vmatpush3.bf16.msra.mxu1 %v10521_v38  ;;  %10526 = vmatprep.subr.bf16.mxu0 %v10525_v45 }
  0x32   : > { %9592 = vmatmul.mubr.msk.f32.gmra.mrb[4].mxu0 %vm613_vm0, %v11698_v46  ;;  %10534 = vmatprep.subr.bf16.mxu1 %v10533_v47 }
  0x33   : > { %9609 = vmatmul.mubr.msk.f32.gmra.mrb[4].mxu1 %vm613_vm0, %v11698_v46  ;;  %9619 = vmatprep.mubr.msk.f32.mxu0 %vm613_vm0, %v11644_v26 }
  0x34   : > { %9636 = vmatprep.mubr.msk.f32.mxu1 %vm613_vm0, %v11644_v26 }
  0x36   : > { %9620 = vmatmul.mubr.msk.f32.vlgmr.msra.gmra.mrb[6].mxu0 %vm613_vm0, %v11646_v27 }
  0x37   : > { %9637 = vmatmul.mubr.msk.f32.vlgmr.msra.gmra.mrb[6].mxu1 %vm613_vm0, %v11646_v27  ;;  %10528 = vmatpush3.bf16.msra.mxu0 %v10525_v45 }
  0x38   : > { %9622 = vmatprep.mubr.msk.f32.mxu0 %vm613_vm0, %v11655_v31  ;;  %9639 = vmatprep.mubr.msk.f32.mxu1 %vm613_vm0, %v11655_v31 }
  0x39   : > { %10536 = vmatpush3.bf16.msra.mxu1 %v10533_v47  ;;  %10530 = vmatprep.subr.bf16.mxu0 %v10529_v52 }
  0x3a   : > { %9623 = vmatmul.mubr.msk.f32.gmra.mrb[8].mxu0 %vm613_vm0, %v11670_v36  ;;  %10538 = vmatprep.subr.bf16.mxu1 %v10537_v53 }
  0x3b   : > { %9640 = vmatmul.mubr.msk.f32.gmra.mrb[8].mxu1 %vm613_vm0, %v11670_v36  ;;  %9625 = vmatprep.mubr.msk.f32.mxu0 %vm613_vm0, %v11683_v41 }
  0x3c   : > { %9642 = vmatprep.mubr.msk.f32.mxu1 %vm613_vm0, %v11683_v41  ;;  %10532 = vmatpush3.bf16.msra.mxu0 %v10529_v52 }
  0x3d   : > { %10540 = vmatpush3.bf16.msra.mxu1 %v10537_v53  ;;  %10542 = vmatprep.subr.bf16.mxu0 %v10541_v58 }
  0x3e   : > { %9626 = vmatmul.mubr.msk.f32.gmra.mrb[10].mxu0 %vm613_vm0, %v11698_v46  ;;  %10550 = vmatprep.subr.bf16.mxu1 %v10549_v59 }
  0x3f   : > { %9643 = vmatmul.mubr.msk.f32.gmra.mrb[10].mxu1 %vm613_vm0, %v11698_v46  ;;  %9653 = vmatprep.mubr.msk.f32.mxu0 %vm613_vm0, %v11644_v26 }
  0x40   : > { %9670 = vmatprep.mubr.msk.f32.mxu1 %vm613_vm0, %v11644_v26 }
  0x42   : > { %9654 = vmatmul.mubr.msk.f32.vlgmr.msra.gmra.mrb[12].mxu0 %vm613_vm0, %v11646_v27 }
  0x43   : > { %9671 = vmatmul.mubr.msk.f32.vlgmr.msra.gmra.mrb[12].mxu1 %vm613_vm0, %v11646_v27  ;;  %9656 = vmatprep.mubr.msk.f32.mxu0 %vm613_vm0, %v11655_v31 }
  0x44   : > { %9673 = vmatprep.mubr.msk.f32.mxu1 %vm613_vm0, %v11655_v31  ;;  %10544 = vmatpush3.bf16.msra.mxu0 %v10541_v58 }
  0x45   : > { %10552 = vmatpush3.bf16.msra.mxu1 %v10549_v59  ;;  %10546 = vmatprep.subr.bf16.mxu0 %v10545_v0 }
  0x46   : > { %9657 = vmatmul.mubr.msk.f32.gmra.mrb[14].mxu0 %vm613_vm0, %v11670_v36  ;;  %10554 = vmatprep.subr.bf16.mxu1 %v10553_v1 }
  0x47   : > { %9674 = vmatmul.mubr.msk.f32.gmra.mrb[14].mxu1 %vm613_vm0, %v11670_v36  ;;  %9659 = vmatprep.mubr.msk.f32.mxu0 %vm613_vm0, %v11683_v41 }
  0x48   : > { %9676 = vmatprep.mubr.msk.f32.mxu1 %vm613_vm0, %v11683_v41  ;;  %10548 = vmatpush3.bf16.msra.mxu0 %v10545_v0 }
  0x49   : > { %10556 = vmatpush3.bf16.msra.mxu1 %v10553_v1  ;;  %10558 = vmatprep.subr.bf16.mxu0 %v10557_v6 }
  0x4a   : > { %9660 = vmatmul.mubr.msk.f32.gmra.mrb[16].mxu0 %vm613_vm0, %v11698_v46  ;;  %10566 = vmatprep.subr.bf16.mxu1 %v10565_v7 }
  0x4b   : > { %9677 = vmatmul.mubr.msk.f32.gmra.mrb[16].mxu1 %vm613_vm0, %v11698_v46  ;;  %9687 = vmatprep.mubr.msk.f32.mxu0 %vm613_vm0, %v11644_v26 }
  0x4c   : > { %9704 = vmatprep.mubr.msk.f32.mxu1 %vm613_vm0, %v11644_v26 }
  0x4e   : > { %9688 = vmatmul.mubr.msk.f32.vlgmr.msra.gmra.mrb[18].mxu0 %vm613_vm0, %v11646_v27 }
  0x4f   : > { %9705 = vmatmul.mubr.msk.f32.vlgmr.msra.gmra.mrb[18].mxu1 %vm613_vm0, %v11646_v27  ;;  %9690 = vmatprep.mubr.msk.f32.mxu0 %vm613_vm0, %v11655_v31 }
  0x50   : > { %9707 = vmatprep.mubr.msk.f32.mxu1 %vm613_vm0, %v11655_v31  ;;  %10560 = vmatpush3.bf16.msra.mxu0 %v10557_v6 }
  0x51   : > { %10562 = vmatprep.subr.bf16.mxu0 %v10561_v12  ;;  %10568 = vmatpush3.bf16.msra.mxu1 %v10565_v7 }
  0x52   : > { %9691 = vmatmul.mubr.msk.f32.gmra.mrb[20].mxu0 %vm613_vm0, %v11670_v36  ;;  %10570 = vmatprep.subr.bf16.mxu1 %v10569_v15 }
  0x53   : > { %9708 = vmatmul.mubr.msk.f32.gmra.mrb[20].mxu1 %vm613_vm0, %v11670_v36  ;;  %9693 = vmatprep.mubr.msk.f32.mxu0 %vm613_vm0, %v11683_v41 }
  0x54   : > { %9710 = vmatprep.mubr.msk.f32.mxu1 %vm613_vm0, %v11683_v41  ;;  %10564 = vmatpush3.bf16.msra.mxu0 %v10561_v12 }
  0x55   : > { %10574 = vmatprep.subr.bf16.mxu0 %v10573_v18  ;;  %10572 = vmatpush3.bf16.msra.mxu1 %v10569_v15 }
  0x56   : > { %9694 = vmatmul.mubr.msk.f32.gmra.mrb[22].mxu0 %vm613_vm0, %v11698_v46  ;;  %10582 = vmatprep.subr.bf16.mxu1 %v10581_v19 }
  0x57   : > { %9711 = vmatmul.mubr.msk.f32.gmra.mrb[22].mxu1 %vm613_vm0, %v11698_v46  ;;  %9721 = vmatprep.mubr.msk.f32.mxu0 %vm613_vm0, %v11644_v26 }
  0x58   : > { %9738 = vmatprep.mubr.msk.f32.mxu1 %vm613_vm0, %v11644_v26 }
  0x5a   : > { %9722 = vmatmul.mubr.msk.f32.vlgmr.msra.gmra.mrb[24].mxu0 %vm613_vm0, %v11646_v27 }
  0x5b   : > { %9724 = vmatprep.mubr.msk.f32.mxu0 %vm613_vm0, %v11655_v31  ;;  %10576 = vmatpush3.bf16.msra.mxu0 %v10573_v18 }
  0x5c   : > { %10578 = vmatprep.subr.bf16.mxu0 %v10577_v22  ;;  %9739 = vmatmul.mubr.msk.f32.vlgmr.msra.gmra.mrb[24].mxu1 %vm613_vm0, %v11646_v27 }
  0x5d   : > { %9741 = vmatprep.mubr.msk.f32.mxu1 %vm613_vm0, %v11655_v31  ;;  %10584 = vmatpush3.bf16.msra.mxu1 %v10581_v19 }
  0x5e   : > { %9725 = vmatmul.mubr.msk.f32.gmra.mrb[26].mxu0 %vm613_vm0, %v11670_v36  ;;  %10586 = vmatprep.subr.bf16.mxu1 %v10585_v25 }
  0x5f   : > { %9727 = vmatprep.mubr.msk.f32.mxu0 %vm613_vm0, %v11683_v41  ;;  %10580 = vmatpush3.bf16.msra.mxu0 %v10577_v22 }
  0x60   : > { %9742 = vmatmul.mubr.msk.f32.gmra.mrb[26].mxu1 %vm613_vm0, %v11670_v36 }
  0x61   : > { %9744 = vmatprep.mubr.msk.f32.mxu1 %vm613_vm0, %v11683_v41  ;;  %10588 = vmatpush3.bf16.msra.mxu1 %v10585_v25 }
  0x62   : > { %9728 = vmatmul.mubr.msk.f32.gmra.mrb[28].mxu0 %vm613_vm0, %v11698_v46 }
  0x63   : > { %9755 = vmatprep.mubr.msk.f32.mxu0 %vm613_vm0, %v11644_v26 }
  0x64   : > { %9745 = vmatmul.mubr.msk.f32.gmra.mrb[28].mxu1 %vm613_vm0, %v11698_v46 }
  0x65   : > { %9772 = vmatprep.mubr.msk.f32.mxu1 %vm613_vm0, %v11644_v26 }
  0x66   : > { %9756 = vmatmul.mubr.msk.f32.vlgmr.msra.gmra.mrb[30].mxu0 %vm613_vm0, %v11646_v27 }
  0x67   : > { %9758 = vmatprep.mubr.msk.f32.mxu0 %vm613_vm0, %v11655_v31 }
  0x68   : > { %9773 = vmatmul.mubr.msk.f32.vlgmr.msra.gmra.mrb[30].mxu1 %vm613_vm0, %v11646_v27 }
  0x69   : > { %9775 = vmatprep.mubr.msk.f32.mxu1 %vm613_vm0, %v11655_v31 }
  0x6a   : > { %9759 = vmatmul.mubr.msk.f32.gmra.mrb[32].mxu0 %vm613_vm0, %v11670_v36 }
  0x6b   : > { %9761 = vmatprep.mubr.msk.f32.mxu0 %vm613_vm0, %v11683_v41 }
  0x6c   : > { %9776 = vmatmul.mubr.msk.f32.gmra.mrb[32].mxu1 %vm613_vm0, %v11670_v36 }
  0x6d   : > { %9778 = vmatprep.mubr.msk.f32.mxu1 %vm613_vm0, %v11683_v41 }
  0x6e   : > { %9762 = vmatmul.mubr.msk.f32.gmra.mrb[34].mxu0 %vm613_vm0, %v11698_v46 }
  0x70   : > { %9779 = vmatmul.mubr.msk.f32.gmra.mrb[34].mxu1 %vm613_vm0, %v11698_v46 }
  0xfd   : > { %v11914_v28 = vpop.f32.mrb[0].mxu0 }
  0xfe   : > { %v698_v29 = vpop.f32.mrb[1].mxu0  ;;  %v11916_v30 = vpop.f32.mrb[0].mxu1 }
  0xff   : > { %9793 = vmatprep.mubr.msk.f32.mxu0 %vm1804_vm1, %v698_v29  ;;  %v793_v32 = vpop.f32.mrb[1].mxu1 }
 0x100   : > { %9814 = vmatprep.mubr.msk.f32.mxu1 %vm1804_vm1, %v793_v32 }
 0x101   : > { %v11920_v33 = vpop.f32.mrb[2].mxu0 }
 0x102   : > { %v11922_v34 = vpop.f32.mrb[3].mxu0  ;;  %v11924_v35 = vpop.f32.mrb[2].mxu1 }
 0x103   : > { %v11926_v37 = vpop.f32.mrb[3].mxu1 }
 0x105   : > { %v11928_v38 = vpop.f32.mrb[4].mxu0 }
 0x106   : > { %v11930_v39 = vpop.f32.mrb[5].mxu0  ;;  %v11932_v40 = vpop.f32.mrb[4].mxu1 }
 0x107   : > { %v11934_v42 = vpop.f32.mrb[5].mxu1 }
 0x109   : > { %v11936_v43 = vpop.f32.mrb[6].mxu0 }
 0x10a   : > { %v11938_v44 = vpop.f32.mrb[7].mxu0  ;;  %v11940_v45 = vpop.f32.mrb[6].mxu1 }
 0x10b   : > { %v11942_v47 = vpop.f32.mrb[7].mxu1 }
 0x10d   : > { %v11944_v48 = vpop.f32.mrb[8].mxu0 }
 0x10e   : > { %v11946_v49 = vpop.f32.mrb[9].mxu0  ;;  %v11948_v50 = vpop.f32.mrb[8].mxu1 }
 0x10f   : > { %v11950_v51 = vpop.f32.mrb[9].mxu1 }
 0x111   : > { %v11952_v52 = vpop.f32.mrb[10].mxu0 }
 0x112   : > { %v11954_v53 = vpop.f32.mrb[11].mxu0  ;;  %v11956_v54 = vpop.f32.mrb[10].mxu1 }
 0x113   : > { %v11958_v55 = vpop.f32.mrb[11].mxu1 }
 0x115   : > { %v9655_v56 = vpop.f32.mrb[12].mxu0 }
 0x116   : > { %v9672_v57 = vpop.f32.mrb[12].mxu1  ;;  %v1094_v58 = vpop.f32.mrb[13].mxu0 }
 0x117   : > { %v10589_v60 = vpack.c.bf16 %v9655_v56, %v1094_v58  ;;  %v1189_v61 = vpop.f32.mrb[13].mxu1 }
 0x118   : > { %v10607_v62 = vpack.c.bf16 %v9672_v57, %v1189_v61 }
 0x119   : > { %10591 = vmatprep.subr.msk.bf16.mxu0 %vm11962_vm2, %v10589_v60  ;;  %v9658_v63 = vpop.f32.mrb[14].mxu0 }
 0x11a   : > { %10609 = vmatprep.subr.msk.bf16.mxu1 %vm11962_vm2, %v10607_v62  ;;  %10594 = vmatpush3.bf16.xpose.msk.msra.mxu0 %vm11962_vm2, %v10589_v60  ;;  %v9675_v0 = vpop.f32.mrb[14].mxu1  ;;  %v1104_v1 = vpop.f32.mrb[15].mxu0 }
 0x11b   : > { %10612 = vmatpush3.bf16.xpose.msk.msra.mxu1 %vm11962_vm2, %v10607_v62  ;;  %v10595_v2 = vpack.c.bf16 %v9658_v63, %v1104_v1  ;;  %v1199_v3 = vpop.f32.mrb[15].mxu1 }
 0x11c   : > { %v10613_v4 = vpack.c.bf16 %v9675_v0, %v1199_v3 }
 0x11d   : > { %10597 = vmatprep.subr.msk.bf16.mxu0 %vm11962_vm2, %v10595_v2  ;;  %v9661_v5 = vpop.f32.mrb[16].mxu0 }
 0x11e   : > { %10615 = vmatprep.subr.msk.bf16.mxu1 %vm11962_vm2, %v10613_v4  ;;  %v9678_v6 = vpop.f32.mrb[16].mxu1  ;;  %v1114_v7 = vpop.f32.mrb[17].mxu0 }
 0x11f   : > { %v10601_v8 = vpack.c.bf16 %v9661_v5, %v1114_v7  ;;  %v1209_v9 = vpop.f32.mrb[17].mxu1 }
 0x120   : > { %v10619_v10 = vpack.c.bf16 %v9678_v6, %v1209_v9 }
 0x121   : > { %v9689_v11 = vpop.f32.mrb[18].mxu0 }
 0x122   : > { %10600 = vmatpush3.bf16.xpose.msk.msra.mxu0 %vm11962_vm2, %v10595_v2  ;;  %v9706_v12 = vpop.f32.mrb[18].mxu1  ;;  %v1284_v13 = vpop.f32.mrb[19].mxu0 }
 0x123   : > { %10618 = vmatpush3.bf16.xpose.msk.msra.mxu1 %vm11962_vm2, %v10613_v4  ;;  %10603 = vmatprep.subr.msk.bf16.mxu0 %vm11962_vm2, %v10601_v8  ;;  %v10625_v14 = vpack.c.bf16 %v9689_v11, %v1284_v13  ;;  %v1379_v15 = vpop.f32.mrb[19].mxu1 }
 0x124   : > { %10621 = vmatprep.subr.msk.bf16.mxu1 %vm11962_vm2, %v10619_v10  ;;  %v10643_v16 = vpack.c.bf16 %v9706_v12, %v1379_v15 }
 0x125   : > { %v9692_v17 = vpop.f32.mrb[20].mxu0 }
 0x126   : > { %v9709_v18 = vpop.f32.mrb[20].mxu1  ;;  %v1294_v19 = vpop.f32.mrb[21].mxu0 }
 0x127   : > { %v10631_v20 = vpack.c.bf16 %v9692_v17, %v1294_v19  ;;  %v1389_v21 = vpop.f32.mrb[21].mxu1  ;;  %v591_v17 = vld [vmem:[%s14591_s24] sm:$0xff]  ;;  %v12096_v19 = vld [vmem:[%s14591_s24 + $0x10] sm:$0xff] }
 0x128   : > { %v10649_v22 = vpack.c.bf16 %v9709_v18, %v1389_v21 }
 0x129   : > { %v9695_v23 = vpop.f32.mrb[22].mxu0 }
 0x12a   : > { %10606 = vmatpush3.bf16.xpose.msk.msra.mxu0 %vm11962_vm2, %v10601_v8  ;;  %v9712_v24 = vpop.f32.mrb[22].mxu1  ;;  %v1304_v25 = vpop.f32.mrb[23].mxu0 }
 0x12b   : > { %10624 = vmatpush3.bf16.xpose.msk.msra.mxu1 %vm11962_vm2, %v10619_v10  ;;  %10627 = vmatprep.subr.msk.bf16.mxu0 %vm11962_vm2, %v10625_v14  ;;  %v10637_v29 = vpack.c.bf16 %v9695_v23, %v1304_v25  ;;  %v1399_v32 = vpop.f32.mrb[23].mxu1 }
 0x12c   : > { %10645 = vmatprep.subr.msk.bf16.mxu1 %vm11962_vm2, %v10643_v16  ;;  %v10655_v56 = vpack.c.bf16 %v9712_v24, %v1399_v32 }
 0x12d   : > { %v9723_v57 = vpop.f32.mrb[24].mxu0 }
 0x12e   : > { %v1490_v58 = vpop.f32.mrb[25].mxu0 }
 0x12f   : > { %v10661_v60 = vpack.c.bf16 %v9723_v57, %v1490_v58  ;;  %v9740_v61 = vpop.f32.mrb[24].mxu1 }
 0x130   : > { %v1585_v62 = vpop.f32.mrb[25].mxu1 }
 0x131   : > { %9794 = vmatmul.mubr.msk.f32.vlgmr.msra.gmra.mrb[36].mxu0 %vm1804_vm1, %v11914_v28  ;;  %v9726_v63 = vpop.f32.mrb[26].mxu0  ;;  %v10673_v0 = vpack.c.bf16 %v9740_v61, %v1585_v62 }
 0x132   : > { %9815 = vmatmul.mubr.msk.f32.vlgmr.msra.gmra.mrb[36].mxu1 %vm1804_vm1, %v11916_v30  ;;  %9796 = vmatprep.mubr.msk.f32.mxu0 %vm1804_vm1, %v11922_v34  ;;  %v1500_v1 = vpop.f32.mrb[27].mxu0 }
 0x133   : > { %9817 = vmatprep.mubr.msk.f32.mxu1 %vm1804_vm1, %v11926_v37  ;;  %10630 = vmatpush3.bf16.xpose.msk.msra.mxu0 %vm11962_vm2, %v10625_v14  ;;  %v10665_v2 = vpack.c.bf16 %v9726_v63, %v1500_v1  ;;  %v9743_v3 = vpop.f32.mrb[26].mxu1  ;;  %v12083_v14 = vld [vmem:[%s14591_s24 + $0x18] sm:$0xff] }
 0x134   : > { %10648 = vmatpush3.bf16.xpose.msk.msra.mxu1 %vm11962_vm2, %v10643_v16  ;;  %10633 = vmatprep.subr.msk.bf16.mxu0 %vm11962_vm2, %v10631_v20  ;;  %v1595_v28 = vpop.f32.mrb[27].mxu1 }
 0x135   : > { %9797 = vmatmul.mubr.msk.f32.gmra.mrb[38].mxu0 %vm1804_vm1, %v11920_v33  ;;  %10651 = vmatprep.subr.msk.bf16.mxu1 %vm11962_vm2, %v10649_v22  ;;  %v9729_v30 = vpop.f32.mrb[28].mxu0  ;;  %v10677_v34 = vpack.c.bf16 %v9743_v3, %v1595_v28 }
 0x136   : > { %9818 = vmatmul.mubr.msk.f32.gmra.mrb[38].mxu1 %vm1804_vm1, %v11924_v35  ;;  %9799 = vmatprep.mubr.msk.f32.mxu0 %vm1804_vm1, %v11930_v39  ;;  %v1510_v37 = vpop.f32.mrb[29].mxu0 }
 0x137   : > { %9820 = vmatprep.mubr.msk.f32.mxu1 %vm1804_vm1, %v11934_v42  ;;  %v10669_v4 = vpack.c.bf16 %v9729_v30, %v1510_v37  ;;  %v9746_v5 = vpop.f32.mrb[28].mxu1  ;;  %v595_v30 = vld [vmem:[%s14591_s24 + $0x20] sm:$0xff] }
 0x138   : > { %v1605_v6 = vpop.f32.mrb[29].mxu1 }
 0x139   : > { %9800 = vmatmul.mubr.msk.f32.gmra.mrb[40].mxu0 %vm1804_vm1, %v11928_v38  ;;  %v9757_v33 = vpop.f32.mrb[30].mxu0  ;;  %v10681_v7 = vpack.c.bf16 %v9746_v5, %v1605_v6 }
 0x13a   : > { %9821 = vmatmul.mubr.msk.f32.gmra.mrb[40].mxu1 %vm1804_vm1, %v11932_v40  ;;  %9835 = vmatprep.mubr.msk.f32.mxu0 %vm1804_vm1, %v11938_v44  ;;  %v1680_v35 = vpop.f32.mrb[31].mxu0 }
 0x13b   : > { %10636 = vmatpush3.bf16.xpose.msk.msra.mxu0 %vm11962_vm2, %v10631_v20  ;;  %9856 = vmatprep.mubr.msk.f32.mxu1 %vm1804_vm1, %v11942_v47  ;;  %v12028_v39 = vpack.c.bf16 %v9757_v33, %v1680_v35 }
 0x13c   : > { %10654 = vmatpush3.bf16.xpose.msk.msra.mxu1 %vm11962_vm2, %v10649_v22  ;;  %10639 = vmatprep.subr.msk.bf16.mxu0 %vm11962_vm2, %v10637_v29 }
 0x13d   : > { %10657 = vmatprep.subr.msk.bf16.mxu1 %vm11962_vm2, %v10655_v56  ;;  %v9760_v38 = vpop.f32.mrb[32].mxu0 }
 0x13e   : > { %v1690_v40 = vpop.f32.mrb[33].mxu0 }
 0x13f   : > { %v12036_v42 = vpack.c.bf16 %v9760_v38, %v1690_v40 }
 0x141   : > { %v9763_v44 = vpop.f32.mrb[34].mxu0 }
 0x142   : > { %v1700_v8 = vpop.f32.mrb[35].mxu0 }
 0x143   : > { %10642 = vmatpush3.bf16.xpose.msk.msra.mxu0 %vm11962_vm2, %v10637_v29  ;;  %v12040_v47 = vpack.c.bf16 %v9763_v44, %v1700_v8 }
 0x144   : > { %10660 = vmatpush3.bf16.xpose.msk.msra.mxu1 %vm11962_vm2, %v10655_v56  ;;  %10662 = vmatprep.subr.bf16.mxu0 %v10661_v60  ;;  %v12113_v56 = vld [vmem:[%s14591_s24 + $0x28] sm:$0xff] }
 0x145   : > { %10674 = vmatprep.subr.bf16.mxu1 %v10673_v0 }
 0x14a   : > { %9836 = vmatmul.mubr.msk.f32.vlgmr.msra.gmra.mrb[42].mxu0 %vm1804_vm1, %v11936_v43  ;;  %v9774_v43 = vpop.f32.mrb[30].mxu1 }
 0x14b   : > { %9857 = vmatmul.mubr.msk.f32.vlgmr.msra.gmra.mrb[42].mxu1 %vm1804_vm1, %v11940_v45  ;;  %9838 = vmatprep.mubr.msk.f32.mxu0 %vm1804_vm1, %v11946_v49  ;;  %v1775_v45 = vpop.f32.mrb[31].mxu1 }
 0x14c   : > { %9859 = vmatprep.mubr.msk.f32.mxu1 %vm1804_vm1, %v11950_v51  ;;  %10664 = vmatpush3.bf16.msra.mxu0 %v10661_v60  ;;  %v9777_v49 = vpop.f32.mrb[32].mxu1 }
 0x14d   : > { %10666 = vmatprep.subr.bf16.mxu0 %v10665_v2  ;;  %10676 = vmatpush3.bf16.msra.mxu1 %v10673_v0 }
 0x14e   : > { %9839 = vmatmul.mubr.msk.f32.gmra.mrb[44].mxu0 %vm1804_vm1, %v11944_v48  ;;  %10678 = vmatprep.subr.bf16.mxu1 %v10677_v34  ;;  %v12065_v48 = vpack.c.bf16 %v9774_v43, %v1775_v45 }
 0x14f   : > { %9860 = vmatmul.mubr.msk.f32.gmra.mrb[44].mxu1 %vm1804_vm1, %v11948_v50  ;;  %9841 = vmatprep.mubr.msk.f32.mxu0 %vm1804_vm1, %v11954_v53  ;;  %v1785_v50 = vpop.f32.mrb[33].mxu1 }
 0x150   : > { %9862 = vmatprep.mubr.msk.f32.mxu1 %vm1804_vm1, %v11958_v55  ;;  %10668 = vmatpush3.bf16.msra.mxu0 %v10665_v2  ;;  %v12068_v51 = vpack.c.bf16 %v9777_v49, %v1785_v50  ;;  %v9780_v53 = vpop.f32.mrb[34].mxu1 }
 0x151   : > { %10670 = vmatprep.subr.bf16.mxu0 %v10669_v4  ;;  %10680 = vmatpush3.bf16.msra.mxu1 %v10677_v34 }
 0x152   : > { %9842 = vmatmul.mubr.msk.f32.gmra.mrb[46].mxu0 %vm1804_vm1, %v11952_v52  ;;  %10682 = vmatprep.subr.bf16.mxu1 %v10681_v7  ;;  %v1795_v52 = vpop.f32.mrb[35].mxu1 }
 0x153   : > { %9863 = vmatmul.mubr.msk.f32.gmra.mrb[46].mxu1 %vm1804_vm1, %v11956_v54  ;;  %v12070_v55 = vpack.c.bf16 %v9780_v53, %v1795_v52  ;;  %v12075_v54 = vld [vmem:[%s14590_s29 + $0x8] sm:$0xff]  ;;  %s9038_s29 = sshll.u32 %s11556_s0, 4  ;;  %s11439_s0 = smov [#allocation2]  }
 0x154   : > { %10672 = vmatpush3.bf16.msra.mxu0 %v10669_v4 }
 0x155   : > { %10686 = vmatprep.subr.bf16.mxu0 %v12028_v39  ;;  %10684 = vmatpush3.bf16.msra.mxu1 %v10681_v7 }
 0x156   : > { %11021 = vmatprep.subr.bf16.mxu1 %v12065_v48 }
 0x204   : > { %v9795_v9 = vpop.f32.mrb[36].mxu0 }
 0x205   : > { %v12078_v10 = vadd.f32 %v9795_v9, %v12075_v54  ;;  %v9816_v11 = vpop.f32.mrb[36].mxu1  ;;  %v1907_v12 = vpop.f32.mrb[37].mxu0 }
 0x206   : > { %v2038_v13 = vpop.f32.mrb[37].mxu1  ;;  %v12086_v15 = vadd.f32 %v9816_v11, %v12075_v54  ;;  %v12101_v24 = vadd.f32 %v1907_v12, %v591_v17 }
 0x207   : > { %v2333_v16 = vsel %vm2329_vm3, %v12078_v10, -inf  ;;  %v12115_v62 = vadd.f32 %v2038_v13, %v591_v17 }
 0x208   : > { %2334 = vmax.xlane.f32.xlu0 %v2333_v16  ;;  %v9798_v18 = vpop.f32.mrb[38].mxu0  ;;  %v2351_v29 = vsel %vm2329_vm3, %v12086_v15, -inf  ;;  %v2330_v1 = vsel %vm2329_vm3, %v12101_v24, -inf }
 0x209   : > { %v9819_v20 = vpop.f32.mrb[38].mxu1  ;;  %v12099_v21 = vadd.f32 %v9798_v18, %v12083_v14  ;;  %v1917_v22 = vpop.f32.mrb[39].mxu0  ;;  %v2348_v28 = vsel %vm2329_vm3, %v12115_v62, -inf }
 0x20a   : > { %v2048_v23 = vpop.f32.mrb[39].mxu1  ;;  %v12104_v25 = vadd.f32 %v1917_v22, %v12096_v19  ;;  %v12139_v4 = vadd.f32 %v9819_v20, %v12083_v14 }
 0x20b   : > { %v2339_v32 = vsel %vm2329_vm3, %v12099_v21, -inf  ;;  %v12125_v2 = vadd.f32 %v2048_v23, %v12096_v19 }
 0x20c   : > { %2352 = vmax.xlane.f32.xlu0 %v2351_v29  ;;  %2340 = vmax.xlane.f32.xlu1 %v2339_v32  ;;  %v9801_v57 = vpop.f32.mrb[40].mxu0  ;;  %v2336_v0 = vsel %vm2329_vm3, %v12104_v25, -inf  ;;  %v2357_v44 = vsel %vm2329_vm3, %v12139_v4, -inf }
 0x20d   : > { %v9822_v58 = vpop.f32.mrb[40].mxu1  ;;  %v1927_v60 = vpop.f32.mrb[41].mxu0  ;;  %v12118_v63 = vadd.f32 %v9801_v57, %v12113_v56  ;;  %v2354_v37 = vsel %vm2329_vm3, %v12125_v2, -inf }
 0x20e   : > { %v2058_v61 = vpop.f32.mrb[41].mxu1  ;;  %v12134_v34 = vadd.f32 %v1927_v60, %v595_v30  ;;  %v12147_v38 = vadd.f32 %v9822_v58, %v12113_v56 }
 0x20f   : > { %v2345_v3 = vsel %vm2329_vm3, %v12118_v63, -inf  ;;  %v12155_v53 = vadd.f32 %v2058_v61, %v595_v30 }
 0x210   : > { %2337 = vmax.xlane.f32.xlu1 %v2336_v0  ;;  %2331 = vmax.xlane.f32.xlu0 %v2330_v1  ;;  %v2342_v5 = vsel %vm2329_vm3, %v12134_v34, -inf  ;;  %v2363_v9 = vsel %vm2329_vm3, %v12147_v38, -inf }
 0x211   : > { %v2360_v23 = vsel %vm2329_vm3, %v12155_v53, -inf }
 0x214   : > { %2346 = vmax.xlane.f32.xlu1 %v2345_v3  ;;  %2349 = vmax.xlane.f32.xlu0 %v2348_v28 }
 0x218   : > { %2355 = vmax.xlane.f32.xlu0 %v2354_v37 }
 0x21c   : > { %2343 = vmax.xlane.f32.xlu0 %v2342_v5 }
 0x21d   : > { %v9837_v6 = vpop.f32.mrb[42].mxu0 }
 0x21e   : > { %v12144_v33 = vadd.f32 %v9837_v6, %v12075_v54  ;;  %v9858_v7 = vpop.f32.mrb[42].mxu1  ;;  %v2169_v35 = vpop.f32.mrb[43].mxu0 }
 0x21f   : > { %v2300_v40 = vpop.f32.mrb[43].mxu1  ;;  %v12151_v8 = vadd.f32 %v2169_v35, %v591_v17  ;;  %v12194_v28 = vadd.f32 %v9858_v7, %v12075_v54 }
 0x220   : > { %v2369_v43 = vsel %vm2329_vm3, %v12144_v33, -inf  ;;  %2358 = vmax.xlane.f32.xlu0 %v2357_v44  ;;  %v12164_v20 = vadd.f32 %v2300_v40, %v591_v17 }
 0x221   : > { %v9840_v45 = vpop.f32.mrb[44].mxu0  ;;  %2370 = vmax.xlane.f32.xlu1 %v2369_v43  ;;  %v2366_v12 = vsel %vm2329_vm3, %v12151_v8, -inf  ;;  %v2387_v5 = vsel %vm2329_vm3, %v12194_v28, -inf }
 0x222   : > { %v9861_v49 = vpop.f32.mrb[44].mxu1  ;;  %v2179_v50 = vpop.f32.mrb[45].mxu0  ;;  %v12160_v11 = vadd.f32 %v9840_v45, %v12083_v14  ;;  %v2384_v58 = vsel %vm2329_vm3, %v12164_v20, -inf }
 0x223   : > { %v2310_v52 = vpop.f32.mrb[45].mxu1  ;;  %v12169_v29 = vadd.f32 %v2179_v50, %v12096_v19  ;;  %v12199_v37 = vadd.f32 %v9861_v49, %v12083_v14 }
 0x224   : > { %2364 = vmax.xlane.f32.xlu0 %v2363_v9  ;;  %v2375_v32 = vsel %vm2329_vm3, %v12160_v11, -inf  ;;  %v12174_v57 = vadd.f32 %v2310_v52, %v12096_v19 }
 0x225   : > { %v9843_v13 = vpop.f32.mrb[46].mxu0  ;;  %2367 = vmax.xlane.f32.xlu1 %v2366_v12  ;;  %v2372_v60 = vsel %vm2329_vm3, %v12169_v29, -inf  ;;  %v2393_v35 = vsel %vm2329_vm3, %v12199_v37, -inf }
 0x226   : > { %v9864_v16 = vpop.f32.mrb[46].mxu1  ;;  %v2189_v18 = vpop.f32.mrb[47].mxu0  ;;  %v2390_v0 = vsel %vm2329_vm3, %v12174_v57, -inf  ;;  %v12187_v1 = vadd.f32 %v9843_v13, %v12113_v56 }
 0x227   : > { %v2320_v22 = vpop.f32.mrb[47].mxu1  ;;  %v12178_v17 = vadd.f32 %v2189_v18, %v595_v30  ;;  %v12204_v6 = vadd.f32 %v9864_v16, %v12113_v56 }
 0x228   : > { %2361 = vmax.xlane.f32.xlu0 %v2360_v23  ;;  %v12182_v61 = vadd.f32 %v2320_v22, %v595_v30  ;;  %v2381_v30 = vsel %vm2329_vm3, %v12187_v1, -inf }
 0x229   : > { %2376 = vmax.xlane.f32.xlu1 %v2375_v32  ;;  %v2378_v19 = vsel %vm2329_vm3, %v12178_v17, -inf  ;;  %v2399_v54 = vsel %vm2329_vm3, %v12204_v6, -inf }
 0x22a   : > { %v2396_v3 = vsel %vm2329_vm3, %v12182_v61, -inf }
 0x22c   : > { %2385 = vmax.xlane.f32.xlu0 %v2384_v58 }
 0x22d   : > { %2373 = vmax.xlane.f32.xlu1 %v2372_v60 }
 0x230   : > { %2391 = vmax.xlane.f32.xlu0 %v2390_v0 }
 0x231   : > { %2379 = vmax.xlane.f32.xlu1 %v2378_v19 }
 0x234   : > { %2397 = vmax.xlane.f32.xlu0 %v2396_v3 }
 0x235   : > { %2382 = vmax.xlane.f32.xlu1 %v2381_v30 }
 0x239   : > { %2388 = vmax.xlane.f32.xlu1 %v2387_v5 }
 0x23d   : > { %2394 = vmax.xlane.f32.xlu1 %v2393_v35 }
 0x241   : > { %2400 = vmax.xlane.f32.xlu1 %v2399_v54 }
 0x295   : > { %v2335_v7 = vpop.xlane.xlu0 %2334 }
 0x296   : > { %v2403_v40 = vsub.f32 %v12078_v10, %v2335_v7 }
 0x298   : > { %v2428_v14 = vmul.f32 1.442695, %v2403_v40 }
 0x299   : > { %v2353_v44 = vpop.xlane.xlu0 %2352  ;;  %v2341_v43 = vpop.xlane.xlu1 %2340 }
 0x29a   : > { %11071 = vpow2.f32 %v2428_v14  ;;  %v2409_v45 = vsub.f32 %v12086_v15, %v2353_v44  ;;  %v2405_v56 = vsub.f32 %v12099_v21, %v2341_v43 }
 0x29c   : > { %v2440_v49 = vmul.f32 1.442695, %v2409_v45  ;;  %v2432_v50 = vmul.f32 1.442695, %v2405_v56 }
 0x29d   : > { %v2338_v52 = vpop.xlane.xlu1 %2337  ;;  %v2332_v9 = vpop.xlane.xlu0 %2331 }
 0x29e   : > { %11073 = vpow2.f32 %v2440_v49  ;;  %v2402_v12 = vsub.f32 %v12101_v24, %v2332_v9  ;;  %v2404_v16 = vsub.f32 %v12104_v25, %v2338_v52 }
 0x29f   : > { %11075 = vpow2.f32 %v2432_v50 }
 0x2a0   : > { %v2426_v13 = vmul.f32 1.442695, %v2402_v12  ;;  %v2430_v58 = vmul.f32 1.442695, %v2404_v16 }
 0x2a1   : > { %v2347_v10 = vpop.xlane.xlu1 %2346  ;;  %v2350_v18 = vpop.xlane.xlu0 %2349 }
 0x2a2   : > { %v2407_v22 = vsub.f32 %v12118_v63, %v2347_v10  ;;  %v2408_v23 = vsub.f32 %v12115_v62, %v2350_v18  ;;  %11077 = vpow2.f32 %v2426_v13 }
 0x2a4   : > { %v12217_v15 = vpop.eup %11071  ;;  %v2436_v21 = vmul.f32 1.442695, %v2407_v22  ;;  %v2438_v32 = vmul.f32 1.442695, %v2408_v23 }
 0x2a5   : > { %v2356_v60 = vpop.xlane.xlu0 %2355  ;;  %v2477_v24 = vsel %vm2329_vm3, %v12217_v15, 0.0 }
 0x2a6   : > { %11079 = vpow2.f32 %v2436_v21  ;;  %v2410_v0 = vsub.f32 %v12125_v2, %v2356_v60  ;;  %2478 = vadd.xlane.f32.xlu1 %v2477_v24 }
 0x2a7   : > { %11081 = vpow2.f32 %v2438_v32 }
 0x2a8   : > { %v12222_v25 = vpop.eup %11073  ;;  %11083 = vpow2.f32 %v2430_v58  ;;  %v2442_v62 = vmul.f32 1.442695, %v2410_v0 }
 0x2a9   : > { %v12224_v63 = vpop.eup %11075  ;;  %v2344_v19 = vpop.xlane.xlu0 %2343  ;;  %v2495_v3 = vsel %vm2329_vm3, %v12222_v25, 0.0 }
 0x2aa   : > { %v2406_v30 = vsub.f32 %v12134_v34, %v2344_v19  ;;  %v2483_v5 = vsel %vm2329_vm3, %v12224_v63, 0.0  ;;  %2496 = vadd.xlane.f32.xlu0 %v2495_v3  ;;  %11085 = vpow2.f32 %v2442_v62 }
 0x2ab   : > { %2484 = vadd.xlane.f32.xlu1 %v2483_v5 }
 0x2ac   : > { %v12231_v2 = vpop.eup %11077  ;;  %v2434_v35 = vmul.f32 1.442695, %v2406_v30 }
 0x2ad   : > { %v2359_v54 = vpop.xlane.xlu0 %2358  ;;  %v2474_v14 = vsel %vm2329_vm3, %v12231_v2, 0.0 }
 0x2ae   : > { %v2371_v7 = vpop.xlane.xlu1 %2370  ;;  %v2411_v40 = vsub.f32 %v12139_v4, %v2359_v54  ;;  %2475 = vadd.xlane.f32.xlu0 %v2474_v14  ;;  %11087 = vpow2.f32 %v2434_v35 }
 0x2af   : > { %v2415_v44 = vsub.f32 %v12144_v33, %v2371_v7 }
 0x2b0   : > { %v12237_v34 = vpop.eup %11079  ;;  %v2444_v56 = vmul.f32 1.442695, %v2411_v40 }
 0x2b1   : > { %v12239_v43 = vpop.eup %11081  ;;  %v2452_v45 = vmul.f32 1.442695, %v2415_v44  ;;  %v2365_v49 = vpop.xlane.xlu0 %2364  ;;  %v2489_v50 = vsel %vm2329_vm3, %v12237_v34, 0.0 }
 0x2b2   : > { %v2368_v52 = vpop.xlane.xlu1 %2367  ;;  %v2413_v4 = vsub.f32 %v12147_v38, %v2365_v49  ;;  %2490 = vadd.xlane.f32.xlu1 %v2489_v50  ;;  %v2492_v9 = vsel %vm2329_vm3, %v12239_v43, 0.0  ;;  %v12246_v33 = vpop.eup %11083 }
 0x2b3   : > { %11089 = vpow2.f32 %v2452_v45  ;;  %v2414_v12 = vsub.f32 %v12151_v8, %v2368_v52  ;;  %2493 = vadd.xlane.f32.xlu0 %v2492_v9  ;;  %v2480_v38 = vsel %vm2329_vm3, %v12246_v33, 0.0 }
 0x2b4   : > { %11091 = vpow2.f32 %v2444_v56  ;;  %v2448_v16 = vmul.f32 1.442695, %v2413_v4  ;;  %v12252_v23 = vpop.eup %11085 }
 0x2b5   : > { %v2450_v13 = vmul.f32 1.442695, %v2414_v12  ;;  %v2362_v10 = vpop.xlane.xlu0 %2361  ;;  %v2498_v0 = vsel %vm2329_vm3, %v12252_v23, 0.0 }
 0x2b6   : > { %v2377_v18 = vpop.xlane.xlu1 %2376  ;;  %v2412_v22 = vsub.f32 %v12155_v53, %v2362_v10 }
 0x2b7   : > { %11093 = vpow2.f32 %v2450_v13  ;;  %v2417_v21 = vsub.f32 %v12160_v11, %v2377_v18  ;;  %2481 = vadd.xlane.f32.xlu0 %v2480_v38 }
 0x2b8   : > { %11095 = vpow2.f32 %v2448_v16  ;;  %v2446_v8 = vmul.f32 1.442695, %v2412_v22  ;;  %v12258_v53 = vpop.eup %11087 }
 0x2b9   : > { %v2456_v32 = vmul.f32 1.442695, %v2417_v21  ;;  %v2386_v58 = vpop.xlane.xlu0 %2385  ;;  %v2486_v54 = vsel %vm2329_vm3, %v12258_v53, 0.0 }
 0x2ba   : > { %v2374_v60 = vpop.xlane.xlu1 %2373  ;;  %v2420_v24 = vsub.f32 %v12164_v20, %v2386_v58 }
 0x2bb   : > { %11097 = vpow2.f32 %v2456_v32  ;;  %v2416_v62 = vsub.f32 %v12169_v29, %v2374_v60  ;;  %2499 = vadd.xlane.f32.xlu0 %v2498_v0 }
 0x2bc   : > { %11099 = vpow2.f32 %v2446_v8  ;;  %v2462_v3 = vmul.f32 1.442695, %v2420_v24 }
 0x2bd   : > { %v12261_v19 = vpop.eup %11089  ;;  %v2454_v11 = vmul.f32 1.442695, %v2416_v62  ;;  %v2392_v30 = vpop.xlane.xlu0 %2391 }
 0x2be   : > { %v2380_v5 = vpop.xlane.xlu1 %2379  ;;  %v2422_v35 = vsub.f32 %v12174_v57, %v2392_v30  ;;  %v2513_v20 = vsel %vm2329_vm3, %v12261_v19, 0.0  ;;  %v12268_v7 = vpop.eup %11091 }
 0x2bf   : > { %11101 = vpow2.f32 %v2454_v11  ;;  %v2418_v29 = vsub.f32 %v12178_v17, %v2380_v5  ;;  %2514 = vadd.xlane.f32.xlu1 %v2513_v20  ;;  %2487 = vadd.xlane.f32.xlu0 %v2486_v54  ;;  %v2501_v50 = vsel %vm2329_vm3, %v12268_v7, 0.0 }
 0x2c0   : > { %11103 = vpow2.f32 %v2462_v3  ;;  %v2466_v44 = vmul.f32 1.442695, %v2422_v35 }
 0x2c1   : > { %v12271_v40 = vpop.eup %11093  ;;  %v2458_v14 = vmul.f32 1.442695, %v2418_v29  ;;  %v2398_v45 = vpop.xlane.xlu0 %2397 }
 0x2c2   : > { %v2383_v57 = vpop.xlane.xlu1 %2382  ;;  %v2424_v56 = vsub.f32 %v12182_v61, %v2398_v45  ;;  %v2510_v49 = vsel %vm2329_vm3, %v12271_v40, 0.0  ;;  %v12278_v52 = vpop.eup %11095 }
 0x2c3   : > { %11105 = vpow2.f32 %v2458_v14  ;;  %v2419_v17 = vsub.f32 %v12187_v1, %v2383_v57  ;;  %2511 = vadd.xlane.f32.xlu1 %v2510_v49  ;;  %2502 = vadd.xlane.f32.xlu0 %v2501_v50  ;;  %v2507_v16 = vsel %vm2329_vm3, %v12278_v52, 0.0 }
 0x2c4   : > { %11107 = vpow2.f32 %v2466_v44  ;;  %v2470_v12 = vmul.f32 1.442695, %v2424_v56 }
 0x2c5   : > { %v12281_v4 = vpop.eup %11097  ;;  %v2460_v9 = vmul.f32 1.442695, %v2419_v17 }
 0x2c6   : > { %v2389_v13 = vpop.xlane.xlu1 %2388  ;;  %v2519_v61 = vsel %vm2329_vm3, %v12281_v4, 0.0  ;;  %v12287_v10 = vpop.eup %11099 }
 0x2c7   : > { %11109 = vpow2.f32 %v2460_v9  ;;  %v2421_v18 = vsub.f32 %v12194_v28, %v2389_v13  ;;  %2520 = vadd.xlane.f32.xlu1 %v2519_v61  ;;  %2508 = vadd.xlane.f32.xlu0 %v2507_v16  ;;  %v2504_v32 = vsel %vm2329_vm3, %v12287_v10, 0.0 }
 0x2c8   : > { %11111 = vpow2.f32 %v2470_v12 }
 0x2c9   : > { %v12290_v1 = vpop.eup %11101  ;;  %v2464_v22 = vmul.f32 1.442695, %v2421_v18 }
 0x2ca   : > { %v2395_v38 = vpop.xlane.xlu1 %2394  ;;  %v2516_v21 = vsel %vm2329_vm3, %v12290_v1, 0.0  ;;  %v12296_v8 = vpop.eup %11103 }
 0x2cb   : > { %11113 = vpow2.f32 %v2464_v22  ;;  %v2423_v58 = vsub.f32 %v12199_v37, %v2395_v38  ;;  %2517 = vadd.xlane.f32.xlu1 %v2516_v21  ;;  %2505 = vadd.xlane.f32.xlu0 %v2504_v32  ;;  %v2528_v62 = vsel %vm2329_vm3, %v12296_v8, 0.0 }
 0x2cd   : > { %v12299_v28 = vpop.eup %11105  ;;  %v2468_v60 = vmul.f32 1.442695, %v2423_v58 }
 0x2ce   : > { %v2401_v24 = vpop.xlane.xlu1 %2400  ;;  %v2522_v0 = vsel %vm2329_vm3, %v12299_v28, 0.0  ;;  %v12305_v11 = vpop.eup %11107 }
 0x2cf   : > { %11115 = vpow2.f32 %v2468_v60  ;;  %v2425_v3 = vsub.f32 %v12204_v6, %v2401_v24  ;;  %2523 = vadd.xlane.f32.xlu1 %v2522_v0  ;;  %2529 = vadd.xlane.f32.xlu0 %v2528_v62  ;;  %v2534_v35 = vsel %vm2329_vm3, %v12305_v11, 0.0 }
 0x2d1   : > { %v12308_v37 = vpop.eup %11109  ;;  %v2472_v30 = vmul.f32 1.442695, %v2425_v3 }
 0x2d2   : > { %v2525_v5 = vsel %vm2329_vm3, %v12308_v37, 0.0  ;;  %v12314_v20 = vpop.eup %11111 }
 0x2d3   : > { %11117 = vpow2.f32 %v2472_v30  ;;  %2526 = vadd.xlane.f32.xlu1 %v2525_v5  ;;  %2535 = vadd.xlane.f32.xlu0 %v2534_v35  ;;  %v2540_v29 = vsel %vm2329_vm3, %v12314_v20, 0.0 }
 0x2d5   : > { %v12316_v54 = vpop.eup %11113 }
 0x2d6   : > { %v2531_v6 = vsel %vm2329_vm3, %v12316_v54, 0.0 }
 0x2d7   : > { %2532 = vadd.xlane.f32.xlu1 %v2531_v6  ;;  %2541 = vadd.xlane.f32.xlu0 %v2540_v29 }
 0x2d9   : > { %v12322_v14 = vpop.eup %11115 }
 0x2da   : > { %v2537_v44 = vsel %vm2329_vm3, %v12322_v14, 0.0 }
 0x2db   : > { %2538 = vadd.xlane.f32.xlu1 %v2537_v44 }
 0x2dd   : > { %v12326_v45 = vpop.eup %11117 }
 0x2de   : > { %v2543_v57 = vsel %vm2329_vm3, %v12326_v45, 0.0 }
 0x2df   : > { %2544 = vadd.xlane.f32.xlu1 %v2543_v57 }
 0x333   : > { %v2479_v49 = vpop.xlane.xlu1 %2478 }
 0x334   : > { %11119 = vrcp.f32 %v2479_v49 }
 0x337   : > { %v2497_v56 = vpop.xlane.xlu0 %2496 }
 0x338   : > { %v2485_v9 = vpop.xlane.xlu1 %2484 }
 0x33b   : > { %v2476_v50 = vpop.xlane.xlu0 %2475 }
 0x33c   : > { %11121 = vrcp.f32 %v2476_v50 }
 0x33d   : > { %11123 = vrcp.f32 %v2497_v56 }
 0x33e   : > { %v11120_v13 = vpop.eup %11119 }
 0x33f   : > { %v2491_v16 = vpop.xlane.xlu1 %2490  ;;  %v2571_v38 = vmul.f32 %v11120_v13, %v12217_v15 }
 0x340   : > { %v2494_v17 = vpop.xlane.xlu0 %2493 }
 0x341   : > { %11125 = vrcp.f32 %v2494_v17 }
 0x342   : > { %11127 = vrcp.f32 %v2485_v9 }
 0x344   : > { %v2482_v12 = vpop.xlane.xlu0 %2481 }
 0x345   : > { %11129 = vrcp.f32 %v2482_v12 }
 0x346   : > { %v11122_v61 = vpop.eup %11121 }
 0x347   : > { %v2570_v22 = vmul.f32 %v11122_v61, %v12231_v2  ;;  %v11124_v21 = vpop.eup %11123 }
 0x348   : > { %v2500_v18 = vpop.xlane.xlu0 %2499  ;;  %v2577_v0 = vmul.f32 %v11124_v21, %v12222_v25 }
 0x349   : > { %11131 = vrcp.f32 %v2500_v18  ;;  %9877 = vmatprep.mubr.msk.f32.mxu0 %vm2329_vm3, %v2570_v22 }
 0x34a   : > { %9878 = vmatmul.mubr.msk.f32.vlgmr.msra.gmra.mrb[48].mxu0 %vm2329_vm3, %v2571_v38  ;;  %11133 = vrcp.f32 %v2491_v16 }
 0x34b   : > { %v11126_v32 = vpop.eup %11125  ;;  %10688 = vmatpush3.bf16.msra.mxu0 %v12028_v39 }
 0x34c   : > { %v2515_v58 = vpop.xlane.xlu1 %2514  ;;  %v2488_v60 = vpop.xlane.xlu0 %2487  ;;  %v2576_v24 = vmul.f32 %v11126_v32, %v12239_v43  ;;  %10690 = vmatprep.subr.bf16.mxu0 %v12036_v42 }
 0x34d   : > { %v11128_v2 = vpop.eup %11127  ;;  %11135 = vrcp.f32 %v2488_v60 }
 0x34e   : > { %9898 = vmatprep.mubr.msk.f32.mxu1 %vm2329_vm3, %v2576_v24  ;;  %11137 = vrcp.f32 %v2515_v58  ;;  %v2573_v25 = vmul.f32 %v11128_v2, %v12224_v63 }
 0x34f   : > { %v11130_v15 = vpop.eup %11129  ;;  %9899 = vmatmul.mubr.msk.f32.vlgmr.msra.gmra.mrb[48].mxu1 %vm2329_vm3, %v2577_v0  ;;  %10692 = vmatpush3.bf16.msra.mxu0 %v12036_v42 }
 0x350   : > { %11024 = vmatpush3.bf16.msra.mxu1 %v12065_v48  ;;  %v2512_v39 = vpop.xlane.xlu1 %2511  ;;  %v2503_v62 = vpop.xlane.xlu0 %2502  ;;  %v2572_v43 = vmul.f32 %v11130_v15, %v12246_v33  ;;  %10694 = vmatprep.subr.bf16.mxu0 %v12040_v47 }
 0x351   : > { %11139 = vrcp.f32 %v2512_v39  ;;  %11022 = vmatprep.subr.bf16.mxu1 %v12068_v51 }
 0x352   : > { %11141 = vrcp.f32 %v2503_v62  ;;  %9880 = vmatprep.mubr.msk.f32.mxu0 %vm2329_vm3, %v2572_v43 }
 0x353   : > { %v11132_v3 = vpop.eup %11131  ;;  %9881 = vmatmul.mubr.msk.f32.gmra.mrb[50].mxu0 %vm2329_vm3, %v2573_v25 }
 0x354   : > { %10696 = vmatpush3.bf16.msra.mxu0 %v12040_v47  ;;  %11025 = vmatpush3.bf16.msra.mxu1 %v12068_v51  ;;  %v2521_v42 = vpop.xlane.xlu1 %2520  ;;  %v2509_v30 = vpop.xlane.xlu0 %2508  ;;  %v2578_v33 = vmul.f32 %v11132_v3, %v12252_v23 }
 0x355   : > { %10698 = vmatprep.subr.bf16.mxu0 %v12065_v48  ;;  %11023 = vmatprep.subr.bf16.mxu1 %v12070_v55  ;;  %v11134_v63 = vpop.eup %11133  ;;  %11143 = vrcp.f32 %v2521_v42 }
 0x356   : > { %9901 = vmatprep.mubr.msk.f32.mxu1 %vm2329_vm3, %v2578_v33  ;;  %11145 = vrcp.f32 %v2509_v30  ;;  %v2575_v23 = vmul.f32 %v11134_v63, %v12237_v34 }
 0x357   : > { %v11136_v5 = vpop.eup %11135 }
 0x358   : > { %11026 = vmatpush3.bf16.msra.mxu1 %v12070_v55  ;;  %v2518_v35 = vpop.xlane.xlu1 %2517  ;;  %v2506_v47 = vpop.xlane.xlu0 %2505  ;;  %v2574_v6 = vmul.f32 %v11136_v5, %v12258_v53 }
 0x359   : > { %11147 = vrcp.f32 %v2518_v35  ;;  %v11138_v29 = vpop.eup %11137 }
 0x35a   : > { %11149 = vrcp.f32 %v2506_v47  ;;  %9883 = vmatprep.mubr.msk.f32.mxu0 %vm2329_vm3, %v2574_v6  ;;  %v2583_v9 = vmul.f32 %v11138_v29, %v12261_v19 }
 0x35b   : > { %v11140_v44 = vpop.eup %11139  ;;  %9884 = vmatmul.mubr.msk.f32.gmra.mrb[52].mxu0 %vm2329_vm3, %v2575_v23 }
 0x35c   : > { %v11142_v57 = vpop.eup %11141  ;;  %v2524_v56 = vpop.xlane.xlu1 %2523  ;;  %v2582_v50 = vmul.f32 %v11140_v44, %v12271_v40 }
 0x35d   : > { %v2530_v49 = vpop.xlane.xlu0 %2529  ;;  %11151 = vrcp.f32 %v2524_v56  ;;  %v2579_v17 = vmul.f32 %v11142_v57, %v12268_v7 }
 0x35e   : > { %9919 = vmatprep.mubr.msk.f32.mxu0 %vm2329_vm3, %v2582_v50  ;;  %11153 = vrcp.f32 %v2530_v49 }
 0x35f   : > { %9902 = vmatmul.mubr.msk.f32.gmra.mrb[50].mxu1 %vm2329_vm3, %v2579_v17  ;;  %9920 = vmatmul.mubr.msk.f32.vlgmr.msra.gmra.mrb[54].mxu0 %vm2329_vm3, %v2583_v9  ;;  %v11144_v12 = vpop.eup %11143 }
 0x360   : > { %v2527_v34 = vpop.xlane.xlu1 %2526  ;;  %10700 = vmatpush3.bf16.msra.mxu0 %v12065_v48  ;;  %v11146_v13 = vpop.eup %11145  ;;  %v2585_v22 = vmul.f32 %v11144_v12, %v12281_v4 }
 0x361   : > { %v2536_v53 = vpop.xlane.xlu0 %2535  ;;  %11155 = vrcp.f32 %v2527_v34  ;;  %10702 = vmatprep.subr.bf16.mxu0 %v12068_v51  ;;  %v2581_v48 = vmul.f32 %v11146_v13, %v12278_v52 }
 0x362   : > { %11157 = vrcp.f32 %v2536_v53 }
 0x363   : > { %v11148_v7 = vpop.eup %11147 }
 0x364   : > { %v11150_v40 = vpop.eup %11149  ;;  %v2533_v19 = vpop.xlane.xlu1 %2532  ;;  %v2584_v61 = vmul.f32 %v11148_v7, %v12290_v1  ;;  %10704 = vmatpush3.bf16.msra.mxu0 %v12068_v51 }
 0x365   : > { %11159 = vrcp.f32 %v2533_v19  ;;  %v2542_v16 = vpop.xlane.xlu0 %2541  ;;  %v2580_v18 = vmul.f32 %v11150_v40, %v12287_v10  ;;  %10706 = vmatprep.subr.bf16.mxu0 %v12070_v55 }
 0x366   : > { %9922 = vmatprep.mubr.msk.f32.mxu0 %vm2329_vm3, %v2584_v61  ;;  %11161 = vrcp.f32 %v2542_v16 }
 0x367   : > { %v11152_v38 = vpop.eup %11151  ;;  %9904 = vmatprep.mubr.msk.f32.mxu1 %vm2329_vm3, %v2580_v18  ;;  %9923 = vmatmul.mubr.msk.f32.gmra.mrb[56].mxu0 %vm2329_vm3, %v2585_v22 }
 0x368   : > { %9905 = vmatmul.mubr.msk.f32.gmra.mrb[52].mxu1 %vm2329_vm3, %v2581_v48  ;;  %v2539_v51 = vpop.xlane.xlu1 %2538  ;;  %v2586_v1 = vmul.f32 %v11152_v38, %v12299_v28  ;;  %10708 = vmatpush3.bf16.msra.mxu0 %v12070_v55  ;;  %v11154_v4 = vpop.eup %11153 }
 0x369   : > { %11163 = vrcp.f32 %v2539_v51  ;;  %v2588_v60 = vmul.f32 %v11154_v4, %v12296_v8 }
 0x36a   : > { %9925 = vmatprep.mubr.msk.f32.mxu0 %vm2329_vm3, %v2586_v1 }
 0x36b   : > { %v11156_v10 = vpop.eup %11155 }
 0x36c   : > { %v11158_v21 = vpop.eup %11157  ;;  %v2545_v52 = vpop.xlane.xlu1 %2544  ;;  %v2587_v32 = vmul.f32 %v11156_v10, %v12308_v37 }
 0x36d   : > { %11165 = vrcp.f32 %v2545_v52  ;;  %v2590_v58 = vmul.f32 %v11158_v21, %v12305_v11 }
 0x36e   : > { %9926 = vmatmul.mubr.msk.f32.gmra.mrb[58].mxu0 %vm2329_vm3, %v2587_v32 }
 0x36f   : > { %v11160_v24 = vpop.eup %11159  ;;  %9943 = vmatprep.mubr.msk.f32.mxu1 %vm2329_vm3, %v2590_v58  ;;  %9940 = vmatprep.mubr.msk.f32.mxu0 %vm2329_vm3, %v2588_v60 }
 0x370   : > { %v2589_v55 = vmul.f32 %v11160_v24, %v12316_v54  ;;  %v11162_v28 = vpop.eup %11161  ;;  %v3046_v54 = vld [vmem:[%s14547_s6] sm:$0xff] }
 0x371   : > { %v2592_v2 = vmul.f32 %v11162_v28, %v12314_v20  ;;  %9949 = vmatprep.subr.mxu0 %v3046_v54  ;;  %v3048_v20 = vld [vmem:[%s14547_s6 + $0x10] sm:$0xff] }
 0x372   : > { %9941 = vmatmul.mubr.msk.f32.vlgmr.msra.gmra.mrb[60].mxu0 %vm2329_vm3, %v2589_v55 }
 0x373   : > { %v11164_v0 = vpop.eup %11163  ;;  %9950 = vmatpush3.msra.mxu0 %v3046_v54 }
 0x374   : > { %v2591_v37 = vmul.f32 %v11164_v0, %v12322_v14  ;;  %v3047_v14 = vld [vmem:[%s14547_s6 + $0x8] sm:$0xff]  ;;  %9971 = vmatprep.subr.mxu0 %v3048_v20 }
 0x375   : > { %9960 = vmatprep.subr.mxu1 %v3047_v14 }
 0x376   : > { %9944 = vmatmul.mubr.msk.f32.vlgmr.msra.gmra.mrb[54].mxu1 %vm2329_vm3, %v2591_v37 }
 0x377   : > { %v11166_v8 = vpop.eup %11165  ;;  %9946 = vmatprep.mubr.msk.f32.mxu1 %vm2329_vm3, %v2592_v2  ;;  %9961 = vmatpush3.msra.mxu1 %v3047_v14 }
 0x378   : > { %v2593_v11 = vmul.f32 %v11166_v8, %v12326_v45  ;;  %v3049_v45 = vld [vmem:[%s14547_s6 + $0x18] sm:$0xff] }
 0x379   : > { %9982 = vmatprep.subr.mxu1 %v3049_v45 }
 0x37a   : > { %9947 = vmatmul.mubr.msk.f32.gmra.mrb[56].mxu1 %vm2329_vm3, %v2593_v11 }
 0x41d   : > { %v9879_v15 = vpop.f32.mrb[48].mxu0 }
 0x41e   : > { %v2678_v39 = vpop.f32.mrb[49].mxu0 }
 0x41f   : > { %9951 = vmatprep.mubr.msk.f32.mxu0 %vm1804_vm1, %v2678_v39 }
 0x420   : > { %9952 = vmatmul.mubr.msk.f32.vlgmr.msra.gmra.mrb[62].mxu0 %vm1804_vm1, %v9879_v15 }
 0x421   : > { %9972 = vmatpush3.msra.mxu0 %v3048_v20 }
 0x422   : > { %v9900_v62 = vpop.f32.mrb[48].mxu1 }
 0x423   : > { %v2791_v43 = vpop.f32.mrb[49].mxu1 }
 0x424   : > { %9962 = vmatprep.mubr.msk.f32.mxu1 %vm1804_vm1, %v2791_v43 }
 0x425   : > { %9963 = vmatmul.mubr.msk.f32.vlgmr.msra.gmra.mrb[58].mxu1 %vm1804_vm1, %v9900_v62 }
 0x426   : > { %v9882_v25 = vpop.f32.mrb[50].mxu0  ;;  %9983 = vmatpush3.msra.mxu1 %v3049_v45 }
 0x427   : > { %v2688_v3 = vpop.f32.mrb[51].mxu0 }
 0x428   : > { %9954 = vmatprep.mubr.msk.f32.mxu0 %vm1804_vm1, %v2688_v3 }
 0x429   : > { %9955 = vmatmul.mubr.msk.f32.gmra.mrb[64].mxu0 %vm1804_vm1, %v9882_v25 }
 0x42e   : > { %v9885_v42 = vpop.f32.mrb[52].mxu0 }
 0x42f   : > { %v2698_v30 = vpop.f32.mrb[53].mxu0 }
 0x430   : > { %9957 = vmatprep.mubr.msk.f32.mxu0 %vm1804_vm1, %v2698_v30 }
 0x431   : > { %9958 = vmatmul.mubr.msk.f32.gmra.mrb[66].mxu0 %vm1804_vm1, %v9885_v42 }
 0x432   : > { %v9903_v33 = vpop.f32.mrb[50].mxu1  ;;  %v9921_v5 = vpop.f32.mrb[54].mxu0 }
 0x433   : > { %v2801_v63 = vpop.f32.mrb[51].mxu1  ;;  %v2904_v35 = vpop.f32.mrb[55].mxu0 }
 0x434   : > { %9965 = vmatprep.mubr.msk.f32.mxu1 %vm1804_vm1, %v2801_v63  ;;  %9973 = vmatprep.mubr.msk.f32.mxu0 %vm1804_vm1, %v2904_v35 }
 0x435   : > { %9966 = vmatmul.mubr.msk.f32.gmra.mrb[60].mxu1 %vm1804_vm1, %v9903_v33  ;;  %9974 = vmatmul.mubr.msk.f32.vlgmr.msra.gmra.mrb[68].mxu0 %vm1804_vm1, %v9921_v5 }
 0x43a   : > { %v9924_v47 = vpop.f32.mrb[56].mxu0 }
 0x43b   : > { %v9906_v6 = vpop.f32.mrb[52].mxu1  ;;  %v2914_v29 = vpop.f32.mrb[57].mxu0 }
 0x43c   : > { %v2811_v23 = vpop.f32.mrb[53].mxu1  ;;  %9976 = vmatprep.mubr.msk.f32.mxu0 %vm1804_vm1, %v2914_v29 }
 0x43d   : > { %9968 = vmatprep.mubr.msk.f32.mxu1 %vm1804_vm1, %v2811_v23  ;;  %9977 = vmatmul.mubr.msk.f32.gmra.mrb[70].mxu0 %vm1804_vm1, %v9924_v47 }
 0x43e   : > { %9969 = vmatmul.mubr.msk.f32.gmra.mrb[62].mxu1 %vm1804_vm1, %v9906_v6 }
 0x441   : > { %v9927_v44 = vpop.f32.mrb[58].mxu0 }
 0x442   : > { %v2924_v57 = vpop.f32.mrb[59].mxu0 }
 0x443   : > { %9979 = vmatprep.mubr.msk.f32.mxu0 %vm1804_vm1, %v2924_v57 }
 0x444   : > { %9980 = vmatmul.mubr.msk.f32.gmra.mrb[72].mxu0 %vm1804_vm1, %v9927_v44 }
 0x445   : > { %v9942_v56 = vpop.f32.mrb[60].mxu0 }
 0x446   : > { %v3017_v49 = vpop.f32.mrb[61].mxu0 }
 0x447   : > { %9984 = vmatprep.mubr.msk.f32.mxu1 %vm1804_vm1, %v3017_v49 }
 0x448   : > { %9985 = vmatmul.mubr.msk.f32.vlgmr.msra.gmra.mrb[64].mxu1 %vm1804_vm1, %v9942_v56 }
 0x449   : > { %v9945_v50 = vpop.f32.mrb[54].mxu1 }
 0x44a   : > { %v3027_v17 = vpop.f32.mrb[55].mxu1 }
 0x44b   : > { %9987 = vmatprep.mubr.msk.f32.mxu1 %vm1804_vm1, %v3027_v17 }
 0x44c   : > { %9988 = vmatmul.mubr.msk.f32.gmra.mrb[66].mxu1 %vm1804_vm1, %v9945_v50 }
 0x44d   : > { %v9948_v9 = vpop.f32.mrb[56].mxu1 }
 0x44e   : > { %v3037_v34 = vpop.f32.mrb[57].mxu1 }
 0x44f   : > { %9990 = vmatprep.mubr.msk.f32.mxu1 %vm1804_vm1, %v3037_v34 }
 0x450   : > { %9991 = vmatmul.mubr.msk.f32.gmra.mrb[68].mxu1 %vm1804_vm1, %v9948_v9 }
 0x4f3   : > { %v9953_v53 = vpop.f32.mrb[62].mxu0 }
 0x4f4   : > { %v3134_v12 = vpop.f32.mrb[63].mxu0  ;;  %v3509_v7 = vsel %vm613_vm0, %v9953_v53, 0.0 }
 0x4f5   : > { %v3502_v61 = vsel %vm613_vm0, %v3134_v12, 0.0 }
 0x4f8   : > { %v9964_v13 = vpop.f32.mrb[58].mxu1 }
 0x4f9   : > { %v3510_v40 = vsel %vm613_vm0, %v9964_v13, 0.0  ;;  %v3247_v19 = vpop.f32.mrb[59].mxu1 }
 0x4fa   : > { %v3511_v16 = vadd.f32 %v3510_v40, %v3509_v7  ;;  %v3503_v18 = vsel %vm613_vm0, %v3247_v19, 0.0 }
 0x4fb   : > { %v3504_v22 = vadd.f32 %v3503_v18, %v3502_v61 }
 0x4fc   : > { %v9956_v48 = vpop.f32.mrb[64].mxu0 }
 0x4fd   : > { %v3144_v38 = vpop.f32.mrb[65].mxu0  ;;  %v3523_v10 = vsel %vm613_vm0, %v9956_v48, 0.0 }
 0x4fe   : > { %v3516_v58 = vsel %vm613_vm0, %v3144_v38, 0.0 }
 0x504   : > { %v9959_v51 = vpop.f32.mrb[66].mxu0 }
 0x505   : > { %v3154_v1 = vpop.f32.mrb[67].mxu0  ;;  %v3537_v45 = vsel %vm613_vm0, %v9959_v51, 0.0 }
 0x506   : > { %v3530_v25 = vsel %vm613_vm0, %v3154_v1, 0.0 }
 0x508   : > { %v9967_v4 = vpop.f32.mrb[60].mxu1  ;;  %v9975_v32 = vpop.f32.mrb[68].mxu0 }
 0x509   : > { %v3524_v21 = vsel %vm613_vm0, %v9967_v4, 0.0  ;;  %v3257_v52 = vpop.f32.mrb[61].mxu1  ;;  %v3512_v55 = vsel %vm613_vm0, %v9975_v32, 0.0  ;;  %v3360_v28 = vpop.f32.mrb[69].mxu0 }
 0x50a   : > { %v3525_v60 = vadd.f32 %v3524_v21, %v3523_v10  ;;  %v3517_v24 = vsel %vm613_vm0, %v3257_v52, 0.0  ;;  %v3513_v37 = vadd.f32 %v3512_v55, %v3511_v16  ;;  %v3505_v2 = vsel %vm613_vm0, %v3360_v28, 0.0 }
 0x50b   : > { %v3518_v0 = vadd.f32 %v3517_v24, %v3516_v58  ;;  %v3506_v8 = vadd.f32 %v3505_v2, %v3504_v22 }
 0x510   : > { %v9978_v11 = vpop.f32.mrb[70].mxu0 }
 0x511   : > { %v9970_v54 = vpop.f32.mrb[62].mxu1  ;;  %v3526_v14 = vsel %vm613_vm0, %v9978_v11, 0.0  ;;  %v3370_v20 = vpop.f32.mrb[71].mxu0 }
 0x512   : > { %v3538_v15 = vsel %vm613_vm0, %v9970_v54, 0.0  ;;  %v3527_v39 = vadd.f32 %v3526_v14, %v3525_v60  ;;  %v3267_v62 = vpop.f32.mrb[63].mxu1  ;;  %v3519_v43 = vsel %vm613_vm0, %v3370_v20, 0.0 }
 0x513   : > { %v3539_v3 = vadd.f32 %v3538_v15, %v3537_v45  ;;  %v3531_v42 = vsel %vm613_vm0, %v3267_v62, 0.0  ;;  %v3520_v30 = vadd.f32 %v3519_v43, %v3518_v0 }
 0x514   : > { %v3532_v33 = vadd.f32 %v3531_v42, %v3530_v25 }
 0x517   : > { %v9981_v63 = vpop.f32.mrb[72].mxu0 }
 0x518   : > { %v3540_v5 = vsel %vm613_vm0, %v9981_v63, 0.0  ;;  %v3380_v35 = vpop.f32.mrb[73].mxu0 }
 0x519   : > { %v3541_v47 = vadd.f32 %v3540_v5, %v3539_v3  ;;  %v3533_v6 = vsel %vm613_vm0, %v3380_v35, 0.0 }
 0x51a   : > { %v3534_v29 = vadd.f32 %v3533_v6, %v3532_v33  ;;  %v3656_v6 = vld [vmem:[%s14550_s9 + $0x8] sm:$0xff] }
 0x51b   : > { %v9986_v23 = vpop.f32.mrb[64].mxu1 }
 0x51c   : > { %v3514_v44 = vsel %vm613_vm0, %v9986_v23, 0.0  ;;  %v3473_v57 = vpop.f32.mrb[65].mxu1  ;;  %v3657_v23 = vld [vmem:[%s14550_s9 + $0x10] sm:$0xff] }
 0x51d   : > { %v3515_v56 = vadd.f32 %v3514_v44, %v3513_v37  ;;  %v3507_v49 = vsel %vm613_vm0, %v3473_v57, 0.0  ;;  %v3658_v44 = vld [vmem:[%s14550_s9 + $0x18] sm:$0xff] }
 0x51e   : > { %v3508_v50 = vadd.f32 %v3507_v49, %v3506_v8  ;;  %v10713_v57 = vpack.c.bf16 %v3658_v44, %v3657_v23 }
 0x51f   : > { %v9989_v17 = vpop.f32.mrb[66].mxu1  ;;  %v3545_v9 = vadd.f32 %v3515_v56, %v11646_v27 }
 0x520   : > { %v3528_v34 = vsel %vm613_vm0, %v9989_v17, 0.0  ;;  %v3483_v53 = vpop.f32.mrb[67].mxu1  ;;  %v3544_v12 = vadd.f32 %v3508_v50, %v11644_v26 }
 0x521   : > { %v3529_v13 = vadd.f32 %v3528_v34, %v3527_v39  ;;  %v3521_v7 = vsel %vm613_vm0, %v3483_v53, 0.0  ;;  %v3555_v40 = vsel %vm613_vm0, %v3545_v9, 0.0 }
 0x522   : > { %v3522_v19 = vadd.f32 %v3521_v7, %v3520_v30  ;;  %3556 = vadd.xlane.f32.xlu1 %v3555_v40  ;;  %v3552_v61 = vsel %vm613_vm0, %v3544_v12, 0.0 }
 0x523   : > { %3553 = vadd.xlane.f32.xlu0 %v3552_v61  ;;  %v9992_v16 = vpop.f32.mrb[68].mxu1  ;;  %v3547_v18 = vadd.f32 %v3529_v13, %v11670_v36 }
 0x524   : > { %v3542_v27 = vsel %vm613_vm0, %v9992_v16, 0.0  ;;  %v3493_v22 = vpop.f32.mrb[69].mxu1  ;;  %v3546_v48 = vadd.f32 %v3522_v19, %v11655_v31 }
 0x525   : > { %v3543_v38 = vadd.f32 %v3542_v27, %v3541_v47  ;;  %v3535_v26 = vsel %vm613_vm0, %v3493_v22, 0.0  ;;  %v3561_v51 = vsel %vm613_vm0, %v3547_v18, 0.0  ;;  %v3655_v47 = vld [vmem:[%s14550_s9] sm:$0xff] }
 0x526   : > { %v3536_v1 = vadd.f32 %v3535_v26, %v3534_v29  ;;  %3562 = vadd.xlane.f32.xlu1 %v3561_v51  ;;  %v3558_v4 = vsel %vm613_vm0, %v3546_v48, 0.0  ;;  %v10709_v29 = vpack.c.bf16 %v3656_v6, %v3655_v47  ;;  %v8748_v26 = vld [vmem:[%s14548_s7] ss:$0 sm:$0xff] }
 0x527   : > { %3559 = vadd.xlane.f32.xlu0 %v3558_v4  ;;  %v3549_v10 = vadd.f32 %v3543_v38, %v11698_v46 }
 0x528   : > { %v3548_v21 = vadd.f32 %v3536_v1, %v11683_v41  ;;  %10710 = vmatprep.subr.bf16.mxu0 %v10709_v29 }
 0x529   : > { %v3567_v36 = vsel %vm613_vm0, %v3549_v10, 0.0  ;;  %10712 = vmatpush3.bf16.msra.mxu0 %v10709_v29 }
 0x52a   : > { %3568 = vadd.xlane.f32.xlu1 %v3567_v36  ;;  %v3564_v52 = vsel %vm613_vm0, %v3548_v21, 0.0  ;;  %10714 = vmatprep.subr.bf16.mxu0 %v10713_v57 }
 0x52b   : > { %3565 = vadd.xlane.f32.xlu0 %v3564_v52 }
 0x52d   : > { %10716 = vmatpush3.bf16.msra.mxu0 %v10713_v57 }
 0x5af   : > { %v3557_v31 = vpop.xlane.xlu1 %3556 }
 0x5b0   : > { %v3572_v32 = vmul.f32 0.03125, %v3557_v31  ;;  %v3554_v58 = vpop.xlane.xlu0 %3553 }
 0x5b1   : > { %v3571_v60 = vmul.f32 0.03125, %v3554_v58 }
 0x5b2   : > { %v12466_v24 = vsub.f32 %v3545_v9, %v3572_v32 }
 0x5b3   : > { %v12468_v55 = vsub.f32 %v3544_v12, %v3571_v60  ;;  %v3563_v28 = vpop.xlane.xlu1 %3562 }
 0x5b4   : > { %v3574_v0 = vmul.f32 0.03125, %v3563_v28  ;;  %v3560_v37 = vpop.xlane.xlu0 %3559  ;;  %v3584_v41 = vmul.f32 %v12466_v24, %v12466_v24 }
 0x5b5   : > { %v3573_v46 = vmul.f32 0.03125, %v3560_v37  ;;  %v3583_v2 = vmul.f32 %v12468_v55, %v12468_v55 }
 0x5b6   : > { %v12474_v8 = vsub.f32 %v3547_v18, %v3574_v0  ;;  %v3592_v11 = vsel %vm613_vm0, %v3584_v41, 0.0 }
 0x5b7   : > { %v12477_v54 = vsub.f32 %v3546_v48, %v3573_v46  ;;  %3593 = vadd.xlane.f32.xlu1 %v3592_v11  ;;  %v3569_v14 = vpop.xlane.xlu1 %3568  ;;  %v3589_v20 = vsel %vm613_vm0, %v3583_v2, 0.0 }
 0x5b8   : > { %v3576_v45 = vmul.f32 0.03125, %v3569_v14  ;;  %3590 = vadd.xlane.f32.xlu0 %v3589_v20  ;;  %v3566_v15 = vpop.xlane.xlu0 %3565  ;;  %v3586_v39 = vmul.f32 %v12474_v8, %v12474_v8 }
 0x5b9   : > { %v3575_v62 = vmul.f32 0.03125, %v3566_v15  ;;  %v3585_v43 = vmul.f32 %v12477_v54, %v12477_v54  ;;  %v3942_v15 = vld [vmem:[%s14552_s11 + $0x8] sm:$0xff] }
 0x5ba   : > { %v12484_v25 = vsub.f32 %v3549_v10, %v3576_v45  ;;  %v3598_v3 = vsel %vm613_vm0, %v3586_v39, 0.0  ;;  %v8749_v10 = vld [vmem:[%s14549_s8] ss:$0 sm:$0xff] }
 0x5bb   : > { %v12487_v42 = vsub.f32 %v3548_v21, %v3575_v62  ;;  %3599 = vadd.xlane.f32.xlu1 %v3598_v3  ;;  %v3595_v30 = vsel %vm613_vm0, %v3585_v43, 0.0  ;;  %v3941_v45 = vld [vmem:[%s14552_s11] sm:$0xff]  ;;  %v3943_v62 = vld [vmem:[%s14552_s11 + $0x10] sm:$0xff]  ;;  %v3944_v43 = vld [vmem:[%s14552_s11 + $0x18] sm:$0xff] }
 0x5bc   : > { %3596 = vadd.xlane.f32.xlu0 %v3595_v30  ;;  %v3588_v33 = vmul.f32 %v12484_v25, %v12484_v25  ;;  %v10717_v39 = vpack.c.bf16 %v3942_v15, %v3941_v45  ;;  %v3945_v3 = vld [vmem:[%s14552_s11 + $0x20] sm:$0xff] }
 0x5bd   : > { %v3587_v63 = vmul.f32 %v12487_v42, %v12487_v42 }
 0x5be   : > { %v3604_v5 = vsel %vm613_vm0, %v3588_v33, 0.0  ;;  %10718 = vmatprep.subr.bf16.mxu1 %v10717_v39  ;;  %v3947_v33 = vld [vmem:[%s14552_s11 + $0x30] sm:$0xff] }
 0x5bf   : > { %3605 = vadd.xlane.f32.xlu1 %v3604_v5  ;;  %v3601_v35 = vsel %vm613_vm0, %v3587_v63, 0.0  ;;  %10720 = vmatpush3.bf16.msra.mxu1 %v10717_v39  ;;  %v3948_v63 = vld [vmem:[%s14552_s11 + $0x38] sm:$0xff] }
 0x5c0   : > { %3602 = vadd.xlane.f32.xlu0 %v3601_v35  ;;  %v10729_v5 = vpack.c.bf16 %v3948_v63, %v3947_v33  ;;  %v8750_v35 = vld [vmem:[%s14551_s10] ss:$0 sm:$0xff] }
 0x644   : > { %v3594_v56 = vpop.xlane.xlu1 %3593 }
 0x645   : > { %v3608_v49 = vmul.f32 0.03125, %v3594_v56  ;;  %v3591_v50 = vpop.xlane.xlu0 %3590 }
 0x646   : > { %v3607_v17 = vmul.f32 0.03125, %v3591_v50 }
 0x647   : > { %v3614_v9 = vadd.f32 1e-06, %v3608_v49 }
 0x648   : > { %v3613_v34 = vadd.f32 1e-06, %v3607_v17  ;;  %v3600_v53 = vpop.xlane.xlu1 %3599 }
 0x649   : > { %11167 = vrsqrt.f32 %v3614_v9  ;;  %v3610_v12 = vmul.f32 0.03125, %v3600_v53  ;;  %v3597_v13 = vpop.xlane.xlu0 %3596 }
 0x64a   : > { %11169 = vrsqrt.f32 %v3613_v34  ;;  %v3609_v7 = vmul.f32 0.03125, %v3597_v13 }
 0x64b   : > { %v3616_v40 = vadd.f32 1e-06, %v3610_v12 }
 0x64c   : > { %v3615_v19 = vadd.f32 1e-06, %v3609_v7  ;;  %v3606_v61 = vpop.xlane.xlu1 %3605 }
 0x64d   : > { %11171 = vrsqrt.f32 %v3616_v40  ;;  %v3612_v16 = vmul.f32 0.03125, %v3606_v61  ;;  %v3603_v18 = vpop.xlane.xlu0 %3602 }
 0x64e   : > { %11173 = vrsqrt.f32 %v3615_v19  ;;  %v3611_v27 = vmul.f32 0.03125, %v3603_v18 }
 0x64f   : > { %v3618_v22 = vadd.f32 1e-06, %v3612_v16 }
 0x650   : > { %v3617_v48 = vadd.f32 1e-06, %v3611_v27 }
 0x651   : > { %11175 = vrsqrt.f32 %v3618_v22 }
 0x652   : > { %11177 = vrsqrt.f32 %v3617_v48 }
 0x653   : > { %v11168_v38 = vpop.eup %11167 }
 0x654   : > { %v11170_v51 = vpop.eup %11169  ;;  %v3626_v1 = vmul.f32 %v11168_v38, %v12466_v24 }
 0x655   : > { %v3625_v4 = vmul.f32 %v11170_v51, %v12468_v55 }
 0x656   : > { %v3638_v21 = vmul.f32 %v8748_v26, %v3626_v1 }
 0x657   : > { %v11172_v36 = vpop.eup %11171  ;;  %v3637_v52 = vmul.f32 %v8748_v26, %v3625_v4 }
 0x658   : > { %v11174_v31 = vpop.eup %11173  ;;  %v3628_v32 = vmul.f32 %v11172_v36, %v12474_v8  ;;  %v12520_v28 = vadd.f32 %v8749_v10, %v3638_v21 }
 0x659   : > { %v12517_v58 = vadd.f32 %v8749_v10, %v3637_v52  ;;  %v3627_v60 = vmul.f32 %v11174_v31, %v12477_v54 }
 0x65a   : > { %v3640_v0 = vmul.f32 %v8748_v26, %v3628_v32 }
 0x65b   : > { %v11176_v24 = vpop.eup %11175  ;;  %10001 = vmatprep.mubr.msk.f32.mxu0 %vm613_vm0, %v12517_v58  ;;  %v3639_v55 = vmul.f32 %v8748_v26, %v3627_v60 }
 0x65c   : > { %v11178_v37 = vpop.eup %11177  ;;  %10002 = vmatmul.mubr.msk.f32.vlgmr.msra.gmra.mrb[74].mxu0 %vm613_vm0, %v12520_v28  ;;  %v3630_v41 = vmul.f32 %v11176_v24, %v12484_v25  ;;  %v12530_v8 = vadd.f32 %v8749_v10, %v3640_v0  ;;  %v10721_v25 = vpack.c.bf16 %v3944_v43, %v3943_v62 }
 0x65d   : > { %v12527_v46 = vadd.f32 %v8749_v10, %v3639_v55  ;;  %v3629_v2 = vmul.f32 %v11178_v37, %v12487_v42  ;;  %v3946_v42 = vld [vmem:[%s14552_s11 + $0x28] sm:$0xff] }
 0x65e   : > { %v3642_v11 = vmul.f32 %v8748_v26, %v3630_v41  ;;  %10722 = vmatprep.subr.bf16.mxu1 %v10721_v25  ;;  %v10725_v30 = vpack.c.bf16 %v3946_v42, %v3945_v3 }
 0x65f   : > { %10004 = vmatprep.mubr.msk.f32.mxu0 %vm613_vm0, %v12527_v46  ;;  %v3641_v54 = vmul.f32 %v8748_v26, %v3629_v2  ;;  %10724 = vmatpush3.bf16.msra.mxu1 %v10721_v25 }
 0x660   : > { %10005 = vmatmul.mubr.msk.f32.gmra.mrb[76].mxu0 %vm613_vm0, %v12530_v8  ;;  %v12538_v20 = vadd.f32 %v8749_v10, %v3642_v11  ;;  %10726 = vmatprep.subr.bf16.mxu1 %v10725_v30 }
 0x661   : > { %v12536_v14 = vadd.f32 %v8749_v10, %v3641_v54 }
 0x663   : > { %10007 = vmatprep.mubr.msk.f32.mxu0 %vm613_vm0, %v12536_v14  ;;  %10728 = vmatpush3.bf16.msra.mxu1 %v10725_v30 }
 0x664   : > { %10008 = vmatmul.mubr.msk.f32.gmra.mrb[78].mxu0 %vm613_vm0, %v12538_v20  ;;  %10730 = vmatprep.subr.bf16.mxu1 %v10729_v5 }
 0x667   : > { %10732 = vmatpush3.bf16.msra.mxu1 %v10729_v5 }
 0x72f   : > { %v10003_v47 = vpop.f32.mrb[74].mxu0 }
 0x730   : > { %v12571_v6 = vadd.f32 %v10003_v47, %v8750_v35  ;;  %v3750_v29 = vpop.f32.mrb[75].mxu0 }
 0x731   : > { %v12573_v23 = vadd.f32 %v8750_v35, %v3750_v29 }
 0x732   : > { %v12576_v44 = vmul.f32 0.70710677, %v12571_v6 }
 0x733   : > { %v12579_v57 = vmul.f32 0.70710677, %v12573_v23  ;;  %v10006_v56 = vpop.f32.mrb[76].mxu0 }
 0x734   : > { %v3804_v49 = vand.u32 2147483647, %v12576_v44  ;;  %v12582_v50 = vadd.f32 %v10006_v56, %v8750_v35  ;;  %v3760_v17 = vpop.f32.mrb[77].mxu0  ;;  %vm3792_vm4 = vcmp.lt.f32.partialorder %v12576_v44, 0.0  ;;  %v3780_v44 = vmul.f32 0.5, %v12571_v6 }
 0x735   : > { %v3803_v9 = vand.u32 2147483647, %v12579_v57  ;;  %v12585_v34 = vadd.f32 %v8750_v35, %v3760_v17  ;;  %vm3791_vm5 = vcmp.lt.f32.partialorder %v12579_v57, 0.0 }
 0x736   : > { %v3810_v53 = vmul.f32 0.3275911, %v3804_v49  ;;  %v12588_v13 = vmul.f32 0.70710677, %v12582_v50  ;;  %v3888_v4 = vsub.f32 0.0, %v3804_v49 }
 0x737   : > { %v3809_v12 = vmul.f32 0.3275911, %v3803_v9  ;;  %v12591_v40 = vmul.f32 0.70710677, %v12585_v34  ;;  %v10009_v19 = vpop.f32.mrb[78].mxu0  ;;  %v3887_v52 = vsub.f32 0.0, %v3803_v9 }
 0x738   : > { %v3816_v7 = vadd.f32 1.0, %v3810_v53  ;;  %v3806_v16 = vand.u32 2147483647, %v12588_v13  ;;  %v3770_v18 = vpop.f32.mrb[79].mxu0  ;;  %v12595_v48 = vadd.f32 %v10009_v19, %v8750_v35  ;;  %v3894_v60 = vmul.f32 %v3888_v4, %v3804_v49 }
 0x739   : > { %v3815_v61 = vadd.f32 1.0, %v3809_v12  ;;  %v3805_v22 = vand.u32 2147483647, %v12591_v40  ;;  %v12597_v26 = vadd.f32 %v8750_v35, %v3770_v18  ;;  %v3893_v11 = vmul.f32 %v3887_v52, %v3803_v9 }
 0x73a   : > { %11179 = vrcp.f32 %v3816_v7  ;;  %v3812_v27 = vmul.f32 0.3275911, %v3806_v16  ;;  %v12600_v1 = vmul.f32 0.70710677, %v12595_v48  ;;  %v3890_v55 = vsub.f32 0.0, %v3806_v16 }
 0x73b   : > { %11181 = vrcp.f32 %v3815_v61  ;;  %v3811_v51 = vmul.f32 0.3275911, %v3805_v22  ;;  %v12603_v10 = vmul.f32 0.70710677, %v12597_v26  ;;  %v3901_v39 = vmul.f32 1.442695, %v3894_v60 }
 0x73c   : > { %v3818_v38 = vadd.f32 1.0, %v3812_v27  ;;  %v3808_v36 = vand.u32 2147483647, %v12600_v1  ;;  %v3896_v43 = vmul.f32 %v3890_v55, %v3806_v16  ;;  %v3889_v25 = vsub.f32 0.0, %v3805_v22 }
 0x73d   : > { %v3817_v21 = vadd.f32 1.0, %v3811_v51  ;;  %v3807_v31 = vand.u32 2147483647, %v12603_v10  ;;  %v3899_v30 = vmul.f32 1.442695, %v3893_v11  ;;  %vm3794_vm7 = vcmp.lt.f32.partialorder %v12588_v13, 0.0 }
 0x73e   : > { %11183 = vrcp.f32 %v3818_v38  ;;  %v3814_v32 = vmul.f32 0.3275911, %v3808_v36  ;;  %v3892_v5 = vsub.f32 0.0, %v3808_v36  ;;  %v3905_v49 = vmul.f32 1.442695, %v3896_v43 }
 0x73f   : > { %11185 = vrcp.f32 %v3817_v21  ;;  %v3813_v0 = vmul.f32 0.3275911, %v3807_v31  ;;  %v3895_v17 = vmul.f32 %v3889_v25, %v3805_v22  ;;  %v3891_v12 = vsub.f32 0.0, %v3807_v31 }
 0x740   : > { %v3820_v37 = vadd.f32 1.0, %v3814_v32  ;;  %v3898_v61 = vmul.f32 %v3892_v5, %v3808_v36  ;;  %vm3793_vm8 = vcmp.lt.f32.partialorder %v12591_v40, 0.0  ;;  %vm3796_vm9 = vcmp.lt.f32.partialorder %v12600_v1, 0.0 }
 0x741   : > { %v3819_v54 = vadd.f32 1.0, %v3813_v0  ;;  %v3903_v4 = vmul.f32 1.442695, %v3895_v17  ;;  %v3897_v60 = vmul.f32 %v3891_v12, %v3807_v31  ;;  %vm3795_vm10 = vcmp.lt.f32.partialorder %v12603_v10, 0.0 }
 0x742   : > { %11187 = vrcp.f32 %v3820_v37  ;;  %v3909_v36 = vmul.f32 1.442695, %v3898_v61  ;;  %v3783_v10 = vmul.f32 0.5, %v12597_v26 }
 0x743   : > { %11189 = vrcp.f32 %v3819_v54  ;;  %v3907_v31 = vmul.f32 1.442695, %v3897_v60 }
 0x744   : > { %v11180_v24 = vpop.eup %11179  ;;  %11191 = vpow2.f32 %v3901_v39 }
 0x745   : > { %v11182_v41 = vpop.eup %11181  ;;  %v3834_v2 = vmul.f32 1.0614054, %v11180_v24  ;;  %11193 = vpow2.f32 %v3899_v30 }
 0x746   : > { %v3833_v45 = vmul.f32 1.0614054, %v11182_v41  ;;  %11195 = vpow2.f32 %v3905_v49 }
 0x747   : > { %v3840_v15 = vadd.f32 -1.4531521, %v3834_v2  ;;  %11197 = vpow2.f32 %v3903_v4 }
 0x748   : > { %v3839_v62 = vadd.f32 -1.4531521, %v3833_v45  ;;  %v12607_v3 = vpop.eup %11183  ;;  %11199 = vpow2.f32 %v3909_v36 }
 0x749   : > { %v3846_v42 = vmul.f32 %v11180_v24, %v3840_v15  ;;  %v3836_v63 = vmul.f32 1.0614054, %v12607_v3  ;;  %v12610_v47 = vpop.eup %11185  ;;  %11201 = vpow2.f32 %v3907_v31 }
 0x74a   : > { %v3845_v33 = vmul.f32 %v11182_v41, %v3839_v62  ;;  %v3835_v53 = vmul.f32 1.0614054, %v12610_v47 }
 0x74b   : > { %v3852_v35 = vadd.f32 1.4214138, %v3846_v42  ;;  %v3842_v56 = vadd.f32 -1.4531521, %v3836_v63 }
 0x74c   : > { %v3851_v29 = vadd.f32 1.4214138, %v3845_v33  ;;  %v3841_v18 = vadd.f32 -1.4531521, %v3835_v53  ;;  %v12614_v27 = vpop.eup %11187 }
 0x74d   : > { %v3858_v9 = vmul.f32 %v11180_v24, %v3852_v35  ;;  %v3848_v19 = vmul.f32 %v12607_v3, %v3842_v56  ;;  %v12616_v21 = vpop.eup %11189  ;;  %v3838_v32 = vmul.f32 1.0614054, %v12614_v27 }
 0x74e   : > { %v3857_v7 = vmul.f32 %v11182_v41, %v3851_v29  ;;  %v3847_v52 = vmul.f32 %v12610_v47, %v3841_v18  ;;  %v3837_v37 = vmul.f32 1.0614054, %v12616_v21  ;;  %v11192_v62 = vpop.eup %11191 }
 0x74f   : > { %v3864_v16 = vadd.f32 -0.28449672, %v3858_v9  ;;  %v3854_v51 = vadd.f32 1.4214138, %v3848_v19  ;;  %v3844_v54 = vadd.f32 -1.4531521, %v3838_v32  ;;  %v11194_v5 = vpop.eup %11193 }
 0x750   : > { %v3863_v38 = vadd.f32 -0.28449672, %v3857_v7  ;;  %v3853_v11 = vadd.f32 1.4214138, %v3847_v52  ;;  %v3843_v39 = vadd.f32 -1.4531521, %v3837_v37  ;;  %v11196_v12 = vpop.eup %11195 }
 0x751   : > { %v3870_v22 = vmul.f32 %v11180_v24, %v3864_v16  ;;  %v3860_v55 = vmul.f32 %v12607_v3, %v3854_v51  ;;  %v3850_v42 = vmul.f32 %v12614_v27, %v3844_v54  ;;  %v11435_v7 = vmov 1.0   ;;  %v11198_v36 = vpop.eup %11197 }
 0x752   : > { %v3869_v0 = vmul.f32 %v11182_v41, %v3863_v38  ;;  %v3859_v25 = vmul.f32 %v12610_v47, %v3853_v11  ;;  %v3849_v63 = vmul.f32 %v12616_v21, %v3843_v39  ;;  %v3798_v19 = vsel %vm3792_vm4, -1.0, %v11435_v7 }
 0x753   : > { %v3876_v2 = vadd.f32 0.2548296, %v3870_v22  ;;  %v3866_v15 = vadd.f32 -0.28449672, %v3860_v55  ;;  %v3856_v56 = vadd.f32 1.4214138, %v3850_v42 }
 0x754   : > { %v3875_v45 = vadd.f32 0.2548296, %v3869_v0  ;;  %v3865_v29 = vadd.f32 -0.28449672, %v3859_v25  ;;  %v3855_v17 = vadd.f32 1.4214138, %v3849_v63  ;;  %v11200_v25 = vpop.eup %11199 }
 0x755   : > { %v3882_v43 = vmul.f32 %v11180_v24, %v3876_v2  ;;  %v3872_v33 = vmul.f32 %v12607_v3, %v3866_v15  ;;  %v3797_v51 = vsel %vm3791_vm5, -1.0, %v11435_v7  ;;  %v3779_v37 = vmul.f32 0.5, %v12573_v23  ;;  %v11202_v31 = vpop.eup %11201 }
 0x756   : > { %v3881_v30 = vmul.f32 %v11182_v41, %v3875_v45  ;;  %v3871_v53 = vmul.f32 %v12610_v47, %v3865_v29  ;;  %v3862_v41 = vmul.f32 %v12614_v27, %v3856_v56  ;;  %v3861_v18 = vmul.f32 %v12616_v21, %v3855_v17 }
 0x757   : > { %v3912_v35 = vmul.f32 %v11192_v62, %v3882_v43  ;;  %v3878_v49 = vadd.f32 0.2548296, %v3872_v33  ;;  %v3800_v54 = vsel %vm3794_vm7, -1.0, %v11435_v7  ;;  %v3799_v23 = vsel %vm3793_vm8, -1.0, %v11435_v7 }
 0x758   : > { %v3911_v24 = vmul.f32 %v11194_v5, %v3881_v30  ;;  %v3877_v4 = vadd.f32 0.2548296, %v3871_v53  ;;  %v3868_v22 = vadd.f32 -0.28449672, %v3862_v41  ;;  %v3867_v60 = vadd.f32 -0.28449672, %v3861_v18 }
 0x759   : > { %v3918_v9 = vsub.f32 1.0, %v3912_v35  ;;  %v3884_v16 = vmul.f32 %v12607_v3, %v3878_v49  ;;  %v3782_v29 = vmul.f32 0.5, %v12582_v50  ;;  %v3801_v1 = vsel %vm3795_vm10, -1.0, %v11435_v7 }
 0x75a   : > { %v3917_v61 = vsub.f32 1.0, %v3911_v24  ;;  %v3883_v55 = vmul.f32 %v12610_v47, %v3877_v4  ;;  %v3874_v3 = vmul.f32 %v12614_v27, %v3868_v22  ;;  %v3873_v11 = vmul.f32 %v12616_v21, %v3867_v60 }
 0x75b   : > { %v3924_v38 = vmul.f32 %v3918_v9, %v3798_v19  ;;  %v3914_v32 = vmul.f32 %v11196_v12, %v3884_v16  ;;  %v8757_v19 = vld [vmem:[%s14553_s12] ss:$0 sm:$0xff] }
 0x75c   : > { %v3923_v52 = vmul.f32 %v3917_v61, %v3797_v51  ;;  %v3913_v13 = vmul.f32 %v11198_v36, %v3883_v55  ;;  %v3880_v45 = vadd.f32 0.2548296, %v3874_v3  ;;  %v3879_v39 = vadd.f32 0.2548296, %v3873_v11 }
 0x75d   : > { %v3930_v0 = vadd.f32 1.0, %v3924_v38  ;;  %v3920_v57 = vsub.f32 1.0, %v3914_v32 }
 0x75e   : > { %v3929_v2 = vadd.f32 1.0, %v3923_v52  ;;  %v3919_v47 = vsub.f32 1.0, %v3913_v13  ;;  %v3886_v43 = vmul.f32 %v12614_v27, %v3880_v45  ;;  %v3885_v42 = vmul.f32 %v12616_v21, %v3879_v39 }
 0x75f   : > { %v3926_v6 = vmul.f32 %v3920_v57, %v3800_v54  ;;  %v3936_v62 = vmul.f32 %v3930_v0, %v3780_v44  ;;  %v3781_v27 = vmul.f32 0.5, %v12585_v34  ;;  %v3802_v21 = vsel %vm3796_vm9, -1.0, %v11435_v7 }
 0x760   : > { %v3935_v15 = vmul.f32 %v3929_v2, %v3779_v37  ;;  %v3925_v30 = vmul.f32 %v3919_v47, %v3799_v23  ;;  %v3916_v40 = vmul.f32 %v11200_v25, %v3886_v43  ;;  %v3915_v63 = vmul.f32 %v11202_v31, %v3885_v42 }
 0x761   : > { %v3932_v33 = vadd.f32 1.0, %v3926_v6  ;;  %v3784_v34 = vmul.f32 0.5, %v12595_v48 }
 0x762   : > { %10026 = vmatprep.mubr.msk.f32.mxu1 %vm3956_vm6, %v3935_v15  ;;  %v3931_v5 = vadd.f32 1.0, %v3925_v30  ;;  %v3922_v35 = vsub.f32 1.0, %v3916_v40  ;;  %v3921_v56 = vsub.f32 1.0, %v3915_v63 }
 0x763   : > { %10027 = vmatmul.mubr.msk.f32.vlgmr.msra.gmra.mrb[70].mxu1 %vm3956_vm6, %v3936_v62  ;;  %v3938_v17 = vmul.f32 %v3932_v33, %v3782_v29 }
 0x764   : > { %v3937_v24 = vmul.f32 %v3931_v5, %v3781_v27  ;;  %v3928_v49 = vmul.f32 %v3922_v35, %v3802_v21  ;;  %v3927_v9 = vmul.f32 %v3921_v56, %v3801_v1 }
 0x766   : > { %v3934_v53 = vadd.f32 1.0, %v3928_v49  ;;  %10029 = vmatprep.mubr.msk.f32.mxu1 %vm3956_vm6, %v3937_v24  ;;  %v3933_v41 = vadd.f32 1.0, %v3927_v9  ;;  %v8766_v9 = vld [vmem:[%s14584_s3 + $0x80] sm:$0xff] }
 0x767   : > { %10030 = vmatmul.mubr.msk.f32.gmra.mrb[72].mxu1 %vm3956_vm6, %v3938_v17 }
 0x768   : > { %v3939_v50 = vmul.f32 %v3933_v41, %v3783_v10  ;;  %v3940_v12 = vmul.f32 %v3934_v53, %v3784_v34  ;;  %v8767_v53 = vld [vmem:[%s14584_s3 + $0x88] sm:$0xff]  ;;  %v8770_v10 = vld [vmem:[%s14584_s3 + $0xa0] sm:$0xff] }
 0x769   : > { %v10733_v41 = vpack.c.bf16 %v8767_v53, %v8766_v9  ;;  %v8771_v34 = vld [vmem:[%s14584_s3 + $0xa8] sm:$0xff] }
 0x76a   : > { %10032 = vmatprep.mubr.msk.f32.mxu1 %vm3956_vm6, %v3939_v50  ;;  %v10741_v50 = vpack.c.bf16 %v8771_v34, %v8770_v10  ;;  %v8811_v9 = vld [vmem:[%s14545_s4 + $0xa8] sm:$0xff] }
 0x76b   : > { %10033 = vmatmul.mubr.msk.f32.gmra.mrb[74].mxu1 %vm3956_vm6, %v3940_v12  ;;  %10734 = vmatprep.subr.bf16.mxu0 %v10733_v41  ;;  %v8768_v12 = vld [vmem:[%s14584_s3 + $0x90] sm:$0xff] }
 0x76c   : > { %10736 = vmatpush3.bf16.msra.mxu0 %v10733_v41  ;;  %10742 = vmatprep.subr.bf16.mxu1 %v10741_v50 }
 0x76d   : > { %10744 = vmatpush3.bf16.msra.mxu1 %v10741_v50 }
 0x836   : > { %v10028_v61 = vpop.f32.mrb[70].mxu1 }
 0x837   : > { %v4047_v16 = vadd.f32 %v10028_v61, %v8757_v19  ;;  %v4041_v18 = vpop.f32.mrb[71].mxu1  ;;  %v8772_v61 = vld [vmem:[%s14584_s3 + $0xb0] sm:$0xff] }
 0x838   : > { %v4042_v38 = vadd.f32 %v8757_v19, %v4041_v18  ;;  %v8773_v18 = vld [vmem:[%s14584_s3 + $0xb8] sm:$0xff] }
 0x839   : > { %v4071_v26 = vadd.f32 %v4047_v16, %v12520_v28 }
 0x83a   : > { %v4070_v51 = vadd.f32 %v4042_v38, %v12517_v58  ;;  %v10031_v22 = vpop.f32.mrb[72].mxu1  ;;  %v10745_v38 = vpack.c.bf16 %v8773_v18, %v8772_v61 }
 0x83b   : > { %v4081_v48 = vsel %vm613_vm0, %v4071_v26, 0.0  ;;  %v4057_v52 = vadd.f32 %v10031_v22, %v8757_v19  ;;  %v4051_v32 = vpop.f32.mrb[73].mxu1  ;;  %v8779_v22 = vld [vmem:[%s14584_s3 + $0xe8] sm:$0xff] }
 0x83c   : > { %4082 = vadd.xlane.f32.xlu1 %v4081_v48  ;;  %v4078_v4 = vsel %vm613_vm0, %v4070_v51, 0.0  ;;  %v4052_v60 = vadd.f32 %v8757_v19, %v4051_v32  ;;  %10746 = vmatprep.subr.bf16.mxu1 %v10745_v38  ;;  %v8778_v48 = vld [vmem:[%s14584_s3 + $0xe0] sm:$0xff] }
 0x83d   : > { %4079 = vadd.xlane.f32.xlu0 %v4078_v4  ;;  %v4073_v44 = vadd.f32 %v4057_v52, %v12530_v8  ;;  %10748 = vmatpush3.bf16.msra.mxu1 %v10745_v38  ;;  %v10757_v52 = vpack.c.bf16 %v8779_v22, %v8778_v48  ;;  %v8812_v48 = vld [vmem:[%s14545_s4 + $0xb0] sm:$0xff] }
 0x83e   : > { %v4072_v0 = vadd.f32 %v4052_v60, %v12527_v46  ;;  %v10034_v55 = vpop.f32.mrb[74].mxu1 }
 0x83f   : > { %v4087_v3 = vsel %vm613_vm0, %v4073_v44, 0.0  ;;  %v4067_v28 = vadd.f32 %v10034_v55, %v8757_v19  ;;  %v4061_v36 = vpop.f32.mrb[75].mxu1  ;;  %10758 = vmatprep.subr.bf16.mxu1 %v10757_v52 }
 0x840   : > { %4088 = vadd.xlane.f32.xlu1 %v4087_v3  ;;  %v4084_v58 = vsel %vm613_vm0, %v4072_v0, 0.0  ;;  %v4062_v37 = vadd.f32 %v8757_v19, %v4061_v36  ;;  %v8769_v19 = vld [vmem:[%s14584_s3 + $0x98] sm:$0xff] }
 0x841   : > { %4085 = vadd.xlane.f32.xlu0 %v4084_v58  ;;  %v4075_v2 = vadd.f32 %v4067_v28, %v12538_v20  ;;  %v10737_v16 = vpack.c.bf16 %v8769_v19, %v8768_v12 }
 0x842   : > { %v4074_v57 = vadd.f32 %v4062_v37, %v12536_v14 }
 0x843   : > { %v4093_v11 = vsel %vm613_vm0, %v4075_v2, 0.0  ;;  %10738 = vmatprep.subr.bf16.mxu0 %v10737_v16 }
 0x844   : > { %4094 = vadd.xlane.f32.xlu1 %v4093_v11  ;;  %v4090_v8 = vsel %vm613_vm0, %v4074_v57, 0.0  ;;  %10740 = vmatpush3.bf16.msra.mxu0 %v10737_v16 }
 0x845   : > { %4091 = vadd.xlane.f32.xlu0 %v4090_v8 }
 0x8c9   : > { %v4083_v46 = vpop.xlane.xlu1 %4082 }
 0x8ca   : > { %v4097_v54 = vmul.f32 0.03125, %v4083_v46  ;;  %v4080_v13 = vpop.xlane.xlu0 %4079 }
 0x8cb   : > { %v4096_v45 = vmul.f32 0.03125, %v4080_v13 }
 0x8cc   : > { %v12678_v15 = vsub.f32 %v4071_v26, %v4097_v54  ;;  %v8774_v26 = vld [vmem:[%s14584_s3 + $0xc0] sm:$0xff] }
 0x8cd   : > { %v12680_v6 = vsub.f32 %v4070_v51, %v4096_v45  ;;  %v4089_v20 = vpop.xlane.xlu1 %4088  ;;  %v8775_v51 = vld [vmem:[%s14584_s3 + $0xc8] sm:$0xff]  ;;  %v8764_v45 = vld [vmem:[%s14554_s13] ss:$0 sm:$0xff] }
 0x8ce   : > { %v4109_v39 = vmul.f32 %v12678_v15, %v12678_v15  ;;  %v4099_v47 = vmul.f32 0.03125, %v4089_v20  ;;  %v4086_v43 = vpop.xlane.xlu0 %4085  ;;  %v10749_v4 = vpack.c.bf16 %v8775_v51, %v8774_v26  ;;  %v8808_v26 = vld [vmem:[%s14545_s4 + $0x90] sm:$0xff]  ;;  %v8809_v51 = vld [vmem:[%s14545_s4 + $0x98] sm:$0xff] }
 0x8cf   : > { %v4108_v14 = vmul.f32 %v12680_v6, %v12680_v6  ;;  %v4098_v23 = vmul.f32 0.03125, %v4086_v43  ;;  %v8765_v43 = vld [vmem:[%s14555_s14] ss:$0 sm:$0xff]  ;;  %v10769_v22 = vpack.c.bf16 %v8809_v51, %v8808_v26 }
 0x8d0   : > { %v4117_v62 = vsel %vm613_vm0, %v4109_v39, 0.0  ;;  %v12688_v42 = vsub.f32 %v4073_v44, %v4099_v47  ;;  %10750 = vmatprep.subr.bf16.mxu0 %v10749_v4 }
 0x8d1   : > { %4118 = vadd.xlane.f32.xlu1 %v4117_v62  ;;  %v4114_v25 = vsel %vm613_vm0, %v4108_v14, 0.0  ;;  %v12690_v31 = vsub.f32 %v4072_v0, %v4098_v23  ;;  %v4095_v30 = vpop.xlane.xlu1 %4094  ;;  %v8776_v23 = vld [vmem:[%s14584_s3 + $0xd0] sm:$0xff] }
 0x8d2   : > { %4115 = vadd.xlane.f32.xlu0 %v4114_v25  ;;  %v4111_v40 = vmul.f32 %v12688_v42, %v12688_v42  ;;  %v4101_v33 = vmul.f32 0.03125, %v4095_v30  ;;  %v4092_v63 = vpop.xlane.xlu0 %4091 }
 0x8d3   : > { %v4110_v27 = vmul.f32 %v12690_v31, %v12690_v31  ;;  %v4100_v5 = vmul.f32 0.03125, %v4092_v63 }
 0x8d4   : > { %v4123_v35 = vsel %vm613_vm0, %v4111_v40, 0.0  ;;  %v12697_v29 = vsub.f32 %v4075_v2, %v4101_v33  ;;  %v8777_v40 = vld [vmem:[%s14584_s3 + $0xd8] sm:$0xff] }
 0x8d5   : > { %4124 = vadd.xlane.f32.xlu1 %v4123_v35  ;;  %v4120_v21 = vsel %vm613_vm0, %v4110_v27, 0.0  ;;  %v12700_v56 = vsub.f32 %v4074_v57, %v4100_v5  ;;  %v10753_v5 = vpack.c.bf16 %v8777_v40, %v8776_v23  ;;  %v8855_v23 = vld [vmem:[%s14546_s5 + $0xc8] sm:$0xff] }
 0x8d6   : > { %4121 = vadd.xlane.f32.xlu0 %v4120_v21  ;;  %v4113_v24 = vmul.f32 %v12697_v29, %v12697_v29  ;;  %v8859_v40 = vld [vmem:[%s14546_s5 + $0xe8] sm:$0xff] }
 0x8d7   : > { %v4112_v49 = vmul.f32 %v12700_v56, %v12700_v56 }
 0x8d8   : > { %v4129_v1 = vsel %vm613_vm0, %v4113_v24, 0.0 }
 0x8d9   : > { %4130 = vadd.xlane.f32.xlu1 %v4129_v1  ;;  %v4126_v17 = vsel %vm613_vm0, %v4112_v49, 0.0  ;;  %v8806_v1 = vld [vmem:[%s14545_s4 + $0x80] sm:$0xff] }
 0x8da   : > { %4127 = vadd.xlane.f32.xlu0 %v4126_v17 }
 0x95e   : > { %v4119_v32 = vpop.xlane.xlu1 %4118 }
 0x95f   : > { %v4133_v60 = vmul.f32 0.03125, %v4119_v32  ;;  %v4116_v44 = vpop.xlane.xlu0 %4115  ;;  %v8814_v32 = vld [vmem:[%s14545_s4 + $0xc0] sm:$0xff] }
 0x960   : > { %v4132_v0 = vmul.f32 0.03125, %v4116_v44  ;;  %v8818_v44 = vld [vmem:[%s14545_s4 + $0xe0] sm:$0xff] }
 0x961   : > { %v4139_v55 = vadd.f32 1e-06, %v4133_v60  ;;  %v8815_v60 = vld [vmem:[%s14545_s4 + $0xc8] sm:$0xff] }
 0x962   : > { %v4138_v3 = vadd.f32 1e-06, %v4132_v0  ;;  %v4125_v28 = vpop.xlane.xlu1 %4124  ;;  %v8819_v0 = vld [vmem:[%s14545_s4 + $0xe8] sm:$0xff] }
 0x963   : > { %11203 = vrsqrt.f32 %v4139_v55  ;;  %v4135_v36 = vmul.f32 0.03125, %v4125_v28  ;;  %v4122_v58 = vpop.xlane.xlu0 %4121  ;;  %v10781_v55 = vpack.c.bf16 %v8815_v60, %v8814_v32  ;;  %v8816_v28 = vld [vmem:[%s14545_s4 + $0xd0] sm:$0xff] }
 0x964   : > { %11205 = vrsqrt.f32 %v4138_v3  ;;  %v4134_v37 = vmul.f32 0.03125, %v4122_v58  ;;  %v10789_v3 = vpack.c.bf16 %v8819_v0, %v8818_v44  ;;  %v8820_v58 = vld [vmem:[%s14545_s4 + $0xf0] sm:$0xff] }
 0x965   : > { %v4141_v2 = vadd.f32 1e-06, %v4135_v36  ;;  %v8817_v36 = vld [vmem:[%s14545_s4 + $0xd8] sm:$0xff] }
 0x966   : > { %v4140_v57 = vadd.f32 1e-06, %v4134_v37  ;;  %v4131_v11 = vpop.xlane.xlu1 %4130  ;;  %v8821_v37 = vld [vmem:[%s14545_s4 + $0xf8] sm:$0xff] }
 0x967   : > { %11207 = vrsqrt.f32 %v4141_v2  ;;  %v4137_v8 = vmul.f32 0.03125, %v4131_v11  ;;  %v4128_v46 = vpop.xlane.xlu0 %4127  ;;  %v10785_v2 = vpack.c.bf16 %v8817_v36, %v8816_v28  ;;  %v8846_v11 = vld [vmem:[%s14546_s5 + $0x80] sm:$0xff] }
 0x968   : > { %11209 = vrsqrt.f32 %v4140_v57  ;;  %v4136_v54 = vmul.f32 0.03125, %v4128_v46  ;;  %v10793_v57 = vpack.c.bf16 %v8821_v37, %v8820_v58  ;;  %v8850_v46 = vld [vmem:[%s14546_s5 + $0xa0] sm:$0xff] }
 0x969   : > { %v4143_v39 = vadd.f32 1e-06, %v4137_v8  ;;  %v8847_v8 = vld [vmem:[%s14546_s5 + $0x88] sm:$0xff] }
 0x96a   : > { %v4142_v62 = vadd.f32 1e-06, %v4136_v54  ;;  %v8851_v54 = vld [vmem:[%s14546_s5 + $0xa8] sm:$0xff] }
 0x96b   : > { %11211 = vrsqrt.f32 %v4143_v39  ;;  %v8848_v39 = vld [vmem:[%s14546_s5 + $0x90] sm:$0xff] }
 0x96c   : > { %11213 = vrsqrt.f32 %v4142_v62  ;;  %v8853_v62 = vld [vmem:[%s14546_s5 + $0xb8] sm:$0xff] }
 0x96d   : > { %v11204_v13 = vpop.eup %11203 }
 0x96e   : > { %v11206_v14 = vpop.eup %11205  ;;  %v4151_v20 = vmul.f32 %v11204_v13, %v12678_v15  ;;  %v8780_v15 = vld [vmem:[%s14584_s3 + $0xf0] sm:$0xff]  ;;  %v10797_v13 = vpack.c.bf16 %v8847_v8, %v8846_v11 }
 0x96f   : > { %v4150_v47 = vmul.f32 %v11206_v14, %v12680_v6  ;;  %v8781_v6 = vld [vmem:[%s14584_s3 + $0xf8] sm:$0xff] }
 0x970   : > { %v4163_v25 = vmul.f32 %v8764_v45, %v4151_v20  ;;  %v10761_v35 = vpack.c.bf16 %v8781_v6, %v8780_v15  ;;  %v8849_v14 = vld [vmem:[%s14546_s5 + $0x98] sm:$0xff]  ;;  %v8852_v20 = vld [vmem:[%s14546_s5 + $0xb0] sm:$0xff] }
 0x971   : > { %v4162_v30 = vmul.f32 %v8764_v45, %v4150_v47  ;;  %v11208_v63 = vpop.eup %11207  ;;  %v10801_v47 = vpack.c.bf16 %v8849_v14, %v8848_v39 }
 0x972   : > { %v12766_v27 = vadd.f32 %v8765_v43, %v4163_v25  ;;  %v11210_v21 = vpop.eup %11209  ;;  %v4153_v24 = vmul.f32 %v11208_v63, %v12688_v42  ;;  %v8807_v42 = vld [vmem:[%s14545_s4 + $0x88] sm:$0xff]  ;;  %v8854_v25 = vld [vmem:[%s14546_s5 + $0xc0] sm:$0xff]  ;;  %v8856_v63 = vld [vmem:[%s14546_s5 + $0xd0] sm:$0xff] }
 0x973   : > { %v12764_v33 = vadd.f32 %v8765_v43, %v4162_v30  ;;  %v4152_v49 = vmul.f32 %v11210_v21, %v12690_v31  ;;  %v8810_v31 = vld [vmem:[%s14545_s4 + $0xa0] sm:$0xff]  ;;  %v10765_v12 = vpack.c.bf16 %v8807_v42, %v8806_v1  ;;  %v10813_v15 = vpack.c.bf16 %v8855_v23, %v8854_v25  ;;  %v8861_v21 = vld [vmem:[%s14546_s5 + $0xf8] sm:$0xff] }
 0x974   : > { %v4165_v17 = vmul.f32 %v8764_v45, %v4153_v24  ;;  %v10773_v19 = vpack.c.bf16 %v8811_v9, %v8810_v31  ;;  %v8858_v30 = vld [vmem:[%s14546_s5 + $0xe0] sm:$0xff] }
 0x975   : > { %10043 = vmatprep.mubr.msk.f32.mxu0 %vm613_vm0, %v12764_v33  ;;  %10060 = vmatprep.mubr.msk.f32.mxu1 %vm613_vm0, %v12764_v33  ;;  %v4164_v53 = vmul.f32 %v8764_v45, %v4152_v49  ;;  %v11212_v10 = vpop.eup %11211  ;;  %v10821_v6 = vpack.c.bf16 %v8859_v40, %v8858_v30 }
 0x976   : > { %10044 = vmatmul.mubr.msk.f32.vlgmr.msra.gmra.mrb[80].mxu0 %vm613_vm0, %v12766_v27  ;;  %10061 = vmatmul.mubr.msk.f32.vlgmr.msra.gmra.mrb[76].mxu1 %vm613_vm0, %v12766_v27  ;;  %v11214_v41 = vpop.eup %11213  ;;  %v4155_v50 = vmul.f32 %v11212_v10, %v12697_v29  ;;  %v12793_v61 = vadd.f32 %v8765_v43, %v4165_v17 }
 0x977   : > { %10752 = vmatpush3.bf16.msra.mxu0 %v10749_v4  ;;  %10760 = vmatpush3.bf16.msra.mxu1 %v10757_v52  ;;  %v12790_v34 = vadd.f32 %v8765_v43, %v4164_v53  ;;  %v4154_v16 = vmul.f32 %v11214_v41, %v12700_v56  ;;  %v8813_v4 = vld [vmem:[%s14545_s4 + $0xb8] sm:$0xff] }
 0x978   : > { %10754 = vmatprep.subr.bf16.mxu0 %v10753_v5  ;;  %10762 = vmatprep.subr.bf16.mxu1 %v10761_v35  ;;  %v4167_v18 = vmul.f32 %v8764_v45, %v4155_v50  ;;  %v10777_v52 = vpack.c.bf16 %v8813_v4, %v8812_v48 }
 0x979   : > { %10046 = vmatprep.mubr.msk.f32.mxu0 %vm613_vm0, %v12790_v34  ;;  %10063 = vmatprep.mubr.msk.f32.mxu1 %vm613_vm0, %v12790_v34  ;;  %v4166_v38 = vmul.f32 %v8764_v45, %v4154_v16  ;;  %v10805_v45 = vpack.c.bf16 %v8851_v54, %v8850_v46 }
 0x97a   : > { %10047 = vmatmul.mubr.msk.f32.gmra.mrb[82].mxu0 %vm613_vm0, %v12793_v61  ;;  %10064 = vmatmul.mubr.msk.f32.gmra.mrb[78].mxu1 %vm613_vm0, %v12793_v61  ;;  %v12806_v56 = vadd.f32 %v8765_v43, %v4167_v18 }
 0x97b   : > { %10756 = vmatpush3.bf16.msra.mxu0 %v10753_v5  ;;  %10764 = vmatpush3.bf16.msra.mxu1 %v10761_v35  ;;  %v12804_v29 = vadd.f32 %v8765_v43, %v4166_v38  ;;  %v10809_v43 = vpack.c.bf16 %v8853_v62, %v8852_v20  ;;  %v8857_v5 = vld [vmem:[%s14546_s5 + $0xd8] sm:$0xff]  ;;  %v8860_v35 = vld [vmem:[%s14546_s5 + $0xf0] sm:$0xff] }
 0x97c   : > { %10766 = vmatprep.subr.bf16.mxu0 %v10765_v12  ;;  %10774 = vmatprep.subr.bf16.mxu1 %v10773_v19  ;;  %v10817_v24 = vpack.c.bf16 %v8857_v5, %v8856_v63  ;;  %v10825_v49 = vpack.c.bf16 %v8861_v21, %v8860_v35 }
 0x97d   : > { %10049 = vmatprep.mubr.msk.f32.mxu0 %vm613_vm0, %v12804_v29  ;;  %10066 = vmatprep.mubr.msk.f32.mxu1 %vm613_vm0, %v12804_v29 }
 0x97e   : > { %10050 = vmatmul.mubr.msk.f32.gmra.mrb[84].mxu0 %vm613_vm0, %v12806_v56  ;;  %10067 = vmatmul.mubr.msk.f32.gmra.mrb[80].mxu1 %vm613_vm0, %v12806_v56 }
 0x97f   : > { %10077 = vmatprep.mubr.msk.f32.mxu0 %vm613_vm0, %v12764_v33  ;;  %10094 = vmatprep.mubr.msk.f32.mxu1 %vm613_vm0, %v12764_v33 }
 0x982   : > { %10078 = vmatmul.mubr.msk.f32.vlgmr.msra.gmra.mrb[86].mxu0 %vm613_vm0, %v12766_v27  ;;  %10095 = vmatmul.mubr.msk.f32.vlgmr.msra.gmra.mrb[82].mxu1 %vm613_vm0, %v12766_v27 }
 0x983   : > { %10080 = vmatprep.mubr.msk.f32.mxu0 %vm613_vm0, %v12790_v34  ;;  %10097 = vmatprep.mubr.msk.f32.mxu1 %vm613_vm0, %v12790_v34 }
 0x984   : > { %10768 = vmatpush3.bf16.msra.mxu0 %v10765_v12  ;;  %10776 = vmatpush3.bf16.msra.mxu1 %v10773_v19 }
 0x985   : > { %10770 = vmatprep.subr.bf16.mxu0 %v10769_v22  ;;  %10778 = vmatprep.subr.bf16.mxu1 %v10777_v52 }
 0x986   : > { %10081 = vmatmul.mubr.msk.f32.gmra.mrb[88].mxu0 %vm613_vm0, %v12793_v61  ;;  %10098 = vmatmul.mubr.msk.f32.gmra.mrb[84].mxu1 %vm613_vm0, %v12793_v61 }
 0x987   : > { %10083 = vmatprep.mubr.msk.f32.mxu0 %vm613_vm0, %v12804_v29  ;;  %10100 = vmatprep.mubr.msk.f32.mxu1 %vm613_vm0, %v12804_v29 }
 0x988   : > { %10772 = vmatpush3.bf16.msra.mxu0 %v10769_v22  ;;  %10780 = vmatpush3.bf16.msra.mxu1 %v10777_v52 }
 0x989   : > { %10782 = vmatprep.subr.bf16.mxu0 %v10781_v55  ;;  %10790 = vmatprep.subr.bf16.mxu1 %v10789_v3 }
 0x98a   : > { %10084 = vmatmul.mubr.msk.f32.gmra.mrb[90].mxu0 %vm613_vm0, %v12806_v56  ;;  %10101 = vmatmul.mubr.msk.f32.gmra.mrb[86].mxu1 %vm613_vm0, %v12806_v56 }
 0x98b   : > { %10111 = vmatprep.mubr.msk.f32.mxu0 %vm613_vm0, %v12764_v33  ;;  %10128 = vmatprep.mubr.msk.f32.mxu1 %vm613_vm0, %v12764_v33 }
 0x98e   : > { %10112 = vmatmul.mubr.msk.f32.vlgmr.msra.gmra.mrb[92].mxu0 %vm613_vm0, %v12766_v27  ;;  %10129 = vmatmul.mubr.msk.f32.vlgmr.msra.gmra.mrb[88].mxu1 %vm613_vm0, %v12766_v27 }
 0x98f   : > { %10114 = vmatprep.mubr.msk.f32.mxu0 %vm613_vm0, %v12790_v34  ;;  %10131 = vmatprep.mubr.msk.f32.mxu1 %vm613_vm0, %v12790_v34 }
 0x990   : > { %10784 = vmatpush3.bf16.msra.mxu0 %v10781_v55  ;;  %10792 = vmatpush3.bf16.msra.mxu1 %v10789_v3 }
 0x991   : > { %10786 = vmatprep.subr.bf16.mxu0 %v10785_v2  ;;  %10794 = vmatprep.subr.bf16.mxu1 %v10793_v57 }
 0x992   : > { %10115 = vmatmul.mubr.msk.f32.gmra.mrb[94].mxu0 %vm613_vm0, %v12793_v61  ;;  %10132 = vmatmul.mubr.msk.f32.gmra.mrb[90].mxu1 %vm613_vm0, %v12793_v61 }
 0x993   : > { %10117 = vmatprep.mubr.msk.f32.mxu0 %vm613_vm0, %v12804_v29  ;;  %10134 = vmatprep.mubr.msk.f32.mxu1 %vm613_vm0, %v12804_v29 }
 0x994   : > { %10788 = vmatpush3.bf16.msra.mxu0 %v10785_v2  ;;  %10796 = vmatpush3.bf16.msra.mxu1 %v10793_v57 }
 0x995   : > { %10798 = vmatprep.subr.bf16.mxu0 %v10797_v13  ;;  %10806 = vmatprep.subr.bf16.mxu1 %v10805_v45 }
 0x996   : > { %10118 = vmatmul.mubr.msk.f32.gmra.mrb[96].mxu0 %vm613_vm0, %v12806_v56  ;;  %10135 = vmatmul.mubr.msk.f32.gmra.mrb[92].mxu1 %vm613_vm0, %v12806_v56 }
 0x997   : > { %10145 = vmatprep.mubr.msk.f32.mxu0 %vm613_vm0, %v12764_v33  ;;  %10162 = vmatprep.mubr.msk.f32.mxu1 %vm613_vm0, %v12764_v33 }
 0x99a   : > { %10146 = vmatmul.mubr.msk.f32.vlgmr.msra.gmra.mrb[98].mxu0 %vm613_vm0, %v12766_v27  ;;  %10163 = vmatmul.mubr.msk.f32.vlgmr.msra.gmra.mrb[94].mxu1 %vm613_vm0, %v12766_v27 }
 0x99b   : > { %10148 = vmatprep.mubr.msk.f32.mxu0 %vm613_vm0, %v12790_v34  ;;  %10165 = vmatprep.mubr.msk.f32.mxu1 %vm613_vm0, %v12790_v34 }
 0x99c   : > { %10800 = vmatpush3.bf16.msra.mxu0 %v10797_v13  ;;  %10808 = vmatpush3.bf16.msra.mxu1 %v10805_v45 }
 0x99d   : > { %10802 = vmatprep.subr.bf16.mxu0 %v10801_v47  ;;  %10810 = vmatprep.subr.bf16.mxu1 %v10809_v43 }
 0x99e   : > { %10149 = vmatmul.mubr.msk.f32.gmra.mrb[100].mxu0 %vm613_vm0, %v12793_v61  ;;  %10166 = vmatmul.mubr.msk.f32.gmra.mrb[96].mxu1 %vm613_vm0, %v12793_v61 }
 0x99f   : > { %10151 = vmatprep.mubr.msk.f32.mxu0 %vm613_vm0, %v12804_v29  ;;  %10168 = vmatprep.mubr.msk.f32.mxu1 %vm613_vm0, %v12804_v29 }
 0x9a0   : > { %10804 = vmatpush3.bf16.msra.mxu0 %v10801_v47  ;;  %10812 = vmatpush3.bf16.msra.mxu1 %v10809_v43 }
 0x9a1   : > { %10814 = vmatprep.subr.bf16.mxu0 %v10813_v15  ;;  %10822 = vmatprep.subr.bf16.mxu1 %v10821_v6 }
 0x9a2   : > { %10152 = vmatmul.mubr.msk.f32.gmra.mrb[102].mxu0 %vm613_vm0, %v12806_v56  ;;  %10169 = vmatmul.mubr.msk.f32.gmra.mrb[98].mxu1 %vm613_vm0, %v12806_v56 }
 0x9a3   : > { %10179 = vmatprep.mubr.msk.f32.mxu0 %vm613_vm0, %v12764_v33  ;;  %10196 = vmatprep.mubr.msk.f32.mxu1 %vm613_vm0, %v12764_v33 }
 0x9a6   : > { %10180 = vmatmul.mubr.msk.f32.vlgmr.msra.gmra.mrb[104].mxu0 %vm613_vm0, %v12766_v27  ;;  %10197 = vmatmul.mubr.msk.f32.vlgmr.msra.gmra.mrb[100].mxu1 %vm613_vm0, %v12766_v27 }
 0x9a7   : > { %10182 = vmatprep.mubr.msk.f32.mxu0 %vm613_vm0, %v12790_v34  ;;  %10199 = vmatprep.mubr.msk.f32.mxu1 %vm613_vm0, %v12790_v34 }
 0x9a8   : > { %10816 = vmatpush3.bf16.msra.mxu0 %v10813_v15  ;;  %10824 = vmatpush3.bf16.msra.mxu1 %v10821_v6 }
 0x9a9   : > { %10818 = vmatprep.subr.bf16.mxu0 %v10817_v24  ;;  %10826 = vmatprep.subr.bf16.mxu1 %v10825_v49 }
 0x9aa   : > { %10183 = vmatmul.mubr.msk.f32.gmra.mrb[106].mxu0 %vm613_vm0, %v12793_v61  ;;  %10200 = vmatmul.mubr.msk.f32.gmra.mrb[102].mxu1 %vm613_vm0, %v12793_v61 }
 0x9ab   : > { %10185 = vmatprep.mubr.msk.f32.mxu0 %vm613_vm0, %v12804_v29  ;;  %10202 = vmatprep.mubr.msk.f32.mxu1 %vm613_vm0, %v12804_v29 }
 0x9ac   : > { %10820 = vmatpush3.bf16.msra.mxu0 %v10817_v24  ;;  %10828 = vmatpush3.bf16.msra.mxu1 %v10825_v49 }
 0x9ae   : > { %10186 = vmatmul.mubr.msk.f32.gmra.mrb[108].mxu0 %vm613_vm0, %v12806_v56  ;;  %10203 = vmatmul.mubr.msk.f32.gmra.mrb[104].mxu1 %vm613_vm0, %v12806_v56 }
 0x9af   : > { %10213 = vmatprep.mubr.msk.f32.mxu0 %vm613_vm0, %v12764_v33  ;;  %10230 = vmatprep.mubr.msk.f32.mxu1 %vm613_vm0, %v12764_v33 }
 0x9b2   : > { %10214 = vmatmul.mubr.msk.f32.vlgmr.msra.gmra.mrb[110].mxu0 %vm613_vm0, %v12766_v27  ;;  %10231 = vmatmul.mubr.msk.f32.vlgmr.msra.gmra.mrb[106].mxu1 %vm613_vm0, %v12766_v27 }
 0x9b3   : > { %10216 = vmatprep.mubr.msk.f32.mxu0 %vm613_vm0, %v12790_v34  ;;  %10233 = vmatprep.mubr.msk.f32.mxu1 %vm613_vm0, %v12790_v34 }
 0x9b6   : > { %10217 = vmatmul.mubr.msk.f32.gmra.mrb[112].mxu0 %vm613_vm0, %v12793_v61  ;;  %10234 = vmatmul.mubr.msk.f32.gmra.mrb[108].mxu1 %vm613_vm0, %v12793_v61 }
 0x9b7   : > { %10219 = vmatprep.mubr.msk.f32.mxu0 %vm613_vm0, %v12804_v29  ;;  %10236 = vmatprep.mubr.msk.f32.mxu1 %vm613_vm0, %v12804_v29 }
 0x9ba   : > { %10220 = vmatmul.mubr.msk.f32.gmra.mrb[114].mxu0 %vm613_vm0, %v12806_v56  ;;  %10237 = vmatmul.mubr.msk.f32.gmra.mrb[110].mxu1 %vm613_vm0, %v12806_v56 }
 0xa49   : > { %v13020_v1 = vpop.f32.mrb[80].mxu0  ;;  %v13022_v17 = vpop.f32.mrb[76].mxu1 }
 0xa4a   : > { %v4281_v42 = vpop.f32.mrb[81].mxu0  ;;  %v4376_v31 = vpop.f32.mrb[77].mxu1 }
 0xa4b   : > { %10251 = vmatprep.mubr.msk.f32.mxu0 %vm1804_vm1, %v4281_v42  ;;  %10272 = vmatprep.mubr.msk.f32.mxu1 %vm1804_vm1, %v4376_v31 }
 0xa4d   : > { %v13026_v9 = vpop.f32.mrb[82].mxu0  ;;  %v13028_v53 = vpop.f32.mrb[78].mxu1 }
 0xa4e   : > { %v13030_v10 = vpop.f32.mrb[83].mxu0  ;;  %v13032_v41 = vpop.f32.mrb[79].mxu1 }
 0xa51   : > { %v13034_v50 = vpop.f32.mrb[84].mxu0  ;;  %v13036_v12 = vpop.f32.mrb[80].mxu1 }
 0xa52   : > { %v13038_v19 = vpop.f32.mrb[85].mxu0  ;;  %v13040_v16 = vpop.f32.mrb[81].mxu1 }
 0xa55   : > { %v13042_v18 = vpop.f32.mrb[86].mxu0  ;;  %v13044_v38 = vpop.f32.mrb[82].mxu1 }
 0xa56   : > { %v13046_v26 = vpop.f32.mrb[87].mxu0  ;;  %v13048_v51 = vpop.f32.mrb[83].mxu1 }
 0xa59   : > { %v13050_v48 = vpop.f32.mrb[88].mxu0  ;;  %v13052_v4 = vpop.f32.mrb[84].mxu1 }
 0xa5a   : > { %v13054_v22 = vpop.f32.mrb[89].mxu0  ;;  %v13056_v52 = vpop.f32.mrb[85].mxu1 }
 0xa5d   : > { %v13058_v32 = vpop.f32.mrb[90].mxu0  ;;  %v13060_v60 = vpop.f32.mrb[86].mxu1 }
 0xa5e   : > { %v13062_v44 = vpop.f32.mrb[91].mxu0  ;;  %v13064_v0 = vpop.f32.mrb[87].mxu1 }
 0xa61   : > { %v10113_v55 = vpop.f32.mrb[92].mxu0  ;;  %v10130_v3 = vpop.f32.mrb[88].mxu1 }
 0xa62   : > { %v4678_v28 = vpop.f32.mrb[93].mxu0  ;;  %v4773_v36 = vpop.f32.mrb[89].mxu1 }
 0xa63   : > { %v10829_v58 = vpack.c.bf16 %v10113_v55, %v4678_v28  ;;  %v10847_v37 = vpack.c.bf16 %v10130_v3, %v4773_v36 }
 0xa65   : > { %v10116_v2 = vpop.f32.mrb[94].mxu0  ;;  %v10133_v57 = vpop.f32.mrb[90].mxu1  ;;  %10831 = vmatprep.subr.msk.bf16.mxu0 %vm11962_vm2, %v10829_v58  ;;  %10849 = vmatprep.subr.msk.bf16.mxu1 %vm11962_vm2, %v10847_v37 }
 0xa66   : > { %v4688_v11 = vpop.f32.mrb[95].mxu0  ;;  %v4783_v8 = vpop.f32.mrb[91].mxu1  ;;  %10834 = vmatpush3.bf16.xpose.msk.msra.mxu0 %vm11962_vm2, %v10829_v58  ;;  %10852 = vmatpush3.bf16.xpose.msk.msra.mxu1 %vm11962_vm2, %v10847_v37 }
 0xa67   : > { %v10835_v46 = vpack.c.bf16 %v10116_v2, %v4688_v11  ;;  %v10853_v54 = vpack.c.bf16 %v10133_v57, %v4783_v8 }
 0xa69   : > { %v10119_v13 = vpop.f32.mrb[96].mxu0  ;;  %v10136_v45 = vpop.f32.mrb[92].mxu1  ;;  %10837 = vmatprep.subr.msk.bf16.mxu0 %vm11962_vm2, %v10835_v46  ;;  %10855 = vmatprep.subr.msk.bf16.mxu1 %vm11962_vm2, %v10853_v54 }
 0xa6a   : > { %v4698_v39 = vpop.f32.mrb[97].mxu0  ;;  %v4793_v14 = vpop.f32.mrb[93].mxu1 }
 0xa6b   : > { %v10841_v20 = vpack.c.bf16 %v10119_v13, %v4698_v39  ;;  %v10859_v62 = vpack.c.bf16 %v10136_v45, %v4793_v14 }
 0xa6d   : > { %v10147_v47 = vpop.f32.mrb[98].mxu0  ;;  %v10164_v43 = vpop.f32.mrb[94].mxu1 }
 0xa6e   : > { %v4868_v25 = vpop.f32.mrb[99].mxu0  ;;  %v4963_v23 = vpop.f32.mrb[95].mxu1  ;;  %10840 = vmatpush3.bf16.xpose.msk.msra.mxu0 %vm11962_vm2, %v10835_v46  ;;  %10858 = vmatpush3.bf16.xpose.msk.msra.mxu1 %vm11962_vm2, %v10853_v54 }
 0xa6f   : > { %v10865_v30 = vpack.c.bf16 %v10147_v47, %v4868_v25  ;;  %v10883_v40 = vpack.c.bf16 %v10164_v43, %v4963_v23  ;;  %10843 = vmatprep.subr.msk.bf16.mxu0 %vm11962_vm2, %v10841_v20  ;;  %10861 = vmatprep.subr.msk.bf16.mxu1 %vm11962_vm2, %v10859_v62 }
 0xa71   : > { %v10150_v15 = vpop.f32.mrb[100].mxu0  ;;  %v10167_v6 = vpop.f32.mrb[96].mxu1 }
 0xa72   : > { %v4878_v63 = vpop.f32.mrb[101].mxu0  ;;  %v4973_v5 = vpop.f32.mrb[97].mxu1 }
 0xa73   : > { %v10871_v35 = vpack.c.bf16 %v10150_v15, %v4878_v63  ;;  %v10889_v21 = vpack.c.bf16 %v10167_v6, %v4973_v5 }
 0xa75   : > { %v10153_v24 = vpop.f32.mrb[102].mxu0  ;;  %v10170_v49 = vpop.f32.mrb[98].mxu1 }
 0xa76   : > { %v4888_v42 = vpop.f32.mrb[103].mxu0  ;;  %v4983_v31 = vpop.f32.mrb[99].mxu1  ;;  %10846 = vmatpush3.bf16.xpose.msk.msra.mxu0 %vm11962_vm2, %v10841_v20  ;;  %10864 = vmatpush3.bf16.xpose.msk.msra.mxu1 %vm11962_vm2, %v10859_v62 }
 0xa77   : > { %v10877_v55 = vpack.c.bf16 %v10153_v24, %v4888_v42  ;;  %v10895_v3 = vpack.c.bf16 %v10170_v49, %v4983_v31  ;;  %10867 = vmatprep.subr.msk.bf16.mxu0 %vm11962_vm2, %v10865_v30  ;;  %10885 = vmatprep.subr.msk.bf16.mxu1 %vm11962_vm2, %v10883_v40  ;;  %v11367_v49 = vld [vmem:[%s14591_s24 + $0x18] sm:$0xff] }
 0xa79   : > { %v10181_v28 = vpop.f32.mrb[104].mxu0  ;;  %v10198_v36 = vpop.f32.mrb[100].mxu1 }
 0xa7a   : > { %v5075_v58 = vpop.f32.mrb[105].mxu0  ;;  %v5170_v37 = vpop.f32.mrb[101].mxu1 }
 0xa7b   : > { %v10901_v2 = vpack.c.bf16 %v10181_v28, %v5075_v58  ;;  %v10913_v57 = vpack.c.bf16 %v10198_v36, %v5170_v37 }
 0xa7d   : > { %v10184_v11 = vpop.f32.mrb[106].mxu0  ;;  %v10201_v8 = vpop.f32.mrb[102].mxu1  ;;  %10252 = vmatmul.mubr.msk.f32.vlgmr.msra.gmra.mrb[116].mxu0 %vm1804_vm1, %v13020_v1  ;;  %10273 = vmatmul.mubr.msk.f32.vlgmr.msra.gmra.mrb[112].mxu1 %vm1804_vm1, %v13022_v17 }
 0xa7e   : > { %v5085_v46 = vpop.f32.mrb[107].mxu0  ;;  %v5180_v54 = vpop.f32.mrb[103].mxu1  ;;  %10254 = vmatprep.mubr.msk.f32.mxu0 %vm1804_vm1, %v13030_v10  ;;  %10275 = vmatprep.mubr.msk.f32.mxu1 %vm1804_vm1, %v13032_v41 }
 0xa7f   : > { %v10905_v13 = vpack.c.bf16 %v10184_v11, %v5085_v46  ;;  %v10917_v45 = vpack.c.bf16 %v10201_v8, %v5180_v54  ;;  %10870 = vmatpush3.bf16.xpose.msk.msra.mxu0 %vm11962_vm2, %v10865_v30  ;;  %10888 = vmatpush3.bf16.xpose.msk.msra.mxu1 %vm11962_vm2, %v10883_v40  ;;  %v11369_v54 = vld [vmem:[%s14591_s24 + $0x28] sm:$0xff] }
 0xa80   : > { %10873 = vmatprep.subr.msk.bf16.mxu0 %vm11962_vm2, %v10871_v35  ;;  %10891 = vmatprep.subr.msk.bf16.mxu1 %vm11962_vm2, %v10889_v21 }
 0xa81   : > { %v10187_v1 = vpop.f32.mrb[108].mxu0  ;;  %v10204_v17 = vpop.f32.mrb[104].mxu1  ;;  %10255 = vmatmul.mubr.msk.f32.gmra.mrb[118].mxu0 %vm1804_vm1, %v13026_v9  ;;  %10276 = vmatmul.mubr.msk.f32.gmra.mrb[114].mxu1 %vm1804_vm1, %v13028_v53 }
 0xa82   : > { %v5095_v10 = vpop.f32.mrb[109].mxu0  ;;  %v5190_v41 = vpop.f32.mrb[105].mxu1  ;;  %10257 = vmatprep.mubr.msk.f32.mxu0 %vm1804_vm1, %v13038_v19  ;;  %10278 = vmatprep.mubr.msk.f32.mxu1 %vm1804_vm1, %v13040_v16 }
 0xa83   : > { %v10909_v39 = vpack.c.bf16 %v10187_v1, %v5095_v10  ;;  %v10921_v14 = vpack.c.bf16 %v10204_v17, %v5190_v41  ;;  %v11370_v1 = vld [vmem:[%s14591_s24 + $0x20] sm:$0xff] }
 0xa85   : > { %v10215_v20 = vpop.f32.mrb[110].mxu0  ;;  %v10232_v62 = vpop.f32.mrb[106].mxu1  ;;  %10258 = vmatmul.mubr.msk.f32.gmra.mrb[120].mxu0 %vm1804_vm1, %v13034_v50  ;;  %10279 = vmatmul.mubr.msk.f32.gmra.mrb[116].mxu1 %vm1804_vm1, %v13036_v12 }
 0xa86   : > { %v5265_v9 = vpop.f32.mrb[111].mxu0  ;;  %v5360_v53 = vpop.f32.mrb[107].mxu1  ;;  %10293 = vmatprep.mubr.msk.f32.mxu0 %vm1804_vm1, %v13046_v26  ;;  %10314 = vmatprep.mubr.msk.f32.mxu1 %vm1804_vm1, %v13048_v51 }
 0xa87   : > { %v13126_v19 = vpack.c.bf16 %v10215_v20, %v5265_v9  ;;  %v13128_v16 = vpack.c.bf16 %v10232_v62, %v5360_v53  ;;  %10876 = vmatpush3.bf16.xpose.msk.msra.mxu0 %vm11962_vm2, %v10871_v35  ;;  %10894 = vmatpush3.bf16.xpose.msk.msra.mxu1 %vm11962_vm2, %v10889_v21 }
 0xa88   : > { %10879 = vmatprep.subr.msk.bf16.mxu0 %vm11962_vm2, %v10877_v55  ;;  %10897 = vmatprep.subr.msk.bf16.mxu1 %vm11962_vm2, %v10895_v3 }
 0xa89   : > { %v10218_v50 = vpop.f32.mrb[112].mxu0  ;;  %v10235_v12 = vpop.f32.mrb[108].mxu1 }
 0xa8a   : > { %v5275_v26 = vpop.f32.mrb[113].mxu0  ;;  %v5370_v51 = vpop.f32.mrb[109].mxu1 }
 0xa8b   : > { %v13138_v47 = vpack.c.bf16 %v10218_v50, %v5275_v26  ;;  %v13140_v43 = vpack.c.bf16 %v10235_v12, %v5370_v51 }
 0xa8d   : > { %v10221_v25 = vpop.f32.mrb[114].mxu0  ;;  %v10238_v23 = vpop.f32.mrb[110].mxu1 }
 0xa8e   : > { %v5285_v30 = vpop.f32.mrb[115].mxu0  ;;  %v5380_v40 = vpop.f32.mrb[111].mxu1 }
 0xa8f   : > { %v13142_v15 = vpack.c.bf16 %v10221_v25, %v5285_v30  ;;  %v13144_v6 = vpack.c.bf16 %v10238_v23, %v5380_v40  ;;  %10882 = vmatpush3.bf16.xpose.msk.msra.mxu0 %vm11962_vm2, %v10877_v55  ;;  %10900 = vmatpush3.bf16.xpose.msk.msra.mxu1 %vm11962_vm2, %v10895_v3  ;;  %v11368_v55 = vld [vmem:[%s14591_s24 + $0x10] sm:$0xff] }
 0xa90   : > { %10902 = vmatprep.subr.bf16.mxu0 %v10901_v2  ;;  %10914 = vmatprep.subr.bf16.mxu1 %v10913_v57 }
 0xa96   : > { %10294 = vmatmul.mubr.msk.f32.vlgmr.msra.gmra.mrb[122].mxu0 %vm1804_vm1, %v13042_v18  ;;  %10315 = vmatmul.mubr.msk.f32.vlgmr.msra.gmra.mrb[118].mxu1 %vm1804_vm1, %v13044_v38  ;;  %v11365_v38 = vld [vmem:[%s14591_s24 + $0x8] sm:$0xff] }
 0xa97   : > { %10296 = vmatprep.mubr.msk.f32.mxu0 %vm1804_vm1, %v13054_v22  ;;  %10317 = vmatprep.mubr.msk.f32.mxu1 %vm1804_vm1, %v13056_v52  ;;  %v11366_v52 = vld [vmem:[%s14591_s24] sm:$0xff] }
 0xa98   : > { %10904 = vmatpush3.bf16.msra.mxu0 %v10901_v2  ;;  %10916 = vmatpush3.bf16.msra.mxu1 %v10913_v57 }
 0xa99   : > { %10906 = vmatprep.subr.bf16.mxu0 %v10905_v13  ;;  %10918 = vmatprep.subr.bf16.mxu1 %v10917_v45 }
 0xa9a   : > { %10297 = vmatmul.mubr.msk.f32.gmra.mrb[124].mxu0 %vm1804_vm1, %v13050_v48  ;;  %10318 = vmatmul.mubr.msk.f32.gmra.mrb[120].mxu1 %vm1804_vm1, %v13052_v4 }
 0xa9b   : > { %10299 = vmatprep.mubr.msk.f32.mxu0 %vm1804_vm1, %v13062_v44  ;;  %10320 = vmatprep.mubr.msk.f32.mxu1 %vm1804_vm1, %v13064_v0 }
 0xa9c   : > { %10908 = vmatpush3.bf16.msra.mxu0 %v10905_v13  ;;  %10920 = vmatpush3.bf16.msra.mxu1 %v10917_v45 }
 0xa9d   : > { %10910 = vmatprep.subr.bf16.mxu0 %v10909_v39  ;;  %10922 = vmatprep.subr.bf16.mxu1 %v10921_v14 }
 0xa9e   : > { %10300 = vmatmul.mubr.msk.f32.gmra.mrb[126].mxu0 %vm1804_vm1, %v13058_v32  ;;  %10321 = vmatmul.mubr.msk.f32.gmra.mrb[122].mxu1 %vm1804_vm1, %v13060_v60 }
 0xaa0   : > { %10912 = vmatpush3.bf16.msra.mxu0 %v10909_v39  ;;  %10924 = vmatpush3.bf16.msra.mxu1 %v10921_v14 }
 0xaa1   : > { %10926 = vmatprep.subr.bf16.mxu0 %v13126_v19  ;;  %10938 = vmatprep.subr.bf16.mxu1 %v13128_v16 }
 0xb50   : > { %v10253_v59 = vpop.f32.mrb[116].mxu0  ;;  %v10274_v18 = vpop.f32.mrb[112].mxu1 }
 0xb51   : > { %v13175_v48 = vadd.f32 %v11365_v38, %v10253_v59  ;;  %v5491_v4 = vpop.f32.mrb[117].mxu0  ;;  %v5622_v22 = vpop.f32.mrb[113].mxu1  ;;  %v13182_v60 = vadd.f32 %v11365_v38, %v10274_v18 }
 0xb52   : > { %v13180_v32 = vadd.f32 %v11366_v52, %v5491_v4  ;;  %v13186_v0 = vadd.f32 %v11366_v52, %v5622_v22 }
 0xb53   : > { %v5916_v44 = vsel %vm2329_vm3, %v13175_v48, -inf  ;;  %v5934_v31 = vsel %vm2329_vm3, %v13182_v60, -inf }
 0xb54   : > { %v10277_v63 = vpop.f32.mrb[114].mxu1  ;;  %5917 = vmax.xlane.f32.xlu1 %v5916_v44  ;;  %v10256_v5 = vpop.f32.mrb[118].mxu0  ;;  %v5913_v35 = vsel %vm2329_vm3, %v13180_v32, -inf  ;;  %v5931_v58 = vsel %vm2329_vm3, %v13186_v0, -inf }
 0xb55   : > { %v5501_v21 = vpop.f32.mrb[119].mxu0  ;;  %v5632_v24 = vpop.f32.mrb[115].mxu1  ;;  %5914 = vmax.xlane.f32.xlu0 %v5913_v35  ;;  %v13193_v42 = vadd.f32 %v11367_v49, %v10256_v5  ;;  %v13204_v57 = vadd.f32 %v11367_v49, %v10277_v63 }
 0xb56   : > { %v13200_v3 = vadd.f32 %v11368_v55, %v5501_v21  ;;  %v13208_v8 = vadd.f32 %v11368_v55, %v5632_v24 }
 0xb57   : > { %v5922_v11 = vsel %vm2329_vm3, %v13193_v42, -inf  ;;  %v5940_v45 = vsel %vm2329_vm3, %v13204_v57, -inf }
 0xb58   : > { %v10280_v28 = vpop.f32.mrb[116].mxu1  ;;  %5935 = vmax.xlane.f32.xlu1 %v5934_v31  ;;  %v10259_v36 = vpop.f32.mrb[120].mxu0  ;;  %v5919_v46 = vsel %vm2329_vm3, %v13200_v3, -inf  ;;  %v5937_v10 = vsel %vm2329_vm3, %v13208_v8, -inf }
 0xb59   : > { %v5511_v37 = vpop.f32.mrb[121].mxu0  ;;  %v5642_v2 = vpop.f32.mrb[117].mxu1  ;;  %5932 = vmax.xlane.f32.xlu0 %v5931_v58  ;;  %v13215_v13 = vadd.f32 %v11369_v54, %v10259_v36  ;;  %v13226_v41 = vadd.f32 %v11369_v54, %v10280_v28 }
 0xb5a   : > { %v13222_v17 = vadd.f32 %v11370_v1, %v5511_v37  ;;  %v13230_v14 = vadd.f32 %v11370_v1, %v5642_v2 }
 0xb5b   : > { %v5928_v39 = vsel %vm2329_vm3, %v13215_v13, -inf  ;;  %v5946_v62 = vsel %vm2329_vm3, %v13226_v41, -inf }
 0xb5c   : > { %5923 = vmax.xlane.f32.xlu1 %v5922_v11  ;;  %v5925_v20 = vsel %vm2329_vm3, %v13222_v17, -inf  ;;  %v5943_v9 = vsel %vm2329_vm3, %v13230_v14, -inf }
 0xb5d   : > { %5920 = vmax.xlane.f32.xlu0 %v5919_v46 }
 0xb60   : > { %5941 = vmax.xlane.f32.xlu1 %v5940_v45 }
 0xb61   : > { %5938 = vmax.xlane.f32.xlu0 %v5937_v10 }
 0xb64   : > { %5929 = vmax.xlane.f32.xlu1 %v5928_v39 }
 0xb65   : > { %5926 = vmax.xlane.f32.xlu0 %v5925_v20 }
 0xb68   : > { %5947 = vmax.xlane.f32.xlu1 %v5946_v62 }
 0xb69   : > { %v10316_v53 = vpop.f32.mrb[118].mxu1  ;;  %v10295_v50 = vpop.f32.mrb[122].mxu0  ;;  %5944 = vmax.xlane.f32.xlu0 %v5943_v9 }
 0xb6a   : > { %v13238_v12 = vadd.f32 %v11365_v38, %v10295_v50  ;;  %v5753_v26 = vpop.f32.mrb[123].mxu0  ;;  %v5884_v51 = vpop.f32.mrb[119].mxu1  ;;  %v13242_v23 = vadd.f32 %v11365_v38, %v10316_v53 }
 0xb6b   : > { %v13240_v25 = vadd.f32 %v11366_v52, %v5753_v26  ;;  %v13246_v40 = vadd.f32 %v11366_v52, %v5884_v51 }
 0xb6c   : > { %v5952_v30 = vsel %vm2329_vm3, %v13238_v12, -inf  ;;  %v5970_v38 = vsel %vm2329_vm3, %v13242_v23, -inf }
 0xb6d   : > { %v10319_v59 = vpop.f32.mrb[120].mxu1  ;;  %5953 = vmax.xlane.f32.xlu1 %v5952_v30  ;;  %v10298_v18 = vpop.f32.mrb[124].mxu0  ;;  %v5949_v4 = vsel %vm2329_vm3, %v13240_v25, -inf  ;;  %v5967_v21 = vsel %vm2329_vm3, %v13246_v40, -inf }
 0xb6e   : > { %v5763_v22 = vpop.f32.mrb[125].mxu0  ;;  %v5894_v44 = vpop.f32.mrb[121].mxu1  ;;  %5950 = vmax.xlane.f32.xlu0 %v5949_v4  ;;  %v13250_v63 = vadd.f32 %v11367_v49, %v10298_v18  ;;  %v13258_v28 = vadd.f32 %v11367_v49, %v10319_v59 }
 0xb6f   : > { %v13254_v5 = vadd.f32 %v11368_v55, %v5763_v22  ;;  %v13262_v58 = vadd.f32 %v11368_v55, %v5894_v44 }
 0xb70   : > { %v5958_v36 = vsel %vm2329_vm3, %v13250_v63, -inf  ;;  %v5976_v11 = vsel %vm2329_vm3, %v13258_v28, -inf }
 0xb71   : > { %v10322_v35 = vpop.f32.mrb[122].mxu1  ;;  %5971 = vmax.xlane.f32.xlu1 %v5970_v38  ;;  %v10301_v52 = vpop.f32.mrb[126].mxu0  ;;  %v5955_v37 = vsel %vm2329_vm3, %v13254_v5, -inf  ;;  %v5973_v49 = vsel %vm2329_vm3, %v13262_v58, -inf }
 0xb72   : > { %v5773_v24 = vpop.f32.mrb[127].mxu0  ;;  %v5904_v31 = vpop.f32.mrb[123].mxu1  ;;  %5968 = vmax.xlane.f32.xlu0 %v5967_v21  ;;  %v13266_v2 = vadd.f32 %v11369_v54, %v10301_v52  ;;  %v13274_v45 = vadd.f32 %v11369_v54, %v10322_v35 }
 0xb73   : > { %v13270_v46 = vadd.f32 %v11370_v1, %v5773_v24  ;;  %v13278_v10 = vadd.f32 %v11370_v1, %v5904_v31 }
 0xb74   : > { %v5964_v55 = vsel %vm2329_vm3, %v13266_v2, -inf  ;;  %v5982_v20 = vsel %vm2329_vm3, %v13274_v45, -inf }
 0xb75   : > { %5959 = vmax.xlane.f32.xlu1 %v5958_v36  ;;  %v5961_v39 = vsel %vm2329_vm3, %v13270_v46, -inf  ;;  %v5979_v62 = vsel %vm2329_vm3, %v13278_v10, -inf }
 0xb76   : > { %5956 = vmax.xlane.f32.xlu0 %v5955_v37 }
 0xb79   : > { %5977 = vmax.xlane.f32.xlu1 %v5976_v11 }
 0xb7a   : > { %5974 = vmax.xlane.f32.xlu0 %v5973_v49 }
 0xb7d   : > { %5965 = vmax.xlane.f32.xlu1 %v5964_v55 }
 0xb7e   : > { %5962 = vmax.xlane.f32.xlu0 %v5961_v39 }
 0xb81   : > { %5983 = vmax.xlane.f32.xlu1 %v5982_v20 }
 0xb82   : > { %5980 = vmax.xlane.f32.xlu0 %v5979_v62 }
 0xbe1   : > { %v5918_v54 = vpop.xlane.xlu1 %5917 }
 0xbe2   : > { %v5986_v9 = vsub.f32 %v13175_v48, %v5918_v54  ;;  %v5915_v53 = vpop.xlane.xlu0 %5914 }
 0xbe3   : > { %v5985_v1 = vsub.f32 %v13180_v32, %v5915_v53 }
 0xbe4   : > { %v6011_v50 = vmul.f32 1.442695, %v5986_v9 }
 0xbe5   : > { %v6009_v26 = vmul.f32 1.442695, %v5985_v1  ;;  %v5936_v51 = vpop.xlane.xlu1 %5935 }
 0xbe6   : > { %11215 = vpow2.f32 %v6011_v50  ;;  %v5992_v30 = vsub.f32 %v13182_v60, %v5936_v51  ;;  %v5933_v59 = vpop.xlane.xlu0 %5932 }
 0xbe7   : > { %11217 = vpow2.f32 %v6009_v26  ;;  %v5991_v18 = vsub.f32 %v13186_v0, %v5933_v59 }
 0xbe8   : > { %v6023_v4 = vmul.f32 1.442695, %v5992_v30 }
 0xbe9   : > { %v6021_v22 = vmul.f32 1.442695, %v5991_v18  ;;  %v5924_v44 = vpop.xlane.xlu1 %5923 }
 0xbea   : > { %11219 = vpow2.f32 %v6023_v4  ;;  %v5988_v38 = vsub.f32 %v13193_v42, %v5924_v44  ;;  %v5921_v48 = vpop.xlane.xlu0 %5920 }
 0xbeb   : > { %11221 = vpow2.f32 %v6021_v22  ;;  %v5987_v32 = vsub.f32 %v13200_v3, %v5921_v48 }
 0xbec   : > { %v6015_v35 = vmul.f32 1.442695, %v5988_v38 }
 0xbed   : > { %v6013_v52 = vmul.f32 1.442695, %v5987_v32  ;;  %v5942_v21 = vpop.xlane.xlu1 %5941 }
 0xbee   : > { %11223 = vpow2.f32 %v6015_v35  ;;  %v5994_v60 = vsub.f32 %v13204_v57, %v5942_v21  ;;  %v5939_v24 = vpop.xlane.xlu0 %5938 }
 0xbef   : > { %11225 = vpow2.f32 %v6013_v52  ;;  %v5993_v0 = vsub.f32 %v13208_v8, %v5939_v24 }
 0xbf0   : > { %v13294_v31 = vpop.eup %11215  ;;  %v6027_v36 = vmul.f32 1.442695, %v5994_v60 }
 0xbf1   : > { %v13296_v37 = vpop.eup %11217  ;;  %v6025_v42 = vmul.f32 1.442695, %v5993_v0  ;;  %v5930_v11 = vpop.xlane.xlu1 %5929  ;;  %v6060_v3 = vsel %vm2329_vm3, %v13294_v31, 0.0 }
 0xbf2   : > { %11227 = vpow2.f32 %v6027_v36  ;;  %v5990_v49 = vsub.f32 %v13215_v13, %v5930_v11  ;;  %6061 = vadd.xlane.f32.xlu1 %v6060_v3  ;;  %v5927_v55 = vpop.xlane.xlu0 %5926  ;;  %v6057_v57 = vsel %vm2329_vm3, %v13296_v37, 0.0 }
 0xbf3   : > { %11229 = vpow2.f32 %v6025_v42  ;;  %v5989_v8 = vsub.f32 %v13222_v17, %v5927_v55  ;;  %6058 = vadd.xlane.f32.xlu0 %v6057_v57 }
 0xbf4   : > { %v13304_v39 = vpop.eup %11219  ;;  %v6019_v20 = vmul.f32 1.442695, %v5990_v49 }
 0xbf5   : > { %v13306_v62 = vpop.eup %11221  ;;  %v6017_v54 = vmul.f32 1.442695, %v5989_v8  ;;  %v5948_v9 = vpop.xlane.xlu1 %5947  ;;  %v6078_v53 = vsel %vm2329_vm3, %v13304_v39, 0.0 }
 0xbf6   : > { %11231 = vpow2.f32 %v6019_v20  ;;  %v5996_v13 = vsub.f32 %v13226_v41, %v5948_v9  ;;  %6079 = vadd.xlane.f32.xlu1 %v6078_v53  ;;  %v5945_v1 = vpop.xlane.xlu0 %5944  ;;  %v6075_v50 = vsel %vm2329_vm3, %v13306_v62, 0.0 }
 0xbf7   : > { %11233 = vpow2.f32 %v6017_v54  ;;  %v5995_v17 = vsub.f32 %v13230_v14, %v5945_v1  ;;  %6076 = vadd.xlane.f32.xlu0 %v6075_v50 }
 0xbf8   : > { %v13314_v26 = vpop.eup %11223  ;;  %v6031_v51 = vmul.f32 1.442695, %v5996_v13 }
 0xbf9   : > { %v13316_v30 = vpop.eup %11225  ;;  %v6029_v59 = vmul.f32 1.442695, %v5995_v17  ;;  %v6066_v18 = vsel %vm2329_vm3, %v13314_v26, 0.0 }
 0xbfa   : > { %11235 = vpow2.f32 %v6031_v51  ;;  %v5954_v41 = vpop.xlane.xlu1 %5953  ;;  %6067 = vadd.xlane.f32.xlu1 %v6066_v18  ;;  %v6063_v4 = vsel %vm2329_vm3, %v13316_v30, 0.0 }
 0xbfb   : > { %11237 = vpow2.f32 %v6029_v59  ;;  %v5998_v22 = vsub.f32 %v13238_v12, %v5954_v41  ;;  %v5951_v14 = vpop.xlane.xlu0 %5950  ;;  %6064 = vadd.xlane.f32.xlu0 %v6063_v4 }
 0xbfc   : > { %v13323_v44 = vpop.eup %11227  ;;  %v5997_v38 = vsub.f32 %v13240_v25, %v5951_v14 }
 0xbfd   : > { %v13326_v48 = vpop.eup %11229  ;;  %v6035_v32 = vmul.f32 1.442695, %v5998_v22  ;;  %v6084_v35 = vsel %vm2329_vm3, %v13323_v44, 0.0 }
 0xbfe   : > { %v6033_v52 = vmul.f32 1.442695, %v5997_v38  ;;  %v5972_v21 = vpop.xlane.xlu1 %5971  ;;  %6085 = vadd.xlane.f32.xlu1 %v6084_v35  ;;  %v6081_v60 = vsel %vm2329_vm3, %v13326_v48, 0.0 }
 0xbff   : > { %11239 = vpow2.f32 %v6035_v32  ;;  %v6004_v12 = vsub.f32 %v13242_v23, %v5972_v21  ;;  %v5969_v24 = vpop.xlane.xlu0 %5968  ;;  %6082 = vadd.xlane.f32.xlu0 %v6081_v60 }
 0xc00   : > { %v13333_v0 = vpop.eup %11231  ;;  %11241 = vpow2.f32 %v6033_v52  ;;  %v6003_v25 = vsub.f32 %v13246_v40, %v5969_v24 }
 0xc01   : > { %v13336_v36 = vpop.eup %11233  ;;  %v6047_v42 = vmul.f32 1.442695, %v6004_v12  ;;  %v6072_v11 = vsel %vm2329_vm3, %v13333_v0, 0.0 }
 0xc02   : > { %v6045_v3 = vmul.f32 1.442695, %v6003_v25  ;;  %v5960_v49 = vpop.xlane.xlu1 %5959  ;;  %6073 = vadd.xlane.f32.xlu1 %v6072_v11  ;;  %v6069_v55 = vsel %vm2329_vm3, %v13336_v36, 0.0 }
 0xc03   : > { %11243 = vpow2.f32 %v6047_v42  ;;  %v6000_v23 = vsub.f32 %v13250_v63, %v5960_v49  ;;  %v5957_v57 = vpop.xlane.xlu0 %5956  ;;  %6070 = vadd.xlane.f32.xlu0 %v6069_v55 }
 0xc04   : > { %v13343_v8 = vpop.eup %11235  ;;  %11245 = vpow2.f32 %v6045_v3  ;;  %v5999_v40 = vsub.f32 %v13254_v5, %v5957_v57 }
 0xc05   : > { %v13346_v20 = vpop.eup %11237  ;;  %v6039_v54 = vmul.f32 1.442695, %v6000_v23  ;;  %v6090_v9 = vsel %vm2329_vm3, %v13343_v8, 0.0 }
 0xc06   : > { %v6037_v53 = vmul.f32 1.442695, %v5999_v40  ;;  %v5978_v13 = vpop.xlane.xlu1 %5977  ;;  %6091 = vadd.xlane.f32.xlu1 %v6090_v9  ;;  %v6087_v1 = vsel %vm2329_vm3, %v13346_v20, 0.0 }
 0xc07   : > { %11247 = vpow2.f32 %v6039_v54  ;;  %v6006_v63 = vsub.f32 %v13258_v28, %v5978_v13  ;;  %v5975_v50 = vpop.xlane.xlu0 %5974  ;;  %6088 = vadd.xlane.f32.xlu0 %v6087_v1 }
 0xc08   : > { %11249 = vpow2.f32 %v6037_v53  ;;  %v6005_v5 = vsub.f32 %v13262_v58, %v5975_v50 }
 0xc09   : > { %v13354_v17 = vpop.eup %11239  ;;  %v6051_v51 = vmul.f32 1.442695, %v6006_v63 }
 0xc0a   : > { %v13356_v59 = vpop.eup %11241  ;;  %v6049_v18 = vmul.f32 1.442695, %v6005_v5  ;;  %v5966_v41 = vpop.xlane.xlu1 %5965  ;;  %v6096_v4 = vsel %vm2329_vm3, %v13354_v17, 0.0 }
 0xc0b   : > { %11251 = vpow2.f32 %v6051_v51  ;;  %v6002_v22 = vsub.f32 %v13266_v2, %v5966_v41  ;;  %6097 = vadd.xlane.f32.xlu1 %v6096_v4  ;;  %v5963_v28 = vpop.xlane.xlu0 %5962  ;;  %v6093_v14 = vsel %vm2329_vm3, %v13356_v59, 0.0 }
 0xc0c   : > { %11253 = vpow2.f32 %v6049_v18  ;;  %v6001_v58 = vsub.f32 %v13270_v46, %v5963_v28  ;;  %6094 = vadd.xlane.f32.xlu0 %v6093_v14 }
 0xc0d   : > { %v13364_v38 = vpop.eup %11243  ;;  %v6043_v32 = vmul.f32 1.442695, %v6002_v22 }
 0xc0e   : > { %v13366_v35 = vpop.eup %11245  ;;  %v6041_v52 = vmul.f32 1.442695, %v6001_v58  ;;  %v5984_v21 = vpop.xlane.xlu1 %5983  ;;  %v6114_v60 = vsel %vm2329_vm3, %v13364_v38, 0.0 }
 0xc0f   : > { %11255 = vpow2.f32 %v6043_v32  ;;  %v6008_v2 = vsub.f32 %v13274_v45, %v5984_v21  ;;  %6115 = vadd.xlane.f32.xlu1 %v6114_v60  ;;  %v5981_v12 = vpop.xlane.xlu0 %5980  ;;  %v6111_v24 = vsel %vm2329_vm3, %v13366_v35, 0.0 }
 0xc10   : > { %11257 = vpow2.f32 %v6041_v52  ;;  %v6007_v46 = vsub.f32 %v13278_v10, %v5981_v12  ;;  %6112 = vadd.xlane.f32.xlu0 %v6111_v24 }
 0xc11   : > { %v13374_v25 = vpop.eup %11247  ;;  %v6055_v42 = vmul.f32 1.442695, %v6008_v2 }
 0xc12   : > { %v13376_v11 = vpop.eup %11249  ;;  %v6053_v3 = vmul.f32 1.442695, %v6007_v46  ;;  %v6102_v49 = vsel %vm2329_vm3, %v13374_v25, 0.0 }
 0xc13   : > { %11259 = vpow2.f32 %v6055_v42  ;;  %6103 = vadd.xlane.f32.xlu1 %v6102_v49  ;;  %v6099_v45 = vsel %vm2329_vm3, %v13376_v11, 0.0 }
 0xc14   : > { %11261 = vpow2.f32 %v6053_v3  ;;  %6100 = vadd.xlane.f32.xlu0 %v6099_v45 }
 0xc15   : > { %v13382_v55 = vpop.eup %11251 }
 0xc16   : > { %v13384_v10 = vpop.eup %11253  ;;  %v6120_v23 = vsel %vm2329_vm3, %v13382_v55, 0.0 }
 0xc17   : > { %6121 = vadd.xlane.f32.xlu1 %v6120_v23  ;;  %v6117_v57 = vsel %vm2329_vm3, %v13384_v10, 0.0 }
 0xc18   : > { %6118 = vadd.xlane.f32.xlu0 %v6117_v57 }
 0xc19   : > { %v13390_v40 = vpop.eup %11255 }
 0xc1a   : > { %v13392_v54 = vpop.eup %11257  ;;  %v6108_v9 = vsel %vm2329_vm3, %v13390_v40, 0.0 }
 0xc1b   : > { %6109 = vadd.xlane.f32.xlu1 %v6108_v9  ;;  %v6105_v53 = vsel %vm2329_vm3, %v13392_v54, 0.0 }
 0xc1c   : > { %6106 = vadd.xlane.f32.xlu0 %v6105_v53 }
 0xc1d   : > { %v13398_v13 = vpop.eup %11259 }
 0xc1e   : > { %v13400_v1 = vpop.eup %11261  ;;  %v6126_v63 = vsel %vm2329_vm3, %v13398_v13, 0.0 }
 0xc1f   : > { %6127 = vadd.xlane.f32.xlu1 %v6126_v63  ;;  %v6123_v50 = vsel %vm2329_vm3, %v13400_v1, 0.0 }
 0xc20   : > { %6124 = vadd.xlane.f32.xlu0 %v6123_v50 }
 0xc7f   : > { %v6062_v5 = vpop.xlane.xlu1 %6061 }
 0xc80   : > { %11263 = vrcp.f32 %v6062_v5  ;;  %v6059_v51 = vpop.xlane.xlu0 %6058 }
 0xc81   : > { %11265 = vrcp.f32 %v6059_v51 }
 0xc83   : > { %v6080_v18 = vpop.xlane.xlu1 %6079 }
 0xc84   : > { %11267 = vrcp.f32 %v6080_v18  ;;  %v6077_v41 = vpop.xlane.xlu0 %6076 }
 0xc85   : > { %11269 = vrcp.f32 %v6077_v41 }
 0xc87   : > { %v6068_v4 = vpop.xlane.xlu1 %6067 }
 0xc88   : > { %11271 = vrcp.f32 %v6068_v4  ;;  %v6065_v22 = vpop.xlane.xlu0 %6064 }
 0xc89   : > { %11273 = vrcp.f32 %v6065_v22 }
 0xc8a   : > { %v11264_v28 = vpop.eup %11263 }
 0xc8b   : > { %v11266_v14 = vpop.eup %11265  ;;  %v6086_v58 = vpop.xlane.xlu1 %6085  ;;  %v6154_v21 = vmul.f32 %v11264_v28, %v13294_v31 }
 0xc8c   : > { %11275 = vrcp.f32 %v6086_v58  ;;  %v6083_v32 = vpop.xlane.xlu0 %6082  ;;  %v6153_v52 = vmul.f32 %v11266_v14, %v13296_v37 }
 0xc8d   : > { %11277 = vrcp.f32 %v6083_v32 }
 0xc8e   : > { %v11268_v60 = vpop.eup %11267  ;;  %10335 = vmatprep.mubr.msk.f32.mxu0 %vm2329_vm3, %v6153_v52 }
 0xc8f   : > { %v11270_v2 = vpop.eup %11269  ;;  %v6074_v12 = vpop.xlane.xlu1 %6073  ;;  %10336 = vmatmul.mubr.msk.f32.vlgmr.msra.gmra.mrb[128].mxu0 %vm2329_vm3, %v6154_v21  ;;  %v6160_v42 = vmul.f32 %v11268_v60, %v13304_v39 }
 0xc90   : > { %11279 = vrcp.f32 %v6074_v12  ;;  %10928 = vmatpush3.bf16.msra.mxu0 %v13126_v19  ;;  %v6071_v24 = vpop.xlane.xlu0 %6070  ;;  %v6159_v46 = vmul.f32 %v11270_v2, %v13306_v62 }
 0xc91   : > { %10930 = vmatprep.subr.bf16.mxu0 %v13138_v47  ;;  %11281 = vrcp.f32 %v6071_v24 }
 0xc92   : > { %v11272_v31 = vpop.eup %11271  ;;  %10356 = vmatprep.mubr.msk.f32.mxu1 %vm2329_vm3, %v6159_v46 }
 0xc93   : > { %v11274_v37 = vpop.eup %11273  ;;  %v6092_v3 = vpop.xlane.xlu1 %6091  ;;  %10357 = vmatmul.mubr.msk.f32.vlgmr.msra.gmra.mrb[124].mxu1 %vm2329_vm3, %v6160_v42  ;;  %v6156_v39 = vmul.f32 %v11272_v31, %v13314_v26 }
 0xc94   : > { %11283 = vrcp.f32 %v6092_v3  ;;  %10932 = vmatpush3.bf16.msra.mxu0 %v13138_v47  ;;  %10940 = vmatpush3.bf16.msra.mxu1 %v13128_v16  ;;  %v6089_v19 = vpop.xlane.xlu0 %6088  ;;  %v6155_v62 = vmul.f32 %v11274_v37, %v13316_v30 }
 0xc95   : > { %10934 = vmatprep.subr.bf16.mxu0 %v13142_v15  ;;  %10942 = vmatprep.subr.bf16.mxu1 %v13140_v43  ;;  %11285 = vrcp.f32 %v6089_v19 }
 0xc96   : > { %v11276_v49 = vpop.eup %11275  ;;  %10338 = vmatprep.mubr.msk.f32.mxu0 %vm2329_vm3, %v6155_v62 }
 0xc97   : > { %v11278_v45 = vpop.eup %11277  ;;  %10339 = vmatmul.mubr.msk.f32.gmra.mrb[130].mxu0 %vm2329_vm3, %v6156_v39  ;;  %v6162_v30 = vmul.f32 %v11276_v49, %v13323_v44 }
 0xc98   : > { %v6098_v23 = vpop.xlane.xlu1 %6097  ;;  %10936 = vmatpush3.bf16.msra.mxu0 %v13142_v15  ;;  %10944 = vmatpush3.bf16.msra.mxu1 %v13140_v43  ;;  %v6161_v16 = vmul.f32 %v11278_v45, %v13326_v48 }
 0xc99   : > { %11287 = vrcp.f32 %v6098_v23  ;;  %10946 = vmatprep.subr.bf16.mxu1 %v13144_v6  ;;  %v6095_v47 = vpop.xlane.xlu0 %6094 }
 0xc9a   : > { %v11280_v26 = vpop.eup %11279  ;;  %11289 = vrcp.f32 %v6095_v47  ;;  %10359 = vmatprep.mubr.msk.f32.mxu1 %vm2329_vm3, %v6161_v16 }
 0xc9b   : > { %v11282_v57 = vpop.eup %11281  ;;  %10360 = vmatmul.mubr.msk.f32.gmra.mrb[126].mxu1 %vm2329_vm3, %v6162_v30  ;;  %v6158_v48 = vmul.f32 %v11280_v26, %v13333_v0 }
 0xc9c   : > { %v6116_v9 = vpop.xlane.xlu1 %6115  ;;  %10948 = vmatpush3.bf16.msra.mxu1 %v13144_v6  ;;  %v6157_v43 = vmul.f32 %v11282_v57, %v13336_v36 }
 0xc9d   : > { %11291 = vrcp.f32 %v6116_v9  ;;  %v6113_v15 = vpop.xlane.xlu0 %6112 }
 0xc9e   : > { %v11284_v53 = vpop.eup %11283  ;;  %11293 = vrcp.f32 %v6113_v15  ;;  %10341 = vmatprep.mubr.msk.f32.mxu0 %vm2329_vm3, %v6157_v43 }
 0xc9f   : > { %v11286_v44 = vpop.eup %11285  ;;  %10342 = vmatmul.mubr.msk.f32.gmra.mrb[132].mxu0 %vm2329_vm3, %v6158_v48  ;;  %v6164_v6 = vmul.f32 %v11284_v53, %v13343_v8 }
 0xca0   : > { %v6104_v63 = vpop.xlane.xlu1 %6103  ;;  %v6163_v50 = vmul.f32 %v11286_v44, %v13346_v20 }
 0xca1   : > { %11295 = vrcp.f32 %v6104_v63  ;;  %v6101_v5 = vpop.xlane.xlu0 %6100 }
 0xca2   : > { %11297 = vrcp.f32 %v6101_v5  ;;  %10362 = vmatprep.mubr.msk.f32.mxu1 %vm2329_vm3, %v6163_v50 }
 0xca3   : > { %v11288_v36 = vpop.eup %11287  ;;  %10363 = vmatmul.mubr.msk.f32.gmra.mrb[128].mxu1 %vm2329_vm3, %v6164_v6 }
 0xca4   : > { %v11290_v0 = vpop.eup %11289  ;;  %v6122_v51 = vpop.xlane.xlu1 %6121  ;;  %v6166_v4 = vmul.f32 %v11288_v36, %v13354_v17 }
 0xca5   : > { %11299 = vrcp.f32 %v6122_v51  ;;  %v6119_v18 = vpop.xlane.xlu0 %6118  ;;  %v6165_v41 = vmul.f32 %v11290_v0, %v13356_v59 }
 0xca6   : > { %11301 = vrcp.f32 %v6119_v18 }
 0xca7   : > { %v11292_v20 = vpop.eup %11291  ;;  %10377 = vmatprep.mubr.msk.f32.mxu0 %vm2329_vm3, %v6165_v41 }
 0xca8   : > { %v11294_v22 = vpop.eup %11293  ;;  %v6110_v8 = vpop.xlane.xlu1 %6109  ;;  %10378 = vmatmul.mubr.msk.f32.vlgmr.msra.gmra.mrb[134].mxu0 %vm2329_vm3, %v6166_v4  ;;  %v6172_v58 = vmul.f32 %v11292_v20, %v13364_v38 }
 0xca9   : > { %11303 = vrcp.f32 %v6110_v8  ;;  %v6107_v28 = vpop.xlane.xlu0 %6106  ;;  %v6171_v14 = vmul.f32 %v11294_v22, %v13366_v35 }
 0xcaa   : > { %11305 = vrcp.f32 %v6107_v28 }
 0xcab   : > { %v11296_v32 = vpop.eup %11295  ;;  %10398 = vmatprep.mubr.msk.f32.mxu1 %vm2329_vm3, %v6171_v14 }
 0xcac   : > { %v11298_v59 = vpop.eup %11297  ;;  %v6128_v17 = vpop.xlane.xlu1 %6127  ;;  %10399 = vmatmul.mubr.msk.f32.vlgmr.msra.gmra.mrb[130].mxu1 %vm2329_vm3, %v6172_v58  ;;  %v6168_v60 = vmul.f32 %v11296_v32, %v13374_v25 }
 0xcad   : > { %11307 = vrcp.f32 %v6128_v17  ;;  %v6125_v52 = vpop.xlane.xlu0 %6124  ;;  %v6167_v21 = vmul.f32 %v11298_v59, %v13376_v11 }
 0xcae   : > { %11309 = vrcp.f32 %v6125_v52 }
 0xcaf   : > { %v11300_v2 = vpop.eup %11299  ;;  %10380 = vmatprep.mubr.msk.f32.mxu0 %vm2329_vm3, %v6167_v21 }
 0xcb0   : > { %v11302_v35 = vpop.eup %11301  ;;  %10381 = vmatmul.mubr.msk.f32.gmra.mrb[136].mxu0 %vm2329_vm3, %v6168_v60  ;;  %v6174_v12 = vmul.f32 %v11300_v2, %v13382_v55 }
 0xcb1   : > { %v6173_v38 = vmul.f32 %v11302_v35, %v13384_v10 }
 0xcb3   : > { %v11304_v24 = vpop.eup %11303  ;;  %10401 = vmatprep.mubr.msk.f32.mxu1 %vm2329_vm3, %v6173_v38 }
 0xcb4   : > { %v11306_v46 = vpop.eup %11305  ;;  %10402 = vmatmul.mubr.msk.f32.gmra.mrb[132].mxu1 %vm2329_vm3, %v6174_v12  ;;  %v6170_v25 = vmul.f32 %v11304_v24, %v13390_v40  ;;  %v8959_v40 = vld [vmem:[%s14547_s6 + $0x28] sm:$0xff] }
 0xcb5   : > { %v6169_v11 = vmul.f32 %v11306_v46, %v13392_v54  ;;  %v8958_v54 = vld [vmem:[%s14547_s6 + $0x20] sm:$0xff]  ;;  %10418 = vmatprep.subr.mxu1 %v8959_v40 }
 0xcb6   : > { %10407 = vmatprep.subr.mxu0 %v8958_v54  ;;  %10419 = vmatpush3.msra.mxu1 %v8959_v40 }
 0xcb7   : > { %v11308_v42 = vpop.eup %11307  ;;  %10383 = vmatprep.mubr.msk.f32.mxu0 %vm2329_vm3, %v6169_v11  ;;  %10408 = vmatpush3.msra.mxu0 %v8958_v54 }
 0xcb8   : > { %v11310_v31 = vpop.eup %11309  ;;  %10384 = vmatmul.mubr.msk.f32.gmra.mrb[138].mxu0 %vm2329_vm3, %v6170_v25  ;;  %v6176_v55 = vmul.f32 %v11308_v42, %v13398_v13  ;;  %v8960_v13 = vld [vmem:[%s14547_s6 + $0x30] sm:$0xff] }
 0xcb9   : > { %v6175_v10 = vmul.f32 %v11310_v31, %v13400_v1  ;;  %10429 = vmatprep.subr.mxu0 %v8960_v13  ;;  %v8961_v1 = vld [vmem:[%s14547_s6 + $0x38] sm:$0xff] }
 0xcba   : > { %10440 = vmatprep.subr.mxu1 %v8961_v1 }
 0xcbb   : > { %10404 = vmatprep.mubr.msk.f32.mxu1 %vm2329_vm3, %v6175_v10 }
 0xcbc   : > { %10405 = vmatmul.mubr.msk.f32.gmra.mrb[134].mxu1 %vm2329_vm3, %v6176_v55 }
 0xd62   : > { %v10337_v37 = vpop.f32.mrb[128].mxu0 }
 0xd63   : > { %v6261_v3 = vpop.f32.mrb[129].mxu0 }
 0xd64   : > { %10409 = vmatprep.mubr.msk.f32.mxu0 %vm1804_vm1, %v6261_v3 }
 0xd65   : > { %10410 = vmatmul.mubr.msk.f32.vlgmr.msra.gmra.mrb[140].mxu0 %vm1804_vm1, %v10337_v37 }
 0xd66   : > { %v10358_v19 = vpop.f32.mrb[124].mxu1  ;;  %10430 = vmatpush3.msra.mxu0 %v8960_v13 }
 0xd67   : > { %v6374_v62 = vpop.f32.mrb[125].mxu1 }
 0xd68   : > { %10420 = vmatprep.mubr.msk.f32.mxu1 %vm1804_vm1, %v6374_v62 }
 0xd69   : > { %10421 = vmatmul.mubr.msk.f32.vlgmr.msra.gmra.mrb[136].mxu1 %vm1804_vm1, %v10358_v19 }
 0xd6a   : > { %v10340_v39 = vpop.f32.mrb[130].mxu0  ;;  %10441 = vmatpush3.msra.mxu1 %v8961_v1 }
 0xd6b   : > { %v6271_v49 = vpop.f32.mrb[131].mxu0 }
 0xd6c   : > { %10412 = vmatprep.mubr.msk.f32.mxu0 %vm1804_vm1, %v6271_v49 }
 0xd6d   : > { %10413 = vmatmul.mubr.msk.f32.gmra.mrb[142].mxu0 %vm1804_vm1, %v10340_v39 }
 0xd6e   : > { %v10361_v45 = vpop.f32.mrb[126].mxu1 }
 0xd6f   : > { %v6384_v23 = vpop.f32.mrb[127].mxu1 }
 0xd70   : > { %10423 = vmatprep.mubr.msk.f32.mxu1 %vm1804_vm1, %v6384_v23 }
 0xd71   : > { %10424 = vmatmul.mubr.msk.f32.gmra.mrb[138].mxu1 %vm1804_vm1, %v10361_v45 }
 0xd72   : > { %v10343_v16 = vpop.f32.mrb[132].mxu0 }
 0xd73   : > { %v6281_v47 = vpop.f32.mrb[133].mxu0 }
 0xd74   : > { %10415 = vmatprep.mubr.msk.f32.mxu0 %vm1804_vm1, %v6281_v47 }
 0xd75   : > { %10416 = vmatmul.mubr.msk.f32.gmra.mrb[144].mxu0 %vm1804_vm1, %v10343_v16 }
 0xd76   : > { %v10364_v30 = vpop.f32.mrb[128].mxu1 }
 0xd77   : > { %v6394_v26 = vpop.f32.mrb[129].mxu1 }
 0xd78   : > { %10426 = vmatprep.mubr.msk.f32.mxu1 %vm1804_vm1, %v6394_v26 }
 0xd79   : > { %10427 = vmatmul.mubr.msk.f32.gmra.mrb[140].mxu1 %vm1804_vm1, %v10364_v30 }
 0xd7b   : > { %v10379_v57 = vpop.f32.mrb[134].mxu0 }
 0xd7c   : > { %v6487_v9 = vpop.f32.mrb[135].mxu0 }
 0xd7d   : > { %10431 = vmatprep.mubr.msk.f32.mxu0 %vm1804_vm1, %v6487_v9 }
 0xd7e   : > { %10432 = vmatmul.mubr.msk.f32.vlgmr.msra.gmra.mrb[146].mxu0 %vm1804_vm1, %v10379_v57 }
 0xd7f   : > { %v10400_v43 = vpop.f32.mrb[130].mxu1 }
 0xd80   : > { %v6600_v15 = vpop.f32.mrb[131].mxu1 }
 0xd81   : > { %10442 = vmatprep.mubr.msk.f32.mxu1 %vm1804_vm1, %v6600_v15 }
 0xd82   : > { %10443 = vmatmul.mubr.msk.f32.vlgmr.msra.gmra.mrb[142].mxu1 %vm1804_vm1, %v10400_v43 }
 0xd83   : > { %v10382_v48 = vpop.f32.mrb[136].mxu0 }
 0xd84   : > { %v6497_v53 = vpop.f32.mrb[137].mxu0 }
 0xd85   : > { %10434 = vmatprep.mubr.msk.f32.mxu0 %vm1804_vm1, %v6497_v53 }
 0xd86   : > { %10435 = vmatmul.mubr.msk.f32.gmra.mrb[148].mxu0 %vm1804_vm1, %v10382_v48 }
 0xd87   : > { %v10403_v44 = vpop.f32.mrb[132].mxu1 }
 0xd88   : > { %v6610_v63 = vpop.f32.mrb[133].mxu1 }
 0xd89   : > { %10445 = vmatprep.mubr.msk.f32.mxu1 %vm1804_vm1, %v6610_v63 }
 0xd8a   : > { %10446 = vmatmul.mubr.msk.f32.gmra.mrb[144].mxu1 %vm1804_vm1, %v10403_v44 }
 0xd8b   : > { %v10385_v50 = vpop.f32.mrb[138].mxu0 }
 0xd8c   : > { %v6507_v5 = vpop.f32.mrb[139].mxu0 }
 0xd8d   : > { %10437 = vmatprep.mubr.msk.f32.mxu0 %vm1804_vm1, %v6507_v5 }
 0xd8e   : > { %10438 = vmatmul.mubr.msk.f32.gmra.mrb[150].mxu0 %vm1804_vm1, %v10385_v50 }
 0xd8f   : > { %v10406_v6 = vpop.f32.mrb[134].mxu1 }
 0xd90   : > { %v6620_v36 = vpop.f32.mrb[135].mxu1 }
 0xd91   : > { %10448 = vmatprep.mubr.msk.f32.mxu1 %vm1804_vm1, %v6620_v36 }
 0xd92   : > { %10449 = vmatmul.mubr.msk.f32.gmra.mrb[146].mxu1 %vm1804_vm1, %v10406_v6 }
 0xe38   : > { %v10411_v0 = vpop.f32.mrb[140].mxu0 }
 0xe39   : > { %v6718_v51 = vpop.f32.mrb[141].mxu0  ;;  %v7093_v41 = vsel %vm613_vm0, %v10411_v0, 0.0 }
 0xe3a   : > { %v7086_v22 = vsel %vm613_vm0, %v6718_v51, 0.0 }
 0xe3c   : > { %v10422_v18 = vpop.f32.mrb[136].mxu1 }
 0xe3d   : > { %v7094_v4 = vsel %vm613_vm0, %v10422_v18, 0.0  ;;  %v6831_v20 = vpop.f32.mrb[137].mxu1 }
 0xe3e   : > { %v7095_v8 = vadd.f32 %v7094_v4, %v7093_v41  ;;  %v7087_v28 = vsel %vm613_vm0, %v6831_v20, 0.0 }
 0xe3f   : > { %v7088_v14 = vadd.f32 %v7087_v28, %v7086_v22 }
 0xe40   : > { %v10414_v58 = vpop.f32.mrb[142].mxu0 }
 0xe41   : > { %v6728_v32 = vpop.f32.mrb[143].mxu0  ;;  %v7107_v17 = vsel %vm613_vm0, %v10414_v58, 0.0 }
 0xe42   : > { %v7100_v60 = vsel %vm613_vm0, %v6728_v32, 0.0 }
 0xe44   : > { %v10425_v59 = vpop.f32.mrb[138].mxu1 }
 0xe45   : > { %v7108_v52 = vsel %vm613_vm0, %v10425_v59, 0.0  ;;  %v6841_v21 = vpop.f32.mrb[139].mxu1 }
 0xe46   : > { %v7109_v2 = vadd.f32 %v7108_v52, %v7107_v17  ;;  %v7101_v35 = vsel %vm613_vm0, %v6841_v21, 0.0 }
 0xe47   : > { %v7102_v38 = vadd.f32 %v7101_v35, %v7100_v60 }
 0xe48   : > { %v10417_v12 = vpop.f32.mrb[144].mxu0 }
 0xe49   : > { %v6738_v24 = vpop.f32.mrb[145].mxu0  ;;  %v7121_v11 = vsel %vm613_vm0, %v10417_v12, 0.0 }
 0xe4a   : > { %v7114_v31 = vsel %vm613_vm0, %v6738_v24, 0.0 }
 0xe4c   : > { %v10428_v46 = vpop.f32.mrb[140].mxu1 }
 0xe4d   : > { %v7122_v25 = vsel %vm613_vm0, %v10428_v46, 0.0  ;;  %v6851_v42 = vpop.f32.mrb[141].mxu1 }
 0xe4e   : > { %v7123_v10 = vadd.f32 %v7122_v25, %v7121_v11  ;;  %v7115_v55 = vsel %vm613_vm0, %v6851_v42, 0.0 }
 0xe4f   : > { %v7116_v54 = vadd.f32 %v7115_v55, %v7114_v31 }
 0xe51   : > { %v10433_v40 = vpop.f32.mrb[146].mxu0 }
 0xe52   : > { %v7096_v13 = vsel %vm613_vm0, %v10433_v40, 0.0  ;;  %v6944_v1 = vpop.f32.mrb[147].mxu0 }
 0xe53   : > { %v7097_v37 = vadd.f32 %v7096_v13, %v7095_v8  ;;  %v7089_v3 = vsel %vm613_vm0, %v6944_v1, 0.0 }
 0xe54   : > { %v7090_v19 = vadd.f32 %v7089_v3, %v7088_v14 }
 0xe55   : > { %v10444_v62 = vpop.f32.mrb[142].mxu1 }
 0xe56   : > { %v7098_v39 = vsel %vm613_vm0, %v10444_v62, 0.0  ;;  %v7057_v49 = vpop.f32.mrb[143].mxu1 }
 0xe57   : > { %v7099_v45 = vadd.f32 %v7098_v39, %v7097_v37  ;;  %v7091_v23 = vsel %vm613_vm0, %v7057_v49, 0.0 }
 0xe58   : > { %v7092_v16 = vadd.f32 %v7091_v23, %v7090_v19 }
 0xe59   : > { %v7129_v47 = vadd.f32 %v7099_v45, %v12766_v27  ;;  %v10436_v30 = vpop.f32.mrb[148].mxu0 }
 0xe5a   : > { %v7128_v26 = vadd.f32 %v7092_v16, %v12764_v33  ;;  %v7110_v57 = vsel %vm613_vm0, %v10436_v30, 0.0  ;;  %v6954_v9 = vpop.f32.mrb[149].mxu0 }
 0xe5b   : > { %v7111_v43 = vadd.f32 %v7110_v57, %v7109_v2  ;;  %v7103_v15 = vsel %vm613_vm0, %v6954_v9, 0.0  ;;  %v7141_v48 = vsel %vm613_vm0, %v7129_v47, 0.0  ;;  %v8990_v57 = vld [vmem:[%s14550_s9 + $0x20] sm:$0xff]  ;;  %v8991_v9 = vld [vmem:[%s14550_s9 + $0x28] sm:$0xff] }
 0xe5c   : > { %v7104_v53 = vadd.f32 %v7103_v15, %v7102_v38  ;;  %7142 = vadd.xlane.f32.xlu1 %v7141_v48  ;;  %v7138_v44 = vsel %vm613_vm0, %v7128_v26, 0.0  ;;  %v8992_v15 = vld [vmem:[%s14550_s9 + $0x30] sm:$0xff]  ;;  %v8993_v48 = vld [vmem:[%s14550_s9 + $0x38] sm:$0xff] }
 0xe5d   : > { %7139 = vadd.xlane.f32.xlu0 %v7138_v44  ;;  %v10447_v63 = vpop.f32.mrb[144].mxu1 }
 0xe5e   : > { %v7112_v50 = vsel %vm613_vm0, %v10447_v63, 0.0  ;;  %v7067_v27 = vpop.f32.mrb[145].mxu1 }
 0xe5f   : > { %v7113_v5 = vadd.f32 %v7112_v50, %v7111_v43  ;;  %v7105_v33 = vsel %vm613_vm0, %v7067_v27, 0.0  ;;  %v10949_v43 = vpack.c.bf16 %v8991_v9, %v8990_v57 }
 0xe60   : > { %v7106_v6 = vadd.f32 %v7105_v33, %v7104_v53  ;;  %v10953_v53 = vpack.c.bf16 %v8993_v48, %v8992_v15 }
 0xe61   : > { %v7131_v36 = vadd.f32 %v7113_v5, %v12793_v61  ;;  %v10439_v0 = vpop.f32.mrb[150].mxu0  ;;  %10950 = vmatprep.subr.bf16.mxu0 %v10949_v43 }
 0xe62   : > { %v7130_v51 = vadd.f32 %v7106_v6, %v12790_v34  ;;  %v7124_v18 = vsel %vm613_vm0, %v10439_v0, 0.0  ;;  %v6964_v41 = vpop.f32.mrb[151].mxu0  ;;  %10952 = vmatpush3.bf16.msra.mxu0 %v10949_v43 }
 0xe63   : > { %v7125_v4 = vadd.f32 %v7124_v18, %v7123_v10  ;;  %v7117_v20 = vsel %vm613_vm0, %v6964_v41, 0.0  ;;  %v7147_v22 = vsel %vm613_vm0, %v7131_v36, 0.0  ;;  %10954 = vmatprep.subr.bf16.mxu0 %v10953_v53 }
 0xe64   : > { %v7118_v8 = vadd.f32 %v7117_v20, %v7116_v54  ;;  %7148 = vadd.xlane.f32.xlu1 %v7147_v22  ;;  %v7144_v28 = vsel %vm613_vm0, %v7130_v51, 0.0  ;;  %v8988_v20 = vld [vmem:[%s14548_s7 + $0x1] ss:$0 sm:$0xff] }
 0xe65   : > { %7145 = vadd.xlane.f32.xlu0 %v7144_v28  ;;  %v10450_v14 = vpop.f32.mrb[146].mxu1 }
 0xe66   : > { %v7126_v58 = vsel %vm613_vm0, %v10450_v14, 0.0  ;;  %v7077_v61 = vpop.f32.mrb[147].mxu1  ;;  %10956 = vmatpush3.bf16.msra.mxu0 %v10953_v53 }
 0xe67   : > { %v7127_v32 = vadd.f32 %v7126_v58, %v7125_v4  ;;  %v7119_v34 = vsel %vm613_vm0, %v7077_v61, 0.0 }
 0xe68   : > { %v7120_v59 = vadd.f32 %v7119_v34, %v7118_v8 }
 0xe69   : > { %v7133_v17 = vadd.f32 %v7127_v32, %v12806_v56  ;;  %v8989_v32 = vld [vmem:[%s14549_s8 + $0x1] ss:$0 sm:$0xff] }
 0xe6a   : > { %v7132_v52 = vadd.f32 %v7120_v59, %v12804_v29 }
 0xe6b   : > { %v7153_v21 = vsel %vm613_vm0, %v7133_v17, 0.0 }
 0xe6c   : > { %7154 = vadd.xlane.f32.xlu1 %v7153_v21  ;;  %v7150_v60 = vsel %vm613_vm0, %v7132_v52, 0.0 }
 0xe6d   : > { %7151 = vadd.xlane.f32.xlu0 %v7150_v60 }
 0xee9   : > { %v7143_v2 = vpop.xlane.xlu1 %7142 }
 0xeea   : > { %v7157_v35 = vmul.f32 0.03125, %v7143_v2  ;;  %v7140_v38 = vpop.xlane.xlu0 %7139 }
 0xeeb   : > { %v7156_v12 = vmul.f32 0.03125, %v7140_v38 }
 0xeec   : > { %v7163_v24 = vsub.f32 %v7129_v47, %v7157_v35 }
 0xeed   : > { %v13536_v46 = vsub.f32 %v7128_v26, %v7156_v12 }
 0xeee   : > { %v7169_v11 = vmul.f32 %v7163_v24, %v7163_v24 }
 0xeef   : > { %v7168_v25 = vmul.f32 %v13536_v46, %v13536_v46 }
 0xef0   : > { %v7177_v56 = vsel %vm613_vm0, %v7169_v11, 0.0 }
 0xef1   : > { %v7149_v29 = vpop.xlane.xlu1 %7148  ;;  %7178 = vadd.xlane.f32.xlu1 %v7177_v56  ;;  %v7174_v42 = vsel %vm613_vm0, %v7168_v25, 0.0 }
 0xef2   : > { %v7159_v31 = vmul.f32 0.03125, %v7149_v29  ;;  %v7146_v10 = vpop.xlane.xlu0 %7145  ;;  %7175 = vadd.xlane.f32.xlu0 %v7174_v42 }
 0xef3   : > { %v7158_v55 = vmul.f32 0.03125, %v7146_v10 }
 0xef4   : > { %v13542_v54 = vsub.f32 %v7131_v36, %v7159_v31 }
 0xef5   : > { %v13544_v40 = vsub.f32 %v7130_v51, %v7158_v55 }
 0xef6   : > { %v7171_v13 = vmul.f32 %v13542_v54, %v13542_v54 }
 0xef7   : > { %v7170_v1 = vmul.f32 %v13544_v40, %v13544_v40 }
 0xef8   : > { %v7183_v37 = vsel %vm613_vm0, %v7171_v13, 0.0 }
 0xef9   : > { %7184 = vadd.xlane.f32.xlu1 %v7183_v37  ;;  %v7155_v3 = vpop.xlane.xlu1 %7154  ;;  %v7180_v19 = vsel %vm613_vm0, %v7170_v1, 0.0  ;;  %v9002_v1 = vld [vmem:[%s14552_s11 + $0x40] sm:$0xff]  ;;  %v9003_v37 = vld [vmem:[%s14552_s11 + $0x48] sm:$0xff] }
 0xefa   : > { %v7161_v62 = vmul.f32 0.03125, %v7155_v3  ;;  %7181 = vadd.xlane.f32.xlu0 %v7180_v19  ;;  %v7152_v39 = vpop.xlane.xlu0 %7151  ;;  %v10957_v3 = vpack.c.bf16 %v9003_v37, %v9002_v1  ;;  %v9004_v19 = vld [vmem:[%s14552_s11 + $0x50] sm:$0xff] }
 0xefb   : > { %v7160_v49 = vmul.f32 0.03125, %v7152_v39 }
 0xefc   : > { %v13552_v45 = vsub.f32 %v7133_v17, %v7161_v62  ;;  %10958 = vmatprep.subr.bf16.mxu1 %v10957_v3  ;;  %v9005_v62 = vld [vmem:[%s14552_s11 + $0x58] sm:$0xff] }
 0xefd   : > { %v13554_v23 = vsub.f32 %v7132_v52, %v7160_v49  ;;  %10960 = vmatpush3.bf16.msra.mxu1 %v10957_v3  ;;  %v10961_v39 = vpack.c.bf16 %v9005_v62, %v9004_v19  ;;  %v9006_v49 = vld [vmem:[%s14552_s11 + $0x60] sm:$0xff] }
 0xefe   : > { %v7173_v16 = vmul.f32 %v13552_v45, %v13552_v45 }
 0xeff   : > { %v7172_v47 = vmul.f32 %v13554_v23, %v13554_v23  ;;  %10962 = vmatprep.subr.bf16.mxu1 %v10961_v39 }
 0xf00   : > { %v7189_v30 = vsel %vm613_vm0, %v7173_v16, 0.0  ;;  %v9008_v16 = vld [vmem:[%s14552_s11 + $0x70] sm:$0xff] }
 0xf01   : > { %7190 = vadd.xlane.f32.xlu1 %v7189_v30  ;;  %v7186_v26 = vsel %vm613_vm0, %v7172_v47, 0.0  ;;  %10964 = vmatpush3.bf16.msra.mxu1 %v10961_v39  ;;  %v9009_v47 = vld [vmem:[%s14552_s11 + $0x78] sm:$0xff] }
 0xf02   : > { %7187 = vadd.xlane.f32.xlu0 %v7186_v26  ;;  %v10969_v30 = vpack.c.bf16 %v9009_v47, %v9008_v16  ;;  %v8995_v26 = vld [vmem:[%s14551_s10 + $0x1] ss:$0 sm:$0xff] }
 0xf7e   : > { %v7179_v44 = vpop.xlane.xlu1 %7178 }
 0xf7f   : > { %v7193_v63 = vmul.f32 0.03125, %v7179_v44  ;;  %v7176_v50 = vpop.xlane.xlu0 %7175 }
 0xf80   : > { %v7192_v27 = vmul.f32 0.03125, %v7176_v50 }
 0xf81   : > { %v7199_v5 = vadd.f32 1e-06, %v7193_v63 }
 0xf82   : > { %v7198_v33 = vadd.f32 1e-06, %v7192_v27 }
 0xf83   : > { %11311 = vrsqrt.f32 %v7199_v5 }
 0xf84   : > { %11313 = vrsqrt.f32 %v7198_v33 }
 0xf86   : > { %v7185_v6 = vpop.xlane.xlu1 %7184 }
 0xf87   : > { %v7195_v36 = vmul.f32 0.03125, %v7185_v6  ;;  %v7182_v0 = vpop.xlane.xlu0 %7181 }
 0xf88   : > { %v7194_v51 = vmul.f32 0.03125, %v7182_v0 }
 0xf89   : > { %v7201_v18 = vadd.f32 1e-06, %v7195_v36 }
 0xf8a   : > { %v7200_v41 = vadd.f32 1e-06, %v7194_v51 }
 0xf8b   : > { %11315 = vrsqrt.f32 %v7201_v18 }
 0xf8c   : > { %11317 = vrsqrt.f32 %v7200_v41 }
 0xf8d   : > { %v11312_v4 = vpop.eup %11311 }
 0xf8e   : > { %v11314_v22 = vpop.eup %11313  ;;  %v7211_v8 = vmul.f32 %v11312_v4, %v7163_v24  ;;  %v7191_v28 = vpop.xlane.xlu1 %7190 }
 0xf8f   : > { %v7197_v14 = vmul.f32 0.03125, %v7191_v28  ;;  %v7188_v58 = vpop.xlane.xlu0 %7187  ;;  %v7210_v61 = vmul.f32 %v11314_v22, %v13536_v46 }
 0xf90   : > { %v7223_v34 = vmul.f32 %v8988_v20, %v7211_v8  ;;  %v7196_v59 = vmul.f32 0.03125, %v7188_v58 }
 0xf91   : > { %v7203_v17 = vadd.f32 1e-06, %v7197_v14  ;;  %v7222_v52 = vmul.f32 %v8988_v20, %v7210_v61 }
 0xf92   : > { %v7202_v21 = vadd.f32 1e-06, %v7196_v59  ;;  %v13583_v2 = vadd.f32 %v8989_v32, %v7223_v34 }
 0xf93   : > { %11319 = vrsqrt.f32 %v7203_v17  ;;  %v13581_v60 = vadd.f32 %v8989_v32, %v7222_v52 }
 0xf94   : > { %11321 = vrsqrt.f32 %v7202_v21 }
 0xf95   : > { %v11316_v35 = vpop.eup %11315  ;;  %10459 = vmatprep.mubr.msk.f32.mxu0 %vm613_vm0, %v13581_v60 }
 0xf96   : > { %v11318_v38 = vpop.eup %11317  ;;  %10460 = vmatmul.mubr.msk.f32.vlgmr.msra.gmra.mrb[152].mxu0 %vm613_vm0, %v13583_v2  ;;  %v7213_v12 = vmul.f32 %v11316_v35, %v13542_v54 }
 0xf97   : > { %v7212_v24 = vmul.f32 %v11318_v38, %v13544_v40 }
 0xf98   : > { %v7225_v46 = vmul.f32 %v8988_v20, %v7213_v12 }
 0xf99   : > { %v7224_v11 = vmul.f32 %v8988_v20, %v7212_v24 }
 0xf9a   : > { %v13593_v56 = vadd.f32 %v8989_v32, %v7225_v46 }
 0xf9b   : > { %v13591_v25 = vadd.f32 %v8989_v32, %v7224_v11 }
 0xf9d   : > { %v11320_v29 = vpop.eup %11319  ;;  %10462 = vmatprep.mubr.msk.f32.mxu0 %vm613_vm0, %v13591_v25 }
 0xf9e   : > { %v11322_v42 = vpop.eup %11321  ;;  %10463 = vmatmul.mubr.msk.f32.gmra.mrb[154].mxu0 %vm613_vm0, %v13593_v56  ;;  %v7215_v31 = vmul.f32 %v11320_v29, %v13552_v45  ;;  %v9007_v45 = vld [vmem:[%s14552_s11 + $0x68] sm:$0xff] }
 0xf9f   : > { %v7214_v10 = vmul.f32 %v11322_v42, %v13554_v23  ;;  %v10965_v23 = vpack.c.bf16 %v9007_v45, %v9006_v49 }
 0xfa0   : > { %v7227_v55 = vmul.f32 %v8988_v20, %v7215_v31 }
 0xfa1   : > { %v7226_v54 = vmul.f32 %v8988_v20, %v7214_v10  ;;  %10966 = vmatprep.subr.bf16.mxu1 %v10965_v23 }
 0xfa2   : > { %v13603_v13 = vadd.f32 %v8989_v32, %v7227_v55  ;;  %10968 = vmatpush3.bf16.msra.mxu1 %v10965_v23 }
 0xfa3   : > { %v13601_v40 = vadd.f32 %v8989_v32, %v7226_v54  ;;  %10970 = vmatprep.subr.bf16.mxu1 %v10969_v30 }
 0xfa5   : > { %10465 = vmatprep.mubr.msk.f32.mxu0 %vm613_vm0, %v13601_v40 }
 0xfa6   : > { %10466 = vmatmul.mubr.msk.f32.gmra.mrb[156].mxu0 %vm613_vm0, %v13603_v13  ;;  %10972 = vmatpush3.bf16.msra.mxu1 %v10969_v30 }
0x1069   : > { %v10461_v57 = vpop.f32.mrb[152].mxu0 }
0x106a   : > { %v13636_v9 = vadd.f32 %v10461_v57, %v8995_v26  ;;  %v7337_v43 = vpop.f32.mrb[153].mxu0 }
0x106b   : > { %v13638_v15 = vadd.f32 %v8995_v26, %v7337_v43 }
0x106c   : > { %v13641_v48 = vmul.f32 0.70710677, %v13636_v9 }
0x106d   : > { %v13644_v53 = vmul.f32 0.70710677, %v13638_v15 }
0x106e   : > { %v7391_v44 = vand.u32 2147483647, %v13641_v48  ;;  %vm7379_vm11 = vcmp.lt.f32.partialorder %v13641_v48, 0.0 }
0x106f   : > { %v7390_v63 = vand.u32 2147483647, %v13644_v53  ;;  %vm7378_vm12 = vcmp.lt.f32.partialorder %v13644_v53, 0.0 }
0x1070   : > { %v7397_v50 = vmul.f32 0.3275911, %v7391_v44  ;;  %v7475_v22 = vsub.f32 0.0, %v7391_v44 }
0x1071   : > { %v7396_v27 = vmul.f32 0.3275911, %v7390_v63  ;;  %v10464_v5 = vpop.f32.mrb[154].mxu0  ;;  %v7474_v58 = vsub.f32 0.0, %v7390_v63 }
0x1072   : > { %v7403_v33 = vadd.f32 1.0, %v7397_v50  ;;  %v13648_v6 = vadd.f32 %v10464_v5, %v8995_v26  ;;  %v7347_v36 = vpop.f32.mrb[155].mxu0  ;;  %v7481_v52 = vmul.f32 %v7475_v22, %v7391_v44 }
0x1073   : > { %v7402_v0 = vadd.f32 1.0, %v7396_v27  ;;  %v13650_v51 = vadd.f32 %v8995_v26, %v7347_v36  ;;  %v7480_v12 = vmul.f32 %v7474_v58, %v7390_v63 }
0x1074   : > { %11323 = vrcp.f32 %v7403_v33  ;;  %v13653_v18 = vmul.f32 0.70710677, %v13648_v6  ;;  %v7488_v29 = vmul.f32 1.442695, %v7481_v52 }
0x1075   : > { %11325 = vrcp.f32 %v7402_v0  ;;  %v13656_v41 = vmul.f32 0.70710677, %v13650_v51  ;;  %v7486_v37 = vmul.f32 1.442695, %v7480_v12 }
0x1076   : > { %v7393_v4 = vand.u32 2147483647, %v13653_v18  ;;  %vm7381_vm13 = vcmp.lt.f32.partialorder %v13653_v18, 0.0 }
0x1077   : > { %v7392_v20 = vand.u32 2147483647, %v13656_v41  ;;  %vm7380_vm14 = vcmp.lt.f32.partialorder %v13656_v41, 0.0 }
0x1078   : > { %v7399_v8 = vmul.f32 0.3275911, %v7393_v4  ;;  %v7477_v55 = vsub.f32 0.0, %v7393_v4 }
0x1079   : > { %v7398_v28 = vmul.f32 0.3275911, %v7392_v20  ;;  %v10467_v14 = vpop.f32.mrb[156].mxu0  ;;  %v7476_v62 = vsub.f32 0.0, %v7392_v20 }
0x107a   : > { %v7405_v61 = vadd.f32 1.0, %v7399_v8  ;;  %v13660_v32 = vadd.f32 %v10467_v14, %v8995_v26  ;;  %v7357_v34 = vpop.f32.mrb[157].mxu0  ;;  %v7483_v23 = vmul.f32 %v7477_v55, %v7393_v4 }
0x107b   : > { %v7404_v59 = vadd.f32 1.0, %v7398_v28  ;;  %v13662_v17 = vadd.f32 %v8995_v26, %v7357_v34  ;;  %v7482_v44 = vmul.f32 %v7476_v62, %v7392_v20 }
0x107c   : > { %11327 = vrcp.f32 %v7405_v61  ;;  %v13665_v21 = vmul.f32 0.70710677, %v13660_v32  ;;  %v7492_v33 = vmul.f32 1.442695, %v7483_v23 }
0x107d   : > { %11329 = vrcp.f32 %v7404_v59  ;;  %v13668_v35 = vmul.f32 0.70710677, %v13662_v17  ;;  %v7490_v28 = vmul.f32 1.442695, %v7482_v44 }
0x107e   : > { %v11324_v38 = vpop.eup %11323  ;;  %v7395_v24 = vand.u32 2147483647, %v13665_v21  ;;  %vm7383_vm15 = vcmp.lt.f32.partialorder %v13665_v21, 0.0 }
0x107f   : > { %v11326_v46 = vpop.eup %11325  ;;  %v7421_v11 = vmul.f32 1.0614054, %v11324_v38  ;;  %v7394_v54 = vand.u32 2147483647, %v13668_v35  ;;  %vm7382_vm1 = vcmp.lt.f32.partialorder %v13668_v35, 0.0 }
0x1080   : > { %v7420_v42 = vmul.f32 1.0614054, %v11326_v46  ;;  %v7401_v31 = vmul.f32 0.3275911, %v7395_v24  ;;  %v7479_v4 = vsub.f32 0.0, %v7395_v24  ;;  %v7388_v21 = vsel %vm7382_vm1, -1.0, %v11435_v7 }
0x1081   : > { %v7427_v10 = vadd.f32 -1.4531521, %v7421_v11  ;;  %v7400_v39 = vmul.f32 0.3275911, %v7394_v54  ;;  %v7478_v20 = vsub.f32 0.0, %v7394_v54 }
0x1082   : > { %v7426_v1 = vadd.f32 -1.4531521, %v7420_v42  ;;  %v7407_v3 = vadd.f32 1.0, %v7401_v31  ;;  %v7485_v11 = vmul.f32 %v7479_v4, %v7395_v24  ;;  %v7367_v4 = vmul.f32 0.5, %v13636_v9  ;;  %v9011_v35 = vld [vmem:[%s14553_s12 + $0x1] ss:$0 sm:$0xff] }
0x1083   : > { %v7433_v19 = vmul.f32 %v11324_v38, %v7427_v10  ;;  %v7406_v16 = vadd.f32 1.0, %v7400_v39  ;;  %v7484_v39 = vmul.f32 %v7478_v20, %v7394_v54 }
0x1084   : > { %v7432_v49 = vmul.f32 %v11326_v46, %v7426_v1  ;;  %11331 = vrcp.f32 %v7407_v3 }
0x1085   : > { %v7439_v45 = vadd.f32 1.4214138, %v7433_v19  ;;  %11333 = vpow2.f32 %v7488_v29 }
0x1086   : > { %v13672_v47 = vpop.eup %11327  ;;  %v7438_v30 = vadd.f32 1.4214138, %v7432_v49  ;;  %11335 = vpow2.f32 %v7486_v37 }
0x1087   : > { %v13674_v26 = vpop.eup %11329  ;;  %v7445_v57 = vmul.f32 %v11324_v38, %v7439_v45  ;;  %v7423_v43 = vmul.f32 1.0614054, %v13672_v47  ;;  %11337 = vrcp.f32 %v7406_v16  ;;  %v7496_v45 = vmul.f32 1.442695, %v7485_v11 }
0x1088   : > { %v7444_v63 = vmul.f32 %v11326_v46, %v7438_v30  ;;  %v7422_v50 = vmul.f32 1.0614054, %v13674_v26  ;;  %11339 = vpow2.f32 %v7492_v33  ;;  %v7385_v16 = vsel %vm7379_vm11, -1.0, %v11435_v7 }
0x1089   : > { %v7451_v27 = vadd.f32 -0.28449672, %v7445_v57  ;;  %v7429_v5 = vadd.f32 -1.4531521, %v7423_v43  ;;  %11341 = vpow2.f32 %v7490_v28  ;;  %v7384_v57 = vsel %vm7378_vm12, -1.0, %v11435_v7 }
0x108a   : > { %v7450_v36 = vadd.f32 -0.28449672, %v7444_v63  ;;  %v7428_v0 = vadd.f32 -1.4531521, %v7422_v50  ;;  %11343 = vpow2.f32 %v7496_v45  ;;  %v7369_v45 = vmul.f32 0.5, %v13648_v6 }
0x108b   : > { %v7457_v22 = vmul.f32 %v11324_v38, %v7451_v27  ;;  %v7435_v8 = vmul.f32 %v13672_v47, %v7429_v5  ;;  %v7494_v5 = vmul.f32 1.442695, %v7484_v39  ;;  %v7368_v39 = vmul.f32 0.5, %v13650_v51 }
0x108c   : > { %v7456_v14 = vmul.f32 %v11326_v46, %v7450_v36  ;;  %v7434_v58 = vmul.f32 %v13674_v26, %v7428_v0 }
0x108d   : > { %v7463_v61 = vadd.f32 0.2548296, %v7457_v22  ;;  %v7441_v34 = vadd.f32 1.4214138, %v7435_v8  ;;  %11345 = vpow2.f32 %v7494_v5 }
0x108e   : > { %v13680_v59 = vpop.eup %11331  ;;  %v7462_v52 = vadd.f32 0.2548296, %v7456_v14  ;;  %v7440_v12 = vadd.f32 1.4214138, %v7434_v58  ;;  %v7366_v14 = vmul.f32 0.5, %v13638_v15 }
0x108f   : > { %v11334_v29 = vpop.eup %11333  ;;  %v7469_v42 = vmul.f32 %v11324_v38, %v7463_v61  ;;  %v7447_v31 = vmul.f32 %v13672_v47, %v7441_v34  ;;  %v7425_v10 = vmul.f32 1.0614054, %v13680_v59 }
0x1090   : > { %v11336_v55 = vpop.eup %11335  ;;  %v7468_v1 = vmul.f32 %v11326_v46, %v7462_v52  ;;  %v7446_v37 = vmul.f32 %v13674_v26, %v7440_v12 }
0x1091   : > { %v13687_v3 = vpop.eup %11337  ;;  %v7499_v19 = vmul.f32 %v11334_v29, %v7469_v42  ;;  %v7453_v62 = vadd.f32 -0.28449672, %v7447_v31  ;;  %v7431_v24 = vadd.f32 -1.4531521, %v7425_v10  ;;  %v7387_v31 = vsel %vm7381_vm13, -1.0, %v11435_v7 }
0x1092   : > { %v7498_v38 = vmul.f32 %v11336_v55, %v7468_v1  ;;  %v7452_v49 = vadd.f32 -0.28449672, %v7446_v37  ;;  %v7424_v23 = vmul.f32 1.0614054, %v13687_v3  ;;  %v11340_v28 = vpop.eup %11339  ;;  %v7386_v55 = vsel %vm7380_vm14, -1.0, %v11435_v7 }
0x1093   : > { %v7505_v30 = vsub.f32 1.0, %v7499_v19  ;;  %v7459_v48 = vmul.f32 %v13672_v47, %v7453_v62  ;;  %v7437_v46 = vmul.f32 %v13680_v59, %v7431_v24  ;;  %v11342_v20 = vpop.eup %11341 }
0x1094   : > { %v7504_v43 = vsub.f32 1.0, %v7498_v38  ;;  %v7458_v44 = vmul.f32 %v13674_v26, %v7452_v49  ;;  %v7430_v54 = vadd.f32 -1.4531521, %v7424_v23  ;;  %v11344_v24 = vpop.eup %11343 }
0x1095   : > { %v7511_v63 = vmul.f32 %v7505_v30, %v7385_v16  ;;  %v7465_v50 = vadd.f32 0.2548296, %v7459_v48  ;;  %v7443_v27 = vadd.f32 1.4214138, %v7437_v46 }
0x1096   : > { %v7510_v33 = vmul.f32 %v7504_v43, %v7384_v57  ;;  %v7464_v36 = vadd.f32 0.2548296, %v7458_v44  ;;  %v7436_v0 = vmul.f32 %v13687_v3, %v7430_v54  ;;  %v7389_v43 = vsel %vm7383_vm15, -1.0, %v11435_v7 }
0x1097   : > { %v7517_v22 = vadd.f32 1.0, %v7511_v63  ;;  %v7471_v8 = vmul.f32 %v13672_v47, %v7465_v50  ;;  %v7449_v53 = vmul.f32 %v13680_v59, %v7443_v27  ;;  %v11346_v48 = vpop.eup %11345  ;;  %v7371_v50 = vmul.f32 0.5, %v13660_v32 }
0x1098   : > { %v7516_v58 = vadd.f32 1.0, %v7510_v33  ;;  %v7470_v61 = vmul.f32 %v13674_v26, %v7464_v36  ;;  %v7442_v34 = vadd.f32 1.4214138, %v7436_v0 }
0x1099   : > { %v7501_v52 = vmul.f32 %v11340_v28, %v7471_v8  ;;  %v7455_v12 = vadd.f32 -0.28449672, %v7449_v53  ;;  %v7523_v29 = vmul.f32 %v7517_v22, %v7367_v4 }
0x109a   : > { %v7522_v11 = vmul.f32 %v7516_v58, %v7366_v14  ;;  %v7500_v9 = vmul.f32 %v11342_v20, %v7470_v61  ;;  %v7448_v47 = vmul.f32 %v13687_v3, %v7442_v34 }
0x109b   : > { %v7507_v42 = vsub.f32 1.0, %v7501_v52  ;;  %v7461_v15 = vmul.f32 %v13680_v59, %v7455_v12 }
0x109c   : > { %v7506_v26 = vsub.f32 1.0, %v7500_v9  ;;  %v7454_v10 = vadd.f32 -0.28449672, %v7448_v47  ;;  %10484 = vmatprep.mubr.msk.f32.mxu1 %vm3956_vm6, %v7522_v11 }
0x109d   : > { %v7513_v18 = vmul.f32 %v7507_v42, %v7387_v31  ;;  %v7467_v1 = vadd.f32 0.2548296, %v7461_v15  ;;  %10485 = vmatmul.mubr.msk.f32.vlgmr.msra.gmra.mrb[148].mxu1 %vm3956_vm6, %v7523_v29 }
0x109e   : > { %v7512_v41 = vmul.f32 %v7506_v26, %v7386_v55  ;;  %v7460_v37 = vmul.f32 %v13687_v3, %v7454_v10 }
0x109f   : > { %v7519_v19 = vadd.f32 1.0, %v7513_v18  ;;  %v7473_v62 = vmul.f32 %v13680_v59, %v7467_v1 }
0x10a0   : > { %v7518_v38 = vadd.f32 1.0, %v7512_v41  ;;  %v7466_v49 = vadd.f32 0.2548296, %v7460_v37 }
0x10a1   : > { %v7503_v23 = vmul.f32 %v11344_v24, %v7473_v62  ;;  %v7525_v46 = vmul.f32 %v7519_v19, %v7369_v45 }
0x10a2   : > { %v7524_v16 = vmul.f32 %v7518_v38, %v7368_v39  ;;  %v7472_v30 = vmul.f32 %v13687_v3, %v7466_v49  ;;  %v7370_v3 = vmul.f32 0.5, %v13662_v17 }
0x10a3   : > { %v7509_v57 = vsub.f32 1.0, %v7503_v23 }
0x10a4   : > { %v7502_v59 = vmul.f32 %v11346_v48, %v7472_v30  ;;  %10487 = vmatprep.mubr.msk.f32.mxu1 %vm3956_vm6, %v7524_v16 }
0x10a5   : > { %v7515_v51 = vmul.f32 %v7509_v57, %v7389_v43  ;;  %10488 = vmatmul.mubr.msk.f32.gmra.mrb[150].mxu1 %vm3956_vm6, %v7525_v46 }
0x10a6   : > { %v7508_v6 = vsub.f32 1.0, %v7502_v59 }
0x10a7   : > { %v7521_v54 = vadd.f32 1.0, %v7515_v51 }
0x10a8   : > { %v7514_v44 = vmul.f32 %v7508_v6, %v7388_v21  ;;  %v7771_v21 = vld [vmem:[%s14556_s15 + $0x8] sm:$0xff] }
0x10a9   : > { %v7527_v5 = vmul.f32 %v7521_v54, %v7371_v50  ;;  %v7773_v54 = vld [vmem:[%s14556_s15 + $0x18] sm:$0xff]  ;;  %v7770_v50 = vld [vmem:[%s14556_s15] sm:$0xff] }
0x10aa   : > { %v7520_v63 = vadd.f32 1.0, %v7514_v44  ;;  %v7779_v44 = vld [vmem:[%s14556_s15 + $0x48] sm:$0xff] }
0x10ac   : > { %v7526_v27 = vmul.f32 %v7520_v63, %v7370_v3  ;;  %v10973_v3 = vpack.c.bf16 %v7779_v44, %v7771_v21  ;;  %v7781_v63 = vld [vmem:[%s14556_s15 + $0x58] sm:$0xff] }
0x10ae   : > { %10490 = vmatprep.mubr.msk.f32.mxu1 %vm3956_vm6, %v7526_v27  ;;  %v7778_v27 = vld [vmem:[%s14556_s15 + $0x40] sm:$0xff]  ;;  %10974 = vmatprep.subr.bf16.mxu0 %v10973_v3 }
0x10af   : > { %10491 = vmatmul.mubr.msk.f32.gmra.mrb[152].mxu1 %vm3956_vm6, %v7527_v5  ;;  %v11436_v5 = vmov 0.0  }
0x10b0   : > { %7926 = vmatprep.mubr.f32.mxu0 %v11436_v5  ;;  %8015 = vmatprep.mubr.f32.mxu1 %v11436_v5 }
0x1170   : > { %v10486_v33 = vpop.f32.mrb[148].mxu1 }
0x1171   : > { %v7635_v36 = vadd.f32 %v10486_v33, %v9011_v35  ;;  %v7629_v0 = vpop.f32.mrb[149].mxu1  ;;  %v10975_v33 = vpack.c.bf16 %v7778_v27, %v7770_v50 }
0x1172   : > { %v7630_v4 = vadd.f32 %v9011_v35, %v7629_v0  ;;  %v7780_v0 = vld [vmem:[%s14556_s15 + $0x50] sm:$0xff] }
0x1173   : > { %v7659_v22 = vadd.f32 %v7635_v36, %v13583_v2  ;;  %v7772_v36 = vld [vmem:[%s14556_s15 + $0x10] sm:$0xff]  ;;  %10976 = vmatpush1.bf16.msra.mxu0 %v10975_v33 }
0x1174   : > { %v7658_v17 = vadd.f32 %v7630_v4, %v13581_v60  ;;  %v7787_v4 = vld [vmem:[%s14556_s15 + $0x88] sm:$0xff] }
0x1175   : > { %v7671_v32 = vsel %vm613_vm0, %v7659_v22, 0.0 }
0x1176   : > { %7672 = vadd.xlane.f32.xlu1 %v7671_v32  ;;  %v7668_v8 = vsel %vm613_vm0, %v7658_v17, 0.0  ;;  %v7789_v32 = vld [vmem:[%s14556_s15 + $0x98] sm:$0xff] }
0x1177   : > { %7669 = vadd.xlane.f32.xlu0 %v7668_v8  ;;  %v7797_v8 = vld [vmem:[%s14556_s15 + $0xd8] sm:$0xff] }
0x1178   : > { %v10489_v53 = vpop.f32.mrb[150].mxu1 }
0x1179   : > { %v7645_v28 = vadd.f32 %v10489_v53, %v9011_v35  ;;  %v7639_v14 = vpop.f32.mrb[151].mxu1 }
0x117a   : > { %v7640_v58 = vadd.f32 %v9011_v35, %v7639_v14  ;;  %v7786_v14 = vld [vmem:[%s14556_s15 + $0x80] sm:$0xff] }
0x117b   : > { %v7661_v61 = vadd.f32 %v7645_v28, %v13593_v56  ;;  %v10989_v28 = vpack.c.bf16 %v7797_v8, %v7789_v32 }
0x117c   : > { %v7660_v34 = vadd.f32 %v7640_v58, %v13591_v25  ;;  %v7794_v58 = vld [vmem:[%s14556_s15 + $0xc0] sm:$0xff] }
0x117d   : > { %v7677_v20 = vsel %vm613_vm0, %v7661_v61, 0.0 }
0x117e   : > { %7678 = vadd.xlane.f32.xlu1 %v7677_v20  ;;  %v7674_v2 = vsel %vm613_vm0, %v7660_v34, 0.0  ;;  %v7796_v20 = vld [vmem:[%s14556_s15 + $0xd0] sm:$0xff] }
0x117f   : > { %7675 = vadd.xlane.f32.xlu0 %v7674_v2  ;;  %v7803_v2 = vld [vmem:[%s14556_s15 + $0x108] sm:$0xff] }
0x1182   : > { %v10492_v60 = vpop.f32.mrb[152].mxu1 }
0x1183   : > { %v7655_v52 = vadd.f32 %v10492_v60, %v9011_v35  ;;  %v7649_v12 = vpop.f32.mrb[153].mxu1  ;;  %v7811_v60 = vld [vmem:[%s14556_s15 + $0x148] sm:$0xff] }
0x1184   : > { %v7650_v11 = vadd.f32 %v9011_v35, %v7649_v12  ;;  %v10985_v35 = vpack.c.bf16 %v7781_v63, %v7773_v54  ;;  %v10981_v12 = vpack.c.bf16 %v7811_v60, %v7803_v2 }
0x1185   : > { %v7663_v9 = vadd.f32 %v7655_v52, %v13603_v13 }
0x1186   : > { %v7662_v47 = vadd.f32 %v7650_v11, %v13601_v40  ;;  %10986 = vmatprep.subr.bf16.mxu1 %v10985_v35  ;;  %v7805_v11 = vld [vmem:[%s14556_s15 + $0x118] sm:$0xff] }
0x1187   : > { %v7683_v29 = vsel %vm613_vm0, %v7663_v9, 0.0 }
0x1188   : > { %7684 = vadd.xlane.f32.xlu1 %v7683_v29  ;;  %v7680_v56 = vsel %vm613_vm0, %v7662_v47, 0.0 }
0x1189   : > { %7681 = vadd.xlane.f32.xlu0 %v7680_v56  ;;  %v7810_v56 = vld [vmem:[%s14556_s15 + $0x140] sm:$0xff] }
0x1203   : > { %v7673_v25 = vpop.xlane.xlu1 %7672 }
0x1204   : > { %v7687_v42 = vmul.f32 0.03125, %v7673_v25  ;;  %v7670_v15 = vpop.xlane.xlu0 %7669  ;;  %v7804_v25 = vld [vmem:[%s14556_s15 + $0x110] sm:$0xff] }
0x1205   : > { %v7686_v31 = vmul.f32 0.03125, %v7670_v15 }
0x1206   : > { %v13741_v26 = vsub.f32 %v7659_v22, %v7687_v42  ;;  %v10987_v22 = vpack.c.bf16 %v7780_v0, %v7772_v36  ;;  %v7812_v42 = vld [vmem:[%s14556_s15 + $0x150] sm:$0xff]  ;;  %v7775_v0 = vld [vmem:[%s14556_s15 + $0x28] sm:$0xff] }
0x1207   : > { %v13743_v10 = vsub.f32 %v7658_v17, %v7686_v31  ;;  %v7795_v17 = vld [vmem:[%s14556_s15 + $0xc8] sm:$0xff]  ;;  %v10995_v31 = vpack.c.bf16 %v7812_v42, %v7804_v25 }
0x1208   : > { %v7699_v18 = vmul.f32 %v13741_v26, %v13741_v26  ;;  %v10977_v53 = vpack.c.bf16 %v7795_v17, %v7787_v4  ;;  %10988 = vmatpush1.bf16.msra.mxu1 %v10987_v22  ;;  %v7783_v4 = vld [vmem:[%s14556_s15 + $0x68] sm:$0xff]  ;;  %v7777_v22 = vld [vmem:[%s14556_s15 + $0x38] sm:$0xff] }
0x1209   : > { %v7698_v40 = vmul.f32 %v13743_v10, %v13743_v10  ;;  %10990 = vmatprep.subr.bf16.mxu1 %v10989_v28  ;;  %v10997_v32 = vpack.c.bf16 %v7783_v4, %v7775_v0 }
0x120a   : > { %v7707_v13 = vsel %vm613_vm0, %v7699_v18, 0.0  ;;  %10978 = vmatprep.subr.bf16.mxu0 %v10977_v53 }
0x120b   : > { %v7679_v55 = vpop.xlane.xlu1 %7678  ;;  %7708 = vadd.xlane.f32.xlu1 %v7707_v13  ;;  %v7704_v1 = vsel %vm613_vm0, %v7698_v40, 0.0 }
0x120c   : > { %v7689_v41 = vmul.f32 0.03125, %v7679_v55  ;;  %7705 = vadd.xlane.f32.xlu0 %v7704_v1  ;;  %v7676_v37 = vpop.xlane.xlu0 %7675 }
0x120d   : > { %v7688_v19 = vmul.f32 0.03125, %v7676_v37 }
0x120e   : > { %v13751_v62 = vsub.f32 %v7661_v61, %v7689_v41  ;;  %v7788_v61 = vld [vmem:[%s14556_s15 + $0x90] sm:$0xff] }
0x120f   : > { %v13753_v24 = vsub.f32 %v7660_v34, %v7688_v19  ;;  %v10979_v34 = vpack.c.bf16 %v7794_v58, %v7786_v14  ;;  %v10991_v52 = vpack.c.bf16 %v7796_v20, %v7788_v61 }
0x1210   : > { %v7701_v39 = vmul.f32 %v13751_v62, %v13751_v62 }
0x1211   : > { %v7700_v38 = vmul.f32 %v13753_v24, %v13753_v24  ;;  %10980 = vmatpush1.bf16.msra.mxu0 %v10979_v34  ;;  %10992 = vmatpush1.bf16.msra.mxu1 %v10991_v52 }
0x1212   : > { %v7713_v49 = vsel %vm613_vm0, %v7701_v39, 0.0  ;;  %10982 = vmatprep.subr.bf16.mxu0 %v10981_v12  ;;  %v7774_v12 = vld [vmem:[%s14556_s15 + $0x20] sm:$0xff] }
0x1213   : > { %7714 = vadd.xlane.f32.xlu1 %v7713_v49  ;;  %v7710_v45 = vsel %vm613_vm0, %v7700_v38, 0.0 }
0x1214   : > { %7711 = vadd.xlane.f32.xlu0 %v7710_v45 }
0x1215   : > { %v7685_v23 = vpop.xlane.xlu1 %7684 }
0x1216   : > { %v7691_v16 = vmul.f32 0.03125, %v7685_v23  ;;  %v7682_v30 = vpop.xlane.xlu0 %7681 }
0x1217   : > { %v7690_v48 = vmul.f32 0.03125, %v7682_v30  ;;  %v9020_v30 = vld [vmem:[%s14554_s13 + $0x1] ss:$0 sm:$0xff] }
0x1218   : > { %v13761_v46 = vsub.f32 %v7663_v9, %v7691_v16  ;;  %v7813_v9 = vld [vmem:[%s14556_s15 + $0x158] sm:$0xff] }
0x1219   : > { %v13763_v57 = vsub.f32 %v7662_v47, %v7690_v48  ;;  %v7802_v47 = vld [vmem:[%s14556_s15 + $0x100] sm:$0xff]  ;;  %v10993_v29 = vpack.c.bf16 %v7813_v9, %v7805_v11  ;;  %v7791_v9 = vld [vmem:[%s14556_s15 + $0xa8] sm:$0xff] }
0x121a   : > { %v7703_v43 = vmul.f32 %v13761_v46, %v13761_v46  ;;  %v10983_v15 = vpack.c.bf16 %v7810_v56, %v7802_v47  ;;  %v7782_v11 = vld [vmem:[%s14556_s15 + $0x60] sm:$0xff]  ;;  %v7799_v47 = vld [vmem:[%s14556_s15 + $0xe8] sm:$0xff]  ;;  %v7801_v56 = vld [vmem:[%s14556_s15 + $0xf8] sm:$0xff] }
0x121b   : > { %v7702_v59 = vmul.f32 %v13763_v57, %v13763_v57  ;;  %10994 = vmatprep.subr.bf16.mxu1 %v10993_v29  ;;  %v7793_v29 = vld [vmem:[%s14556_s15 + $0xb8] sm:$0xff]  ;;  %v10999_v25 = vpack.c.bf16 %v7782_v11, %v7774_v12 }
0x121c   : > { %v7719_v51 = vsel %vm613_vm0, %v7703_v43, 0.0  ;;  %10984 = vmatpush1.bf16.msra.mxu0 %v10983_v15  ;;  %10996 = vmatpush1.bf16.msra.mxu1 %v10995_v31  ;;  %v7790_v15 = vld [vmem:[%s14556_s15 + $0xa0] sm:$0xff] }
0x121d   : > { %7720 = vadd.xlane.f32.xlu1 %v7719_v51  ;;  %v7716_v6 = vsel %vm613_vm0, %v7702_v59, 0.0  ;;  %v9021_v51 = vld [vmem:[%s14555_s14 + $0x1] ss:$0 sm:$0xff]  ;;  %10998 = vmatprep.subr.bf16.mxu0 %v10997_v32 }
0x121e   : > { %7717 = vadd.xlane.f32.xlu0 %v7716_v6  ;;  %v7798_v31 = vld [vmem:[%s14556_s15 + $0xe0] sm:$0xff] }
0x1298   : > { %v7709_v18 = vpop.xlane.xlu1 %7708 }
0x1299   : > { %v7723_v40 = vmul.f32 0.03125, %v7709_v18  ;;  %v7706_v13 = vpop.xlane.xlu0 %7705 }
0x129a   : > { %v7722_v55 = vmul.f32 0.03125, %v7706_v13  ;;  %v11013_v13 = vpack.c.bf16 %v7801_v56, %v7793_v29 }
0x129b   : > { %v7729_v1 = vadd.f32 1e-06, %v7723_v40  ;;  %v11001_v40 = vpack.c.bf16 %v7799_v47, %v7791_v9 }
0x129c   : > { %v7728_v41 = vadd.f32 1e-06, %v7722_v55  ;;  %v7792_v55 = vld [vmem:[%s14556_s15 + $0xb0] sm:$0xff] }
0x129d   : > { %11347 = vrsqrt.f32 %v7729_v1  ;;  %v7800_v1 = vld [vmem:[%s14556_s15 + $0xf0] sm:$0xff] }
0x129e   : > { %11349 = vrsqrt.f32 %v7728_v41  ;;  %v7807_v41 = vld [vmem:[%s14556_s15 + $0x128] sm:$0xff] }
0x12a0   : > { %v7715_v37 = vpop.xlane.xlu1 %7714 }
0x12a1   : > { %v7725_v19 = vmul.f32 0.03125, %v7715_v37  ;;  %v7712_v39 = vpop.xlane.xlu0 %7711  ;;  %v7815_v37 = vld [vmem:[%s14556_s15 + $0x168] sm:$0xff] }
0x12a2   : > { %v7724_v38 = vmul.f32 0.03125, %v7712_v39  ;;  %v7817_v39 = vld [vmem:[%s14556_s15 + $0x178] sm:$0xff] }
0x12a3   : > { %v7731_v49 = vadd.f32 1e-06, %v7725_v19  ;;  %v7809_v19 = vld [vmem:[%s14556_s15 + $0x138] sm:$0xff] }
0x12a4   : > { %v7730_v45 = vadd.f32 1e-06, %v7724_v38  ;;  %v11003_v38 = vpack.c.bf16 %v7798_v31, %v7790_v15 }
0x12a5   : > { %11351 = vrsqrt.f32 %v7731_v49  ;;  %v11015_v49 = vpack.c.bf16 %v7800_v1, %v7792_v55 }
0x12a6   : > { %11353 = vrsqrt.f32 %v7730_v45  ;;  %v7806_v45 = vld [vmem:[%s14556_s15 + $0x120] sm:$0xff] }
0x12a7   : > { %v11348_v23 = vpop.eup %11347 }
0x12a8   : > { %v11350_v16 = vpop.eup %11349  ;;  %v7741_v43 = vmul.f32 %v11348_v23, %v13741_v26 }
0x12a9   : > { %v7740_v48 = vmul.f32 %v11350_v16, %v13743_v10  ;;  %v11005_v16 = vpack.c.bf16 %v7815_v37, %v7807_v41 }
0x12aa   : > { %v7721_v59 = vpop.xlane.xlu1 %7720  ;;  %v7753_v50 = vmul.f32 %v9020_v30, %v7741_v43  ;;  %v7808_v43 = vld [vmem:[%s14556_s15 + $0x130] sm:$0xff] }
0x12ab   : > { %v7727_v6 = vmul.f32 0.03125, %v7721_v59  ;;  %v7718_v21 = vpop.xlane.xlu0 %7717  ;;  %v7752_v44 = vmul.f32 %v9020_v30, %v7740_v48  ;;  %v7814_v48 = vld [vmem:[%s14556_s15 + $0x160] sm:$0xff]  ;;  %v7816_v59 = vld [vmem:[%s14556_s15 + $0x170] sm:$0xff] }
0x12ac   : > { %v7726_v54 = vmul.f32 0.03125, %v7718_v21  ;;  %v7765_v10 = vadd.f32 %v9021_v51, %v7753_v50 }
0x12ad   : > { %v7733_v3 = vadd.f32 1e-06, %v7727_v6  ;;  %v7764_v63 = vadd.f32 %v9021_v51, %v7752_v44  ;;  %v11019_v6 = vpack.c.bf16 %v7816_v59, %v7808_v43 }
0x12ae   : > { %v7732_v27 = vadd.f32 1e-06, %v7726_v54  ;;  %v8218_v54 = vlaneseq }
0x12af   : > { %v11352_v35 = vpop.eup %11351  ;;  %11355 = vrsqrt.f32 %v7733_v3  ;;  %7818 = vxpose.xlu0.b32.start [1/6] (short) (narrow) %v7764_v63, 32 }
0x12b0   : > { %v11354_v33 = vpop.eup %11353  ;;  %11357 = vrsqrt.f32 %v7732_v27  ;;  %v7743_v36 = vmul.f32 %v11352_v35, %v13751_v62  ;;  %v8219_v3 = vshrl.u32 %v8218_v54, 7  ;;  %v13959_v27 = vand.u32 127, %v8218_v54 }
0x12b1   : > { %v7742_v26 = vmul.f32 %v11354_v33, %v13753_v24  ;;  %v7785_v24 = vld [vmem:[%s14556_s15 + $0x78] sm:$0xff] }
0x12b2   : > { %v11009_v62 = vpack.c.bf16 %v7785_v24, %v7777_v22  ;;  %v7755_v53 = vmul.f32 %v9020_v30, %v7743_v36  ;;  %v8268_v63 = vadd.s32 1, %v8219_v3  ;;  %v8220_v50 = vadd.s32 8, %v8219_v3 }
0x12b3   : > { %7819 = vxpose.xlu0.b32.cont [2/6] (short) (narrow) %v7765_v10, 32  ;;  %v7754_v17 = vmul.f32 %v9020_v30, %v7742_v26  ;;  %v8221_v35 = vadd.s32 16, %v8219_v3  ;;  %v13961_v33 = vmul.u32 32, %v8219_v3  ;;  %v13966_v36 = vadd.s32 256, %v13959_v27 }
0x12b4   : > { %11010 = vmatprep.subr.bf16.mxu1 %v11009_v62  ;;  %v7767_v14 = vadd.f32 %v9021_v51, %v7755_v53  ;;  %v13963_v10 = vmul.u32 32, %v8268_v63  ;;  %v8269_v26 = vadd.s32 1, %v8220_v50  ;;  %v13972_v0 = vadd.s32 384, %v13959_v27 }
0x12b5   : > { %v7766_v8 = vadd.f32 %v9021_v51, %v7754_v17  ;;  %v8270_v4 = vadd.s32 1, %v8221_v35  ;;  %v8222_v22 = vadd.s32 24, %v8219_v3  ;;  %vm8236_vm0 = vcmp.ge.s32.totalorder %v13959_v27, %v13961_v33 }
0x12b6   : > { %vm8276_vm2 = vcmp.lt.s32.totalorder %v13959_v27, %v13963_v10  ;;  %v13978_v17 = vmul.u32 32, %v8220_v50  ;;  %v13980_v32 = vmul.u32 32, %v8269_v26  ;;  %vm8278_vm4 = vcmp.lt.s32.totalorder %v13966_v36, %v13963_v10 }
0x12b7   : > { %7820 = vxpose.xlu0.b32.cont [3/6] (short) (narrow) %v7766_v8, 32  ;;  %vm8239_vm7 = vcmp.ge.s32.totalorder %v13972_v0, %v13961_v33  ;;  %vm13992_vm8 = vmand %vm8236_vm0, %vm8276_vm2  ;;  %vm8279_vm9 = vcmp.lt.s32.totalorder %v13972_v0, %v13963_v10  ;;  %v13998_v62 = vmul.u32 32, %v8221_v35  ;;  %v14000_v8 = vmul.u32 32, %v8270_v4 }
0x12b8   : > { %v8271_v53 = vadd.s32 1, %v8222_v22  ;;  %vm8244_vm11 = vcmp.ge.s32.totalorder %v13959_v27, %v13978_v17  ;;  %vm8284_vm12 = vcmp.lt.s32.totalorder %v13959_v27, %v13980_v32  ;;  %vm8246_vm14 = vcmp.ge.s32.totalorder %v13966_v36, %v13978_v17  ;;  %vm14020_vm1 = vmand %vm8239_vm7, %vm8279_vm9 }
0x12b9   : > { %v11356_v28 = vpop.eup %11355  ;;  %vm8286_vm15 = vcmp.lt.s32.totalorder %v13966_v36, %v13980_v32  ;;  %v14093_v9 = vadd.s32 512, %v13959_v27  ;;  %v14096_v47 = vadd.s32 768, %v13959_v27 }
0x12ba   : > { %v11358_v58 = vpop.eup %11357  ;;  %v7745_v34 = vmul.f32 %v11356_v28, %v13761_v46  ;;  %v7784_v46 = vld [vmem:[%s14556_s15 + $0x70] sm:$0xff]  ;;  %vm14048_vm9 = vmand %vm8246_vm14, %vm8286_vm15 }
0x12bb   : > { %7821 = vxpose.xlu0.b32.cont [4/6] (short) (narrow) %v7767_v14, 32  ;;  %v7744_v61 = vmul.f32 %v11358_v58, %v13763_v57  ;;  %v7776_v57 = vld [vmem:[%s14556_s15 + $0x30] sm:$0xff]  ;;  %v14018_v58 = vmul.u32 32, %v8222_v22 }
0x12bc   : > { %v7757_v60 = vmul.f32 %v9020_v30, %v7745_v34  ;;  %v11011_v42 = vpack.c.bf16 %v7784_v46, %v7776_v57 }
0x12bd   : > { %v7756_v20 = vmul.f32 %v9020_v30, %v7744_v61  ;;  %v11017_v30 = vpack.c.bf16 %v7817_v39, %v7809_v19  ;;  %vm8262_vm7 = vcmp.ge.s32.totalorder %v13966_v36, %v14018_v58 }
0x12be   : > { %v7769_v52 = vadd.f32 %v9021_v51, %v7757_v60  ;;  %v14040_v60 = vmul.u32 32, %v8271_v53 }
0x12bf   : > { %v7768_v2 = vadd.f32 %v9021_v51, %v7756_v20  ;;  %v11007_v51 = vpack.c.bf16 %v7814_v48, %v7806_v45 }
0x12c1   : > { %7822 = vxpose.xlu0.b32.cont [5/6] (short) (narrow) %v7768_v2, 32 }
0x12c5   : > { %7823 = vxpose.xlu0.b32.end [6/6] (short) (narrow) %v7769_v52, 32 }
0x1331   : > { %v7834_v18 = vpop.trf.xlu0 }
0x1332   : > { %9022 = vmatmul.mubr.msk.f32.vlgmr.msra.gmra.mrb[158].mxu0 %vm2329_vm3, %v7834_v18  ;;  %9026 = vmatmul.mubr.msk.f32.vlgmr.msra.gmra.mrb[154].mxu1 %vm2329_vm3, %v7834_v18 }
0x1333   : > { %11000 = vmatpush1.bf16.msra.mxu0 %v10999_v25  ;;  %11012 = vmatpush1.bf16.msra.mxu1 %v11011_v42 }
0x1334   : > { %7932 = vmatprep.mubr.f32.mxu0 %v11436_v5  ;;  %8021 = vmatprep.mubr.f32.mxu1 %v11436_v5 }
0x1335   : > { %v7835_v23 = vpop.trf.xlu0  ;;  %11002 = vmatprep.subr.bf16.mxu0 %v11001_v40  ;;  %11014 = vmatprep.subr.bf16.mxu1 %v11013_v13 }
0x1336   : > { %9023 = vmatmul.mubr.msk.f32.gmra.mrb[160].mxu0 %vm2329_vm3, %v7835_v23  ;;  %9027 = vmatmul.mubr.msk.f32.gmra.mrb[156].mxu1 %vm2329_vm3, %v7835_v23 }
0x1337   : > { %7938 = vmatprep.mubr.f32.mxu0 %v11436_v5  ;;  %8027 = vmatprep.mubr.f32.mxu1 %v11436_v5 }
0x1338   : > { %11004 = vmatpush1.bf16.msra.mxu0 %v11003_v38  ;;  %11016 = vmatpush1.bf16.msra.mxu1 %v11015_v49 }
0x1339   : > { %v7836_v21 = vpop.trf.xlu0  ;;  %11006 = vmatprep.subr.bf16.mxu0 %v11005_v16  ;;  %11018 = vmatprep.subr.bf16.mxu1 %v11017_v30  ;;  %v14161_v30 = vadd.s32 640, %v13959_v27 }
0x133a   : > { %9024 = vmatmul.mubr.msk.f32.gmra.mrb[162].mxu0 %vm2329_vm3, %v7836_v21  ;;  %9028 = vmatmul.mubr.msk.f32.gmra.mrb[158].mxu1 %vm2329_vm3, %v7836_v21 }
0x133b   : > { %7944 = vmatprep.mubr.f32.mxu0 %v11436_v5  ;;  %8033 = vmatprep.mubr.f32.mxu1 %v11436_v5 }
0x133c   : > { %11008 = vmatpush1.bf16.msra.mxu0 %v11007_v51  ;;  %11020 = vmatpush1.bf16.msra.mxu1 %v11019_v6  ;;  %v14180_v51 = vadd.s32 896, %v13959_v27 }
0x133d   : > { %v7837_v44 = vpop.trf.xlu0 }
0x133e   : > { %9025 = vmatmul.mubr.msk.f32.gmra.mrb[164].mxu0 %vm2329_vm3, %v7837_v44  ;;  %9029 = vmatmul.mubr.msk.f32.gmra.mrb[160].mxu1 %vm2329_vm3, %v7837_v44 }
0x133f   : > { %8104 = vmatprep.mubr.f32.mxu0 %v11436_v5  ;;  %8193 = vmatprep.mubr.f32.mxu1 %v11436_v5 }
0x1342   : > { %9030 = vmatmul.mubr.msk.f32.vlgmr.msra.gmra.mrb[166].mxu0 %vm2329_vm3, %v7834_v18  ;;  %9034 = vmatmul.mubr.msk.f32.vlgmr.msra.gmra.mrb[162].mxu1 %vm2329_vm3, %v7834_v18 }
0x1343   : > { %8110 = vmatprep.mubr.f32.mxu0 %v11436_v5  ;;  %8199 = vmatprep.mubr.f32.mxu1 %v11436_v5 }
0x1346   : > { %9031 = vmatmul.mubr.msk.f32.gmra.mrb[168].mxu0 %vm2329_vm3, %v7835_v23  ;;  %9035 = vmatmul.mubr.msk.f32.gmra.mrb[164].mxu1 %vm2329_vm3, %v7835_v23 }
0x1347   : > { %8116 = vmatprep.mubr.f32.mxu0 %v11436_v5  ;;  %8205 = vmatprep.mubr.f32.mxu1 %v11436_v5 }
0x134a   : > { %9032 = vmatmul.mubr.msk.f32.gmra.mrb[170].mxu0 %vm2329_vm3, %v7836_v21  ;;  %9036 = vmatmul.mubr.msk.f32.gmra.mrb[166].mxu1 %vm2329_vm3, %v7836_v21 }
0x134b   : > { %8122 = vmatprep.mubr.f32.mxu0 %v11436_v5  ;;  %8211 = vmatprep.mubr.f32.mxu1 %v11436_v5  ;;  %v13969_v5 = vadd.s32 128, %v13959_v27 }
0x134d   : > { %vm8237_vm5 = vcmp.ge.s32.totalorder %v13969_v5, %v13961_v33  ;;  %vm8277_vm6 = vcmp.lt.s32.totalorder %v13969_v5, %v13963_v10  ;;  %vm8245_vm0 = vcmp.ge.s32.totalorder %v13969_v5, %v13978_v17  ;;  %vm8285_vm2 = vcmp.lt.s32.totalorder %v13969_v5, %v13980_v32 }
0x134e   : > { %9033 = vmatmul.mubr.msk.f32.gmra.mrb[172].mxu0 %vm2329_vm3, %v7837_v44  ;;  %9037 = vmatmul.mubr.msk.f32.gmra.mrb[168].mxu1 %vm2329_vm3, %v7837_v44  ;;  %vm8238_vm3 = vcmp.ge.s32.totalorder %v13966_v36, %v13961_v33  ;;  %vm14010_vm13 = vmand %vm8237_vm5, %vm8277_vm6  ;;  %vm8287_vm5 = vcmp.lt.s32.totalorder %v13972_v0, %v13980_v32  ;;  %vm8260_vm6 = vcmp.ge.s32.totalorder %v13959_v27, %v14018_v58 }
0x134f   : > { %vm14002_vm10 = vmand %vm8238_vm3, %vm8278_vm4  ;;  %vm8247_vm3 = vcmp.ge.s32.totalorder %v13972_v0, %v13978_v17 }
0x1350   : > { %vm14030_vm4 = vmand %vm8244_vm11, %vm8284_vm12  ;;  %vm8294_vm12 = vcmp.lt.s32.totalorder %v13966_v36, %v14000_v8  ;;  %vm8295_vm11 = vcmp.lt.s32.totalorder %v13972_v0, %v14000_v8 }
0x1351   : > { %vm14066_vm14 = vmand %vm8245_vm0, %vm8285_vm2  ;;  %vm8300_vm2 = vcmp.lt.s32.totalorder %v13959_v27, %v14040_v60 }
0x1352   : > { %vm14084_vm0 = vmand %vm8247_vm3, %vm8287_vm5  ;;  %vm14608_vm3 = vcmp.lt.s32.totalorder %v13959_v27, %v14000_v8  ;;  %vm14609_vm5 = vcmp.ge.s32.totalorder %v13959_v27, %v13998_v62 }
0x1353   : > { %vm14108_vm15 = vmand %vm14609_vm5, %vm14608_vm3  ;;  %vm8240_vm5 = vcmp.ge.s32.totalorder %v14093_v9, %v13961_v33 }
0x1405   : > { %v7928_v34 = vpop.f32.mrb[158].mxu0  ;;  %v8017_v20 = vpop.f32.mrb[154].mxu1 }
0x1406   : > { %v7930_v52 = vpop.f32.mrb[159].mxu0  ;;  %v8019_v12 = vpop.f32.mrb[155].mxu1  ;;  %v8340_v29 = vsel %vm13992_vm8, %v7928_v34, 0.0  ;;  %v8342_v56 = vsel %vm14002_vm10, %v8017_v20, 0.0  ;;  %vm8302_vm8 = vcmp.lt.s32.totalorder %v13966_v36, %v14040_v60  ;;  %vm14612_vm10 = vcmp.ge.s32.totalorder %v13966_v36, %v13998_v62 }
0x1407   : > { %v8341_v31 = vsel %vm14010_vm13, %v7930_v52, 0.0  ;;  %v8343_v18 = vsel %vm14020_vm1, %v8019_v12, 0.0  ;;  %vm14130_vm3 = vmand %vm14612_vm10, %vm8294_vm12  ;;  %vm14615_vm13 = vcmp.lt.s32.totalorder %v13969_v5, %v14000_v8  ;;  %vm14616_vm1 = vcmp.ge.s32.totalorder %v13969_v5, %v13998_v62 }
0x1408   : > { %vm8280_vm10 = vcmp.lt.s32.totalorder %v14093_v9, %v13963_v10 }
0x1409   : > { %v7934_v25 = vpop.f32.mrb[160].mxu0  ;;  %v8023_v42 = vpop.f32.mrb[156].mxu1 }
0x140a   : > { %v8348_v40 = vsel %vm14030_vm4, %v7934_v25, 0.0  ;;  %v8350_v13 = vsel %vm14048_vm9, %v8023_v42, 0.0  ;;  %v7936_v55 = vpop.f32.mrb[161].mxu0  ;;  %v8025_v1 = vpop.f32.mrb[157].mxu1  ;;  %vm14144_vm4 = vmand %vm14616_vm1, %vm14615_vm13  ;;  %vm14619_vm9 = vcmp.ge.s32.totalorder %v13972_v0, %v13998_v62  ;;  %vm8241_vm1 = vcmp.ge.s32.totalorder %v14161_v30, %v13961_v33 }
0x140b   : > { %v8372_v37 = vadd.f32 %v8348_v40, %v8340_v29  ;;  %v8390_v19 = vadd.f32 %v8350_v13, %v8342_v56  ;;  %v8349_v39 = vsel %vm14066_vm14, %v7936_v55, 0.0  ;;  %v8351_v38 = vsel %vm14084_vm0, %v8025_v1, 0.0  ;;  %vm14154_vm12 = vmand %vm14619_vm9, %vm8295_vm11 }
0x140c   : > { %v8381_v45 = vadd.f32 %v8349_v39, %v8341_v31  ;;  %v8399_v23 = vadd.f32 %v8351_v38, %v8343_v18  ;;  %vm8301_vm14 = vcmp.lt.s32.totalorder %v13969_v5, %v14040_v60  ;;  %vm14169_vm0 = vmand %vm8260_vm6, %vm8300_vm2  ;;  %vm8303_vm11 = vcmp.lt.s32.totalorder %v13972_v0, %v14040_v60 }
0x140d   : > { %v7940_v48 = vpop.f32.mrb[162].mxu0  ;;  %v8029_v43 = vpop.f32.mrb[158].mxu1  ;;  %vm14192_vm6 = vmand %vm8262_vm7, %vm8302_vm8  ;;  %vm8242_vm2 = vcmp.ge.s32.totalorder %v14096_v47, %v13961_v33  ;;  %vm14626_vm7 = vcmp.ge.s32.totalorder %v13969_v5, %v14018_v58  ;;  %v14638_v29 = vmov 0 }
0x140e   : > { %v8356_v6 = vsel %vm14108_vm15, %v7940_v48, 0.0  ;;  %v8358_v21 = vsel %vm14130_vm3, %v8029_v43, 0.0  ;;  %v7942_v44 = vpop.f32.mrb[163].mxu0  ;;  %v8031_v54 = vpop.f32.mrb[159].mxu1  ;;  %vm8282_vm15 = vcmp.lt.s32.totalorder %v14096_v47, %v13963_v10  ;;  %vm14210_vm8 = vmand %vm14626_vm7, %vm8301_vm14  ;;  %vm14629_vm3 = vcmp.ge.s32.totalorder %v13972_v0, %v14018_v58 }
0x140f   : > { %v8373_v63 = vadd.f32 %v8372_v37, %v8356_v6  ;;  %v8391_v50 = vadd.f32 %v8390_v19, %v8358_v21  ;;  %v8357_v27 = vsel %vm14144_vm4, %v7942_v44, 0.0  ;;  %v8359_v35 = vsel %vm14154_vm12, %v8031_v54, 0.0  ;;  %vm14220_vm13 = vmand %vm14629_vm3, %vm8303_vm11 }
0x1410   : > { %v8382_v36 = vadd.f32 %v8381_v45, %v8357_v27  ;;  %v8400_v4 = vadd.f32 %v8399_v23, %v8359_v35  ;;  %vm8281_vm4 = vcmp.lt.s32.totalorder %v14161_v30, %v13963_v10  ;;  %vm14234_vm9 = vmand %vm8240_vm5, %vm8280_vm10  ;;  %vm8243_vm12 = vcmp.ge.s32.totalorder %v14180_v51, %v13961_v33 }
0x1411   : > { %v7946_v5 = vpop.f32.mrb[164].mxu0  ;;  %v8035_v24 = vpop.f32.mrb[160].mxu1  ;;  %vm8283_vm14 = vcmp.lt.s32.totalorder %v14180_v51, %v13963_v10  ;;  %vm8248_vm11 = vcmp.ge.s32.totalorder %v14093_v9, %v13978_v17  ;;  %vm8288_vm7 = vcmp.lt.s32.totalorder %v14093_v9, %v13980_v32  ;;  %vm14256_vm5 = vmand %vm8242_vm2, %vm8282_vm15  ;;  %vm8250_vm10 = vcmp.ge.s32.totalorder %v14096_v47, %v13978_v17 }
0x1412   : > { %v8364_v53 = vsel %vm14169_vm0, %v7946_v5, 0.0  ;;  %v8366_v28 = vsel %vm14192_vm6, %v8035_v24, 0.0  ;;  %v7948_v14 = vpop.f32.mrb[165].mxu0  ;;  %v8037_v61 = vpop.f32.mrb[161].mxu1  ;;  %vm8290_vm0 = vcmp.lt.s32.totalorder %v14096_v47, %v13980_v32  ;;  %vm14278_vm6 = vmand %vm8241_vm1, %vm8281_vm4  ;;  %vm8249_vm15 = vcmp.ge.s32.totalorder %v14161_v30, %v13978_v17 }
0x1413   : > { %v14264_v20 = vadd.f32 %v8373_v63, %v8364_v53  ;;  %v14266_v2 = vadd.f32 %v8391_v50, %v8366_v28  ;;  %v8365_v52 = vsel %vm14210_vm8, %v7948_v14, 0.0  ;;  %v8367_v12 = vsel %vm14220_vm13, %v8037_v61, 0.0  ;;  %vm14292_vm2 = vmand %vm8243_vm12, %vm8283_vm14 }
0x1414   : > { %v14282_v57 = vadd.f32 %v8382_v36, %v8365_v52  ;;  %v14284_v46 = vadd.f32 %v8400_v4, %v8367_v12  ;;  %v14639_v29 = vsel %vm14292_vm2, 4294967295, %v14638_v29  ;;  %vm8289_vm8 = vcmp.lt.s32.totalorder %v14161_v30, %v13980_v32  ;;  %vm14306_vm3 = vmand %vm8248_vm11, %vm8288_vm7 }
0x1415   : > { %v8106_v56 = vpop.f32.mrb[166].mxu0  ;;  %v8195_v25 = vpop.f32.mrb[162].mxu1  ;;  %vm8251_vm13 = vcmp.ge.s32.totalorder %v14180_v51, %v13978_v17  ;;  %vm8291_vm1 = vcmp.lt.s32.totalorder %v14180_v51, %v13980_v32  ;;  %vm14320_vm4 = vmand %vm8250_vm10, %vm8290_vm0  ;;  %vm8298_vm7 = vcmp.lt.s32.totalorder %v14096_v47, %v14000_v8  ;;  %vm8259_vm12 = vcmp.ge.s32.totalorder %v14180_v51, %v13998_v62 }
0x1416   : > { %v8108_v10 = vpop.f32.mrb[167].mxu0  ;;  %v8197_v42 = vpop.f32.mrb[163].mxu1  ;;  %vm14332_vm2 = vmand %vm8249_vm15, %vm8289_vm8  ;;  %vm8299_vm14 = vcmp.lt.s32.totalorder %v14180_v51, %v14000_v8  ;;  %vm8304_vm8 = vcmp.lt.s32.totalorder %v14093_v9, %v14040_v60  ;;  %v8375_v31 = vrot.slane %v14264_v20, 4  ;;  %v8393_v18 = vrot.slane %v14266_v2, 4 }
0x1417   : > { %vm14344_vm11 = vmand %vm8251_vm13, %vm8291_vm1  ;;  %vm14648_vm13 = vcmp.lt.s32.totalorder %v14093_v9, %v14000_v8  ;;  %vm14649_vm1 = vcmp.ge.s32.totalorder %v14093_v9, %v13998_v62  ;;  %vm8265_vm10 = vcmp.ge.s32.totalorder %v14161_v30, %v14018_v58  ;;  %vm8305_vm0 = vcmp.lt.s32.totalorder %v14161_v30, %v14040_v60 }
0x1418   : > { %vm14364_vm15 = vmand %vm14649_vm1, %vm14648_vm13  ;;  %v8344_v1 = vsel %vm14234_vm9, %v8106_v56, 0.0  ;;  %v8346_v41 = vsel %vm14256_vm5, %v8195_v25, 0.0  ;;  %vm14652_vm13 = vcmp.ge.s32.totalorder %v14096_v47, %v13998_v62  ;;  %v8384_v45 = vrot.slane %v14282_v57, 4 }
0x1419   : > { %v8112_v40 = vpop.f32.mrb[168].mxu0  ;;  %v8201_v13 = vpop.f32.mrb[164].mxu1  ;;  %vm14386_vm1 = vmand %vm14652_vm13, %vm8298_vm7  ;;  %v8402_v23 = vrot.slane %v14284_v46, 4  ;;  %vm14655_vm9 = vcmp.lt.s32.totalorder %v14161_v30, %v14000_v8  ;;  %vm14656_vm5 = vcmp.ge.s32.totalorder %v14161_v30, %v13998_v62  ;;  %v8345_v59 = vsel %vm14278_vm6, %v8108_v10, 0.0 }
0x141a   : > { %v8352_v37 = vsel %vm14306_vm3, %v8112_v40, 0.0  ;;  %v8354_v19 = vsel %vm14320_vm4, %v8201_v13, 0.0  ;;  %v8114_v39 = vpop.f32.mrb[169].mxu0  ;;  %v8203_v38 = vpop.f32.mrb[165].mxu1  ;;  %vm14398_vm3 = vmand %vm14656_vm5, %vm14655_vm9  ;;  %vm14659_vm4 = vnez %v14639_v29  ;;  %vm14662_vm6 = vcmp.ge.s32.totalorder %v14093_v9, %v14018_v58 }
0x141b   : > { %v8408_v16 = vadd.f32 %v8352_v37, %v8344_v1  ;;  %v8426_v48 = vadd.f32 %v8354_v19, %v8346_v41  ;;  %v8347_v6 = vsel %vm14659_vm4, %v8197_v42, 0.0  ;;  %v8353_v21 = vsel %vm14332_vm2, %v8114_v39, 0.0  ;;  %vm14416_vm7 = vmand %vm8259_vm12, %vm8299_vm14 }
0x141c   : > { %v8355_v44 = vsel %vm14344_vm11, %v8203_v38, 0.0  ;;  %v8417_v3 = vadd.f32 %v8353_v21, %v8345_v59  ;;  %vm14426_vm2 = vmand %vm14662_vm6, %vm8304_vm8  ;;  %vm8267_vm12 = vcmp.ge.s32.totalorder %v14180_v51, %v14018_v58  ;;  %vm8307_vm14 = vcmp.lt.s32.totalorder %v14180_v51, %v14040_v60 }
0x141d   : > { %v8435_v63 = vadd.f32 %v8355_v44, %v8347_v6  ;;  %v8118_v50 = vpop.f32.mrb[170].mxu0  ;;  %v8207_v27 = vpop.f32.mrb[166].mxu1  ;;  %v8376_v62 = vadd.f32 %v8375_v31, %v14264_v20  ;;  %v8394_v8 = vadd.f32 %v8393_v18, %v14266_v2  ;;  %vm14665_vm11 = vcmp.lt.s32.totalorder %v14096_v47, %v14040_v60 }
0x141e   : > { %v8360_v26 = vsel %vm14364_vm15, %v8118_v50, 0.0  ;;  %v8362_v9 = vsel %vm14386_vm1, %v8207_v27, 0.0  ;;  %v8120_v36 = vpop.f32.mrb[171].mxu0  ;;  %v8209_v4 = vpop.f32.mrb[167].mxu1  ;;  %vm14666_vm8 = vcmp.ge.s32.totalorder %v14096_v47, %v14018_v58  ;;  %vm14456_vm15 = vmand %vm8265_vm10, %vm8305_vm0  ;;  %v8385_v53 = vadd.f32 %v8384_v45, %v14282_v57 }
0x141f   : > { %vm14446_vm13 = vmand %vm14666_vm8, %vm14665_vm11  ;;  %v8409_v5 = vadd.f32 %v8408_v16, %v8360_v26  ;;  %v8427_v24 = vadd.f32 %v8426_v48, %v8362_v9  ;;  %v8403_v47 = vadd.f32 %v8402_v23, %v14284_v46  ;;  %v8361_v28 = vsel %vm14398_vm3, %v8120_v36, 0.0 }
0x1420   : > { %v8363_v14 = vsel %vm14416_vm7, %v8209_v4, 0.0  ;;  %vm14472_vm10 = vmand %vm8267_vm12, %vm8307_vm14  ;;  %v8418_v61 = vadd.f32 %v8417_v3, %v8361_v28  ;;  %v8377_v52 = vrot.slane %v8376_v62, 2  ;;  %v8395_v12 = vrot.slane %v8394_v8, 2 }
0x1421   : > { %v8436_v34 = vadd.f32 %v8435_v63, %v8363_v14  ;;  %v8124_v20 = vpop.f32.mrb[172].mxu0  ;;  %v8213_v2 = vpop.f32.mrb[168].mxu1  ;;  %v8386_v25 = vrot.slane %v8385_v53, 2  ;;  %v8404_v33 = vrot.slane %v8403_v47, 2  ;;  %vm8490_vm1 = vcmask 253952  }
0x1422   : > { %v8368_v11 = vsel %vm14426_vm2, %v8124_v20, 0.0  ;;  %v8370_v57 = vsel %vm14446_vm13, %v8213_v2, 0.0  ;;  %v8126_v60 = vpop.f32.mrb[173].mxu0  ;;  %v8215_v46 = vpop.f32.mrb[169].mxu1  ;;  %v8378_v18 = vadd.f32 %v8377_v52, %v8376_v62  ;;  %v8396_v40 = vadd.f32 %v8395_v12, %v8394_v8 }
0x1423   : > { %v8410_v29 = vadd.f32 %v8409_v5, %v8368_v11  ;;  %v8428_v58 = vadd.f32 %v8427_v24, %v8370_v57  ;;  %v8369_v51 = vsel %vm14456_vm15, %v8126_v60, 0.0  ;;  %v8371_v56 = vsel %vm14472_vm10, %v8215_v46, 0.0 }
0x1424   : > { %v8419_v10 = vadd.f32 %v8418_v61, %v8369_v51  ;;  %v8437_v42 = vadd.f32 %v8436_v34, %v8371_v56  ;;  %v8387_v1 = vadd.f32 %v8386_v25, %v8385_v53  ;;  %v8405_v41 = vadd.f32 %v8404_v33, %v8403_v47 }
0x1425   : > { %v8411_v15 = vrot.slane %v8410_v29, 4  ;;  %v8429_v32 = vrot.slane %v8428_v58, 4  ;;  %v8379_v23 = vrot.slane %v8378_v18, 1  ;;  %v8397_v16 = vrot.slane %v8396_v40, 1 }
0x1426   : > { %v8420_v17 = vrot.slane %v8419_v10, 4  ;;  %v8438_v31 = vrot.slane %v8437_v42, 4  ;;  %v8388_v59 = vrot.slane %v8387_v1, 1  ;;  %v8406_v6 = vrot.slane %v8405_v41, 1 }
0x1427   : > { %v8412_v13 = vadd.f32 %v8411_v15, %v8410_v29  ;;  %v8430_v55 = vadd.f32 %v8429_v32, %v8428_v58  ;;  %v8380_v27 = vadd.f32 %v8379_v23, %v8378_v18  ;;  %v8398_v35 = vadd.f32 %v8397_v16, %v8396_v40 }
0x1428   : > { %v8421_v37 = vadd.f32 %v8420_v17, %v8419_v10  ;;  %v8439_v19 = vadd.f32 %v8438_v31, %v8437_v42  ;;  %v8389_v26 = vadd.f32 %v8388_v59, %v8387_v1  ;;  %v8407_v9 = vadd.f32 %v8406_v6, %v8405_v41  ;;  %v8489_v59 = vld [vmem:[%s14674_s23] sm:$0x1] }
0x1429   : > { %v8413_v39 = vrot.slane %v8412_v13, 2  ;;  %v8431_v38 = vrot.slane %v8430_v55, 2 }
0x142a   : > { %v8422_v49 = vrot.slane %v8421_v37, 2  ;;  %v8440_v45 = vrot.slane %v8439_v19, 2 }
0x142b   : > { %v8414_v48 = vadd.f32 %v8413_v39, %v8412_v13  ;;  %v8432_v43 = vadd.f32 %v8431_v38, %v8430_v55 }
0x142c   : > { %v8423_v21 = vadd.f32 %v8422_v49, %v8421_v37  ;;  %v8441_v44 = vadd.f32 %v8440_v45, %v8439_v19 }
0x142d   : > { %v8415_v54 = vrot.slane %v8414_v48, 1  ;;  %v8433_v3 = vrot.slane %v8432_v43, 1 }
0x142e   : > { %v8424_v63 = vrot.slane %v8423_v21, 1  ;;  %v8442_v50 = vrot.slane %v8441_v44, 1 }
0x142f   : > { %v8416_v62 = vadd.f32 %v8415_v54, %v8414_v48  ;;  %v8434_v8 = vadd.f32 %v8433_v3, %v8432_v43  ;;  %v8488_v48 = vld [vmem:[%s14673_s22] sm:$0x1]  ;;  %s11375_s22 = sshll.u32 %s11439_s0, 4  ;;  %s11376_s22 = int_to_ptr.vmem [resolvable:$false] %s11375_s22 }
0x1430   : > { %v8425_v36 = vadd.f32 %v8424_v63, %v8423_v21  ;;  %v8443_v4 = vadd.f32 %v8442_v50, %v8441_v44  ;;  %s11377_s1 = scalar_lea.vmem %s11376_s22, 32  ;;  %p11378_p0 = scmp.lt.s32.totalorder %s14500_s27, %s11376_s22 }
0x1431   : > { %v8444_v22 = vadd.f32 %v8416_v62, %v8380_v27  ;;  %v8446_v5 = vadd.f32 %v8434_v8, %v8398_v35  ;;  %p11379_p1 = scmp.lt.s32.totalorder %s11377_s1, %s11371_s25 }
0x1432   : > { %v8445_v24 = vadd.f32 %v8425_v36, %v8389_v26  ;;  %v8447_v0 = vadd.f32 %v8443_v4, %v8407_v9 }
0x1433   : > { %v8448_v53 = vadd.f32 %v8446_v5, %v8444_v22  ;;  %p11380_p2 = por %p11379_p1, %p11378_p0 }
0x1434   : > { %v8449_v47 = vadd.f32 %v8447_v0, %v8445_v24 }
0x1435   : > { %p11381_p3 = pnand %p11380_p2, %p11374_p13 }
0x1436   : > { %v8450_v28 = vadd.f32 %v8449_v47, %v8448_v53 }
0x1438   : > { %8452 = vrot.lane.b32.xlu1 %v8450_v28, %s11437_s20 }
0x14aa   : > { %v8453_v14 = vpop.permute.xlu1 %8452 }
0x14ab   : > { %v8455_v30 = vadd.f32 %v8453_v14, %v8450_v28 }
0x14ad   : > { %8457 = vrot.lane.b32.xlu1 %v8455_v30, %s11438_s21  ;;  %s14675_s21 = sld [smem:[#allocation17_spill]] }
0x14b3   : > { %s14498_s3 = scalar_lea.hbm %s14675_s21, %s9038_s29 }
0x151f   : > { %v8458_v61 = vpop.permute.xlu1 %8457 }
0x1520   : > { %v8460_v34 = vadd.f32 %v8458_v61, %v8455_v30 }
0x1522   : > { %v8462_v20 = vmul.f32 0.70710677, %v8460_v34  ;;  %v8461_v13 = vmul.f32 0.5, %v8460_v34 }
0x1524   : > { %v8465_v2 = vand.u32 2147483647, %v8462_v20  ;;  %vm8463_vm0 = vcmp.lt.f32.partialorder %v8462_v20, 0.0 }
0x1525   : > { %v8464_v18 = vsel %vm8463_vm0, -1.0, %v11435_v7 }
0x1526   : > { %v8466_v52 = vmul.f32 0.3275911, %v8465_v2  ;;  %v8479_v11 = vsub.f32 0.0, %v8465_v2 }
0x1528   : > { %v8467_v12 = vadd.f32 1.0, %v8466_v52  ;;  %v8480_v60 = vmul.f32 %v8479_v11, %v8465_v2 }
0x152a   : > { %11359 = vrcp.f32 %v8467_v12  ;;  %v8481_v58 = vmul.f32 1.442695, %v8480_v60 }
0x152c   : > { %11361 = vpow2.f32 %v8481_v58 }
0x1534   : > { %v11360_v57 = vpop.eup %11359 }
0x1535   : > { %v8470_v46 = vmul.f32 1.0614054, %v11360_v57 }
0x1536   : > { %v11362_v32 = vpop.eup %11361 }
0x1537   : > { %v8471_v29 = vadd.f32 -1.4531521, %v8470_v46 }
0x1539   : > { %v8472_v51 = vmul.f32 %v11360_v57, %v8471_v29 }
0x153b   : > { %v8473_v56 = vadd.f32 1.4214138, %v8472_v51 }
0x153d   : > { %v8474_v25 = vmul.f32 %v11360_v57, %v8473_v56 }
0x153f   : > { %v8475_v33 = vadd.f32 -0.28449672, %v8474_v25 }
0x1541   : > { %v8476_v10 = vmul.f32 %v11360_v57, %v8475_v33 }
0x1543   : > { %v8477_v42 = vadd.f32 0.2548296, %v8476_v10 }
0x1545   : > { %v8478_v15 = vmul.f32 %v11360_v57, %v8477_v42 }
0x1547   : > { %v8483_v17 = vmul.f32 %v11362_v32, %v8478_v15 }
0x1549   : > { %v8484_v31 = vsub.f32 1.0, %v8483_v17 }
0x154b   : > { %v8485_v40 = vmul.f32 %v8484_v31, %v8464_v18 }
0x154d   : > { %v8486_v55 = vadd.f32 1.0, %v8485_v40 }
0x154f   : > { %v8487_v1 = vmul.f32 %v8486_v55, %v8461_v13 }
0x1551   : > { %v8491_v41 = vsel %vm8490_vm1, %v8487_v1, 0.0 }
0x1552   : > { %8492 = vadd.xlane.f32.xlu1 %v8491_v41 }
0x15df   : > { %v8493_v37 = vpop.xlane.xlu1 %8492 }
0x15e0   : > { %v8494_v19 = vmul.f32 0.03125, %v8493_v37 }
0x15e2   : > { %v8495_v39 = vsub.f32 %v8487_v1, %v8494_v19 }
0x15e4   : > { %v8496_v38 = vmul.f32 %v8495_v39, %v8495_v39 }
0x15e6   : > { %v8497_v49 = vsel %vm8490_vm1, %v8496_v38, 0.0 }
0x15e7   : > { %8498 = vadd.xlane.f32.xlu1 %v8497_v49 }
0x1674   : > { %v8499_v45 = vpop.xlane.xlu1 %8498 }
0x1675   : > { %v8500_v23 = vmul.f32 0.03125, %v8499_v45 }
0x1677   : > { %v8501_v7 = vadd.f32 1e-06, %v8500_v23 }
0x1679   : > { %11363 = vrsqrt.f32 %v8501_v7 }
0x1683   : > { %v11364_v16 = vpop.eup %11363 }
0x1684   : > { %v8503_v43 = vmul.f32 %v11364_v16, %v8495_v39 }
0x1686   : > { %v8504_v6 = vmul.f32 %v8503_v43, %v8488_v48 }
0x1688   : > { %v8505_v21 = vadd.f32 %v8504_v6, %v8489_v59 }
0x168a   : > { %8506 = vst.msk [vmem:[%s567_s26] sm:$0x1] %vm8490_vm1, %v8505_v21 }
0x168b   : > { %11384 = shalt.err (!%p11381_p3)
}
0x168c   : > { %s11385_s16 = scalar_lea.hbm %s14498_s3, 16  ;;  %s11389_s29 = scalar_lea.hbm %s14675_s21, 32 }
0x168d   : > { %p11386_p4 = scmp.ne.s32.totalorder %s14498_s3, %s11385_s16  ;;  %p11390_p9 = scmp.lt.u32.totalorder %s14498_s3, %s14675_s21 }
0x168e   : > { %p11391_p10 = scmp.lt.u32.totalorder %s11389_s29, %s11385_s16  ;;  %p11393_p12 = scmp.lt.u32.totalorder %s11385_s16, %s14498_s3 }
0x168f   : > { %p11387_p7 = pnand %p11386_p4, %p11573_p5 }
0x1690   : > { %p11392_p11 = por %p11391_p10, %p11390_p9 }
0x1691   : > { %p11388_p8 = pneg %p11387_p7 }
0x1692   : > { %p11394_p13 = por %p11393_p12, %p11392_p11 }
0x1694   : > { %p11395_p0 = pnand %p11394_p13, %p11388_p8 }
0x1696   : > { %11398 = shalt.err (!%p11395_p0)
}
0x1697   : > { %11028 = dma.vmem_to_hbm [thread:$0]  (%p11573_p5), %s14500_s27, 16, %s14498_s3, %s8508_s17  }
0x1698 PF: > { %s14676_s20 = sld [smem:[#allocation7_spill]]  ;;  %s14677_s25 = sld [smem:[#allocation5_spill]] }
0x169e   : > { %p11034_p1 = scmp.ge.s32.totalorder %s14676_s20, 2  ;;  %s8532_s22 = sand.u32 1, %s14677_s25  }
0x169f   : > { %s8533_s1 = scalar_lea.sflag [#allocation3], %s8532_s22 }
0x16a0   : > { %p11031_p2 = pnand %p11034_p1, %p11577_p6 }
0x16a2   : > { %11416 = dma.done.wait (!%p11031_p2), %s8533_s1, 16  }
0x16a3   : > { %11418 = vsyncadd (!%p11031_p2), %s8533_s1, 4294967280  ;;  %s14679_s30 = sld [smem:[#allocation8_spill]]  ;;  %s14680_s16 = sld [smem:[#allocation6_spill]] }
0x16a4   : > { %s14681_s29 = sld [smem:[#allocation9_spill]]  ;;  %s14682_s27 = smov %s11425_s28 }
0x16a9   : > { %p28_p3 = scmp.ge.s32.totalorder %s14679_s30, 4   ;;  %s14683_s28 = smov %s14680_s16 }
0x16ab   :  { %30 = sbr.rel (!%p28_p3) target bundleno = 11 (0xb), region = 139 }
0x16b2   :  { %8537 = vsyncpa [#allocation3], 1 }
0x16b3   :  { %8539 = vsyncpa [#allocation3 + $0x1], 1 }

</bundles_post_ra>
